<compile_context>
chip_gen: v5e
topology: v5e:2x2
jax: 0.10.0
libtpu: 0.0.40
codegen_flags: <defaults>
</compile_context>

<pallas_src>
import numpy as np
import jax
import jax.numpy as jnp
from jax import lax
from jax.experimental import pallas as pl
from jax.experimental.pallas import tpu as pltpu

POOL_K, POOL_PAD = 7, 3       # AvgPool2d(7, 1, 3), count_include_pad -> /49
DW_K, DW_PAD = 11, 5          # depthwise (1,11)/(11,1) convs, pad 5


def _make_caa_kernel(H, W):
    """Kernel factory: H, W static; in-kernel layout is (C, P) with P = H*W lane-dense."""
    P = H * W

    def kernel(x_ref, m_ref, w1_ref, b1_ref, hwm_ref, hb_ref,
               vwm_ref, vb_ref, w2_ref, b2_ref, o_ref):
        x = x_ref[0]                                           # (C, P) f32

        # ---- AvgPool2d(7, 1, 3), count_include_pad: one MXU matmul (1/49 folded in M) ----
        pooled = jnp.dot(x, m_ref[...], preferred_element_type=jnp.float32)

        # ---- conv1: 1x1 conv (BN scale pre-folded) + bias + SiLU ----
        t = jnp.dot(w1_ref[...], pooled, preferred_element_type=jnp.float32)
        t = t + b1_ref[...]
        t = t * jax.nn.sigmoid(t)                              # SiLU

        # ---- h_conv: depthwise (1, 11), pad (0, 5); weight*edge-mask pre-combined ----
        h_out = t * hwm_ref[DW_PAD]                            # center tap, no roll
        for k in range(DW_K):
            d = k - DW_PAD
            if d == 0:
                continue
            h_out = h_out + pltpu.roll(t, (-d) % P, axis=1) * hwm_ref[k]
        h_out = h_out + hb_ref[...]

        # ---- v_conv: depthwise (11, 1), pad (5, 0); weight*edge-mask pre-combined ----
        v_out = h_out * vwm_ref[DW_PAD]
        for k in range(DW_K):
            d = k - DW_PAD
            if d == 0:
                continue
            v_out = v_out + pltpu.roll(h_out, (-d * W) % P, axis=1) * vwm_ref[k]
        v_out = v_out + vb_ref[...]

        # ---- conv2: 1x1 conv (BN folded) + bias + SiLU, sigmoid attn, modulate ----
        u = jnp.dot(w2_ref[...], v_out, preferred_element_type=jnp.float32)
        u = u + b2_ref[...]
        u = u * jax.nn.sigmoid(u)                              # SiLU
        # Re-read x from VMEM (keeps x's vregs from being live across the body).
        o_ref[0] = x_ref[0] * jax.nn.sigmoid(u)

    return kernel


def caa_pallas(x_nchw, p):
    """PyTorch-style entry point: NCHW in, NCHW out (minor-dim reshapes only)."""
    N, C, H, W = x_nchw.shape
    P = H * W
    x = x_nchw.reshape(N, C, P).astype(jnp.float32)

    # Fold inference-mode BN scale into the 1x1 conv weights (per-output-channel row scale).
    w1_eff = (p["w1"] * p["bn1_scale"]).astype(jnp.float32)        # (C, C)
    w2_eff = (p["w2"] * p["bn2_scale"]).astype(jnp.float32)

    # --- Pool matrix M (P, P): M[p, q] = 1/49 if p is inside the 7x7 window of q, else 0. ---
    h_pos = np.repeat(np.arange(H), W)                             # (P,)
    w_pos = np.tile(np.arange(W), H)                               # (P,)
    dh = np.abs(h_pos[:, None] - h_pos[None, :])
    dw = np.abs(w_pos[:, None] - w_pos[None, :])
    M = jnp.asarray(((dh <= POOL_PAD) & (dw <= POOL_PAD)).astype(np.float32)
                    / float(POOL_K * POOL_K))                      # (P, P)

    # --- Pre-combined depthwise weight * zero-padding edge mask tables (11, C, P). ---
    offs = np.arange(-DW_PAD, DW_PAD + 1)                          # (11,)
    w_masks = ((w_pos[None, :] + offs[:, None] >= 0)
               & (w_pos[None, :] + offs[:, None] < W)).astype(np.float32)   # (11, P)
    h_masks = ((h_pos[None, :] + offs[:, None] >= 0)
               & (h_pos[None, :] + offs[:, None] < H)).astype(np.float32)   # (11, P)
    hwm = (p["hw"].T[:, :, None] * jnp.asarray(w_masks)[:, None, :]).astype(jnp.float32)  # (11,C,P)
    vwm = (p["vw"].T[:, :, None] * jnp.asarray(h_masks)[:, None, :]).astype(jnp.float32)  # (11,C,P)

    kernel = _make_caa_kernel(H, W)

    consts = (M, w1_eff, p["bn1_bias"], hwm, p["hb"], vwm, p["vb"], w2_eff, p["bn2_bias"])

    def full(a):
        zeros = (0,) * a.ndim
        return pl.BlockSpec(a.shape, lambda n, _z=zeros: _z)

    # VMEM budget from actual buffer inventory (constants are double-buffered by the
    # pipeline, plus in/out blocks and ~12 live (C, P) intermediates), clamped below
    # v7x's 64 MiB physical VMEM.
    def nbytes(a):
        return int(np.prod(a.shape)) * jnp.dtype(a.dtype).itemsize
    block_bytes = C * P * 4
    inventory = 2 * sum(nbytes(a) for a in consts) + 4 * block_bytes + 12 * block_bytes
    vmem_limit = int(min(48 * 2**20, max(16 * 2**20, inventory + (4 << 20))))

    out = pl.pallas_call(
        kernel,
        out_shape=jax.ShapeDtypeStruct((N, C, P), jnp.float32),
        grid=(N,),
        in_specs=[pl.BlockSpec((1, C, P), lambda n: (n, 0, 0))]
                 + [full(a) for a in consts],
        out_specs=pl.BlockSpec((1, C, P), lambda n: (n, 0, 0)),
        compiler_params=pltpu.CompilerParams(
            dimension_semantics=("parallel",),
            vmem_limit_bytes=vmem_limit),
    )(x, *consts)
    return out.reshape(N, C, H, W)


# ----------------------- pure-JAX reference (for verification) -----------------------
def caa_reference(x, p):
    N, C, H, W = x.shape

    def conv(v, w, padding, groups=1):
        return lax.conv_general_dilated(
            v, w, (1, 1), padding,
            dimension_numbers=("NCHW", "OIHW", "NCHW"),
            feature_group_count=groups, precision=lax.Precision.HIGHEST)

    s = lax.reduce_window(x, 0.0, lax.add, (1, 1, POOL_K, POOL_K), (1, 1, 1, 1),
                          [(0, 0), (0, 0), (POOL_PAD, POOL_PAD), (POOL_PAD, POOL_PAD)])
    pooled = s / float(POOL_K * POOL_K)

    t = conv(pooled, p["w1"].reshape(C, C, 1, 1), [(0, 0), (0, 0)])
    t = t * p["bn1_scale"].reshape(1, C, 1, 1) + p["bn1_bias"].reshape(1, C, 1, 1)
    t = t * jax.nn.sigmoid(t)
    h = conv(t, p["hw"].reshape(C, 1, 1, DW_K), [(0, 0), (DW_PAD, DW_PAD)], groups=C)
    h = h + p["hb"].reshape(1, C, 1, 1)
    v = conv(h, p["vw"].reshape(C, 1, DW_K, 1), [(DW_PAD, DW_PAD), (0, 0)], groups=C)
    v = v + p["vb"].reshape(1, C, 1, 1)
    u = conv(v, p["w2"].reshape(C, C, 1, 1), [(0, 0), (0, 0)])
    u = u * p["bn2_scale"].reshape(1, C, 1, 1) + p["bn2_bias"].reshape(1, C, 1, 1)
    u = u * jax.nn.sigmoid(u)
    return x * jax.nn.sigmoid(u)


# ----------------------- deterministic parameter construction -----------------------
def make_params(key, C, eps=0.001):
    ks = jax.random.split(key, 16)

    def fold_bn(gamma, beta, mean, var):
        scale = gamma / jnp.sqrt(var + eps)
        bias = beta - mean * scale
        return (scale.reshape(C, 1).astype(jnp.float32),
                bias.reshape(C, 1).astype(jnp.float32))

    bn1_scale, bn1_bias = fold_bn(
        1.0 + 0.1 * jax.random.normal(ks[1], (C,)),
        0.1 * jax.random.normal(ks[2], (C,)),
        0.05 * jax.random.normal(ks[3], (C,)),
        jax.random.uniform(ks[4], (C,), minval=0.5, maxval=1.5))
    bn2_scale, bn2_bias = fold_bn(
        1.0 + 0.1 * jax.random.normal(ks[5], (C,)),
        0.1 * jax.random.normal(ks[6], (C,)),
        0.05 * jax.random.normal(ks[7], (C,)),
        jax.random.uniform(ks[8], (C,), minval=0.5, maxval=1.5))

    return dict(
        w1=0.2 * jax.random.normal(ks[0], (C, C), jnp.float32),      # (Cout, Cin)
        bn1_scale=bn1_scale, bn1_bias=bn1_bias,
        hw=0.2 * jax.random.normal(ks[9], (C, DW_K), jnp.float32),   # per-channel taps
        hb=0.1 * jax.random.normal(ks[10], (C, 1), jnp.float32),
        vw=0.2 * jax.random.normal(ks[11], (C, DW_K), jnp.float32),
        vb=0.1 * jax.random.normal(ks[12], (C, 1), jnp.float32),
        w2=0.2 * jax.random.normal(ks[13], (C, C), jnp.float32),     # (Cout, Cin)
        bn2_scale=bn2_scale, bn2_bias=bn2_bias,
    )


if __name__ == "__main__":
    N, C, H, W = 2, 32, 16, 16            # small, consistent with CAA(channels=32)
    key = jax.random.PRNGKey(0)
    k_x, k_p = jax.random.split(key)
    x_nchw = jax.random.normal(k_x, (N, C, H, W), jnp.float32)
    params = make_params(k_p, C)

    out = jax.block_until_ready(caa_pallas(x_nchw, params))

    ref = caa_reference(x_nchw, params)
    np.testing.assert_allclose(np.asarray(out), np.asarray(ref), rtol=1e-3, atol=1e-3)

    print("KERNEL_OK")
</pallas_src>

<mosaic_0001>
module attributes {stable_mosaic.version = 11 : i64} {
  func.func @kernel(%arg0: i32, %arg1: memref<1x32x256xf32, #tpu.memory_space<vmem>>, %arg2: memref<256x256xf32, #tpu.memory_space<vmem>>, %arg3: memref<32x32xf32, #tpu.memory_space<vmem>>, %arg4: memref<32x1xf32, #tpu.memory_space<vmem>>, %arg5: memref<11x32x256xf32, #tpu.memory_space<vmem>>, %arg6: memref<32x1xf32, #tpu.memory_space<vmem>>, %arg7: memref<11x32x256xf32, #tpu.memory_space<vmem>>, %arg8: memref<32x1xf32, #tpu.memory_space<vmem>>, %arg9: memref<32x32xf32, #tpu.memory_space<vmem>>, %arg10: memref<32x1xf32, #tpu.memory_space<vmem>>, %arg11: memref<1x32x256xf32, #tpu.memory_space<vmem>>) attributes {dimension_semantics = [#tpu.dimension_semantics<parallel>], iteration_bounds = array<i64: 2>, scalar_prefetch = 0 : i64, scratch_operands = 0 : i64, tpu.core_type = #tpu.core_type<tc>, window_params = [{transform_indices = @transform_0, window_bounds = array<i64: 1, 32, 256>}, {pipeline_mode = #tpu.pipeline_mode<synchronous>, transform_indices = @transform_1, window_bounds = array<i64: 256, 256>}, {pipeline_mode = #tpu.pipeline_mode<synchronous>, transform_indices = @transform_2, window_bounds = array<i64: 32, 32>}, {pipeline_mode = #tpu.pipeline_mode<synchronous>, transform_indices = @transform_3, window_bounds = array<i64: 32, 1>}, {pipeline_mode = #tpu.pipeline_mode<synchronous>, transform_indices = @transform_4, window_bounds = array<i64: 11, 32, 256>}, {pipeline_mode = #tpu.pipeline_mode<synchronous>, transform_indices = @transform_5, window_bounds = array<i64: 32, 1>}, {pipeline_mode = #tpu.pipeline_mode<synchronous>, transform_indices = @transform_6, window_bounds = array<i64: 11, 32, 256>}, {pipeline_mode = #tpu.pipeline_mode<synchronous>, transform_indices = @transform_7, window_bounds = array<i64: 32, 1>}, {pipeline_mode = #tpu.pipeline_mode<synchronous>, transform_indices = @transform_8, window_bounds = array<i64: 32, 32>}, {pipeline_mode = #tpu.pipeline_mode<synchronous>, transform_indices = @transform_9, window_bounds = array<i64: 32, 1>}, {transform_indices = @transform_10, window_bounds = array<i64: 1, 32, 256>}]} {
    %c0 = arith.constant 0 : index
    %c0_0 = arith.constant 0 : index
    %c0_1 = arith.constant 0 : index
    %0 = vector.load %arg1[%c0, %c0_0, %c0_1] : memref<1x32x256xf32, #tpu.memory_space<vmem>>, vector<1x32x256xf32>
    %1 = vector.shape_cast %0 : vector<1x32x256xf32> to vector<32x256xf32>
    %c0_2 = arith.constant 0 : index
    %c0_3 = arith.constant 0 : index
    %2 = vector.load %arg2[%c0_2, %c0_3] : memref<256x256xf32, #tpu.memory_space<vmem>>, vector<256x256xf32>
    %cst = arith.constant dense<0.000000e+00> : vector<32x256xf32>
    %3 = tpu.matmul %1, %2, %cst {dimension_numbers = #tpu.dot_dimension_numbers<[1], [0], [0], [1], [0, 0, 1, 1], [], []>} : vector<32x256xf32>, vector<256x256xf32>, vector<32x256xf32> -> vector<32x256xf32>
    %c0_4 = arith.constant 0 : index
    %c0_5 = arith.constant 0 : index
    %4 = vector.load %arg3[%c0_4, %c0_5] : memref<32x32xf32, #tpu.memory_space<vmem>>, vector<32x32xf32>
    %cst_6 = arith.constant dense<0.000000e+00> : vector<32x256xf32>
    %5 = tpu.matmul %4, %3, %cst_6 {dimension_numbers = #tpu.dot_dimension_numbers<[1], [0], [0], [1], [0, 0, 1, 1], [], []>} : vector<32x32xf32>, vector<32x256xf32>, vector<32x256xf32> -> vector<32x256xf32>
    %c0_7 = arith.constant 0 : index
    %c0_8 = arith.constant 0 : index
    %6 = vector.load %arg4[%c0_7, %c0_8] : memref<32x1xf32, #tpu.memory_space<vmem>>, vector<32x1xf32>
    %7 = vector.broadcast %6 : vector<32x1xf32> to vector<32x256xf32>
    %8 = arith.addf %5, %7 : vector<32x256xf32>
    %9 = arith.negf %8 : vector<32x256xf32>
    %10 = math.exp %9 : vector<32x256xf32>
    %cst_9 = arith.constant 1.000000e+00 : f32
    %11 = vector.broadcast %cst_9 : f32 to vector<32x256xf32>
    %12 = arith.addf %11, %10 : vector<32x256xf32>
    %13 = arith.divf %11, %12 : vector<32x256xf32>
    %14 = arith.mulf %8, %13 : vector<32x256xf32>
    %c5 = arith.constant 5 : index
    %c0_10 = arith.constant 0 : index
    %c0_11 = arith.constant 0 : index
    %15 = vector.load %arg5[%c5, %c0_10, %c0_11] : memref<11x32x256xf32, #tpu.memory_space<vmem>>, vector<1x32x256xf32>
    %16 = vector.shape_cast %15 : vector<1x32x256xf32> to vector<32x256xf32>
    %17 = arith.mulf %14, %16 : vector<32x256xf32>
    %c5_i32 = arith.constant 5 : i32
    %18 = tpu.dynamic_rotate %14 by %c5_i32 dim 1 : vector<32x256xf32>, i32 -> vector<32x256xf32>
    %c0_12 = arith.constant 0 : index
    %c0_13 = arith.constant 0 : index
    %c0_14 = arith.constant 0 : index
    %19 = vector.load %arg5[%c0_12, %c0_13, %c0_14] : memref<11x32x256xf32, #tpu.memory_space<vmem>>, vector<1x32x256xf32>
    %20 = vector.shape_cast %19 : vector<1x32x256xf32> to vector<32x256xf32>
    %21 = arith.mulf %18, %20 : vector<32x256xf32>
    %22 = arith.addf %17, %21 : vector<32x256xf32>
    %c4_i32 = arith.constant 4 : i32
    %23 = tpu.dynamic_rotate %14 by %c4_i32 dim 1 : vector<32x256xf32>, i32 -> vector<32x256xf32>
    %c1 = arith.constant 1 : index
    %c0_15 = arith.constant 0 : index
    %c0_16 = arith.constant 0 : index
    %24 = vector.load %arg5[%c1, %c0_15, %c0_16] : memref<11x32x256xf32, #tpu.memory_space<vmem>>, vector<1x32x256xf32>
    %25 = vector.shape_cast %24 : vector<1x32x256xf32> to vector<32x256xf32>
    %26 = arith.mulf %23, %25 : vector<32x256xf32>
    %27 = arith.addf %22, %26 : vector<32x256xf32>
    %c3_i32 = arith.constant 3 : i32
    %28 = tpu.dynamic_rotate %14 by %c3_i32 dim 1 : vector<32x256xf32>, i32 -> vector<32x256xf32>
    %c2 = arith.constant 2 : index
    %c0_17 = arith.constant 0 : index
    %c0_18 = arith.constant 0 : index
    %29 = vector.load %arg5[%c2, %c0_17, %c0_18] : memref<11x32x256xf32, #tpu.memory_space<vmem>>, vector<1x32x256xf32>
    %30 = vector.shape_cast %29 : vector<1x32x256xf32> to vector<32x256xf32>
    %31 = arith.mulf %28, %30 : vector<32x256xf32>
    %32 = arith.addf %27, %31 : vector<32x256xf32>
    %c2_i32 = arith.constant 2 : i32
    %33 = tpu.dynamic_rotate %14 by %c2_i32 dim 1 : vector<32x256xf32>, i32 -> vector<32x256xf32>
    %c3 = arith.constant 3 : index
    %c0_19 = arith.constant 0 : index
    %c0_20 = arith.constant 0 : index
    %34 = vector.load %arg5[%c3, %c0_19, %c0_20] : memref<11x32x256xf32, #tpu.memory_space<vmem>>, vector<1x32x256xf32>
    %35 = vector.shape_cast %34 : vector<1x32x256xf32> to vector<32x256xf32>
    %36 = arith.mulf %33, %35 : vector<32x256xf32>
    %37 = arith.addf %32, %36 : vector<32x256xf32>
    %c1_i32 = arith.constant 1 : i32
    %38 = tpu.dynamic_rotate %14 by %c1_i32 dim 1 : vector<32x256xf32>, i32 -> vector<32x256xf32>
    %c4 = arith.constant 4 : index
    %c0_21 = arith.constant 0 : index
    %c0_22 = arith.constant 0 : index
    %39 = vector.load %arg5[%c4, %c0_21, %c0_22] : memref<11x32x256xf32, #tpu.memory_space<vmem>>, vector<1x32x256xf32>
    %40 = vector.shape_cast %39 : vector<1x32x256xf32> to vector<32x256xf32>
    %41 = arith.mulf %38, %40 : vector<32x256xf32>
    %42 = arith.addf %37, %41 : vector<32x256xf32>
    %c255_i32 = arith.constant 255 : i32
    %43 = tpu.dynamic_rotate %14 by %c255_i32 dim 1 : vector<32x256xf32>, i32 -> vector<32x256xf32>
    %c6 = arith.constant 6 : index
    %c0_23 = arith.constant 0 : index
    %c0_24 = arith.constant 0 : index
    %44 = vector.load %arg5[%c6, %c0_23, %c0_24] : memref<11x32x256xf32, #tpu.memory_space<vmem>>, vector<1x32x256xf32>
    %45 = vector.shape_cast %44 : vector<1x32x256xf32> to vector<32x256xf32>
    %46 = arith.mulf %43, %45 : vector<32x256xf32>
    %47 = arith.addf %42, %46 : vector<32x256xf32>
    %c254_i32 = arith.constant 254 : i32
    %48 = tpu.dynamic_rotate %14 by %c254_i32 dim 1 : vector<32x256xf32>, i32 -> vector<32x256xf32>
    %c7 = arith.constant 7 : index
    %c0_25 = arith.constant 0 : index
    %c0_26 = arith.constant 0 : index
    %49 = vector.load %arg5[%c7, %c0_25, %c0_26] : memref<11x32x256xf32, #tpu.memory_space<vmem>>, vector<1x32x256xf32>
    %50 = vector.shape_cast %49 : vector<1x32x256xf32> to vector<32x256xf32>
    %51 = arith.mulf %48, %50 : vector<32x256xf32>
    %52 = arith.addf %47, %51 : vector<32x256xf32>
    %c253_i32 = arith.constant 253 : i32
    %53 = tpu.dynamic_rotate %14 by %c253_i32 dim 1 : vector<32x256xf32>, i32 -> vector<32x256xf32>
    %c8 = arith.constant 8 : index
    %c0_27 = arith.constant 0 : index
    %c0_28 = arith.constant 0 : index
    %54 = vector.load %arg5[%c8, %c0_27, %c0_28] : memref<11x32x256xf32, #tpu.memory_space<vmem>>, vector<1x32x256xf32>
    %55 = vector.shape_cast %54 : vector<1x32x256xf32> to vector<32x256xf32>
    %56 = arith.mulf %53, %55 : vector<32x256xf32>
    %57 = arith.addf %52, %56 : vector<32x256xf32>
    %c252_i32 = arith.constant 252 : i32
    %58 = tpu.dynamic_rotate %14 by %c252_i32 dim 1 : vector<32x256xf32>, i32 -> vector<32x256xf32>
    %c9 = arith.constant 9 : index
    %c0_29 = arith.constant 0 : index
    %c0_30 = arith.constant 0 : index
    %59 = vector.load %arg5[%c9, %c0_29, %c0_30] : memref<11x32x256xf32, #tpu.memory_space<vmem>>, vector<1x32x256xf32>
    %60 = vector.shape_cast %59 : vector<1x32x256xf32> to vector<32x256xf32>
    %61 = arith.mulf %58, %60 : vector<32x256xf32>
    %62 = arith.addf %57, %61 : vector<32x256xf32>
    %c251_i32 = arith.constant 251 : i32
    %63 = tpu.dynamic_rotate %14 by %c251_i32 dim 1 : vector<32x256xf32>, i32 -> vector<32x256xf32>
    %c10 = arith.constant 10 : index
    %c0_31 = arith.constant 0 : index
    %c0_32 = arith.constant 0 : index
    %64 = vector.load %arg5[%c10, %c0_31, %c0_32] : memref<11x32x256xf32, #tpu.memory_space<vmem>>, vector<1x32x256xf32>
    %65 = vector.shape_cast %64 : vector<1x32x256xf32> to vector<32x256xf32>
    %66 = arith.mulf %63, %65 : vector<32x256xf32>
    %67 = arith.addf %62, %66 : vector<32x256xf32>
    %c0_33 = arith.constant 0 : index
    %c0_34 = arith.constant 0 : index
    %68 = vector.load %arg6[%c0_33, %c0_34] : memref<32x1xf32, #tpu.memory_space<vmem>>, vector<32x1xf32>
    %69 = vector.broadcast %68 : vector<32x1xf32> to vector<32x256xf32>
    %70 = arith.addf %67, %69 : vector<32x256xf32>
    %c5_35 = arith.constant 5 : index
    %c0_36 = arith.constant 0 : index
    %c0_37 = arith.constant 0 : index
    %71 = vector.load %arg7[%c5_35, %c0_36, %c0_37] : memref<11x32x256xf32, #tpu.memory_space<vmem>>, vector<1x32x256xf32>
    %72 = vector.shape_cast %71 : vector<1x32x256xf32> to vector<32x256xf32>
    %73 = arith.mulf %70, %72 : vector<32x256xf32>
    %c80_i32 = arith.constant 80 : i32
    %74 = tpu.dynamic_rotate %70 by %c80_i32 dim 1 : vector<32x256xf32>, i32 -> vector<32x256xf32>
    %c0_38 = arith.constant 0 : index
    %c0_39 = arith.constant 0 : index
    %c0_40 = arith.constant 0 : index
    %75 = vector.load %arg7[%c0_38, %c0_39, %c0_40] : memref<11x32x256xf32, #tpu.memory_space<vmem>>, vector<1x32x256xf32>
    %76 = vector.shape_cast %75 : vector<1x32x256xf32> to vector<32x256xf32>
    %77 = arith.mulf %74, %76 : vector<32x256xf32>
    %78 = arith.addf %73, %77 : vector<32x256xf32>
    %c64_i32 = arith.constant 64 : i32
    %79 = tpu.dynamic_rotate %70 by %c64_i32 dim 1 : vector<32x256xf32>, i32 -> vector<32x256xf32>
    %c1_41 = arith.constant 1 : index
    %c0_42 = arith.constant 0 : index
    %c0_43 = arith.constant 0 : index
    %80 = vector.load %arg7[%c1_41, %c0_42, %c0_43] : memref<11x32x256xf32, #tpu.memory_space<vmem>>, vector<1x32x256xf32>
    %81 = vector.shape_cast %80 : vector<1x32x256xf32> to vector<32x256xf32>
    %82 = arith.mulf %79, %81 : vector<32x256xf32>
    %83 = arith.addf %78, %82 : vector<32x256xf32>
    %c48_i32 = arith.constant 48 : i32
    %84 = tpu.dynamic_rotate %70 by %c48_i32 dim 1 : vector<32x256xf32>, i32 -> vector<32x256xf32>
    %c2_44 = arith.constant 2 : index
    %c0_45 = arith.constant 0 : index
    %c0_46 = arith.constant 0 : index
    %85 = vector.load %arg7[%c2_44, %c0_45, %c0_46] : memref<11x32x256xf32, #tpu.memory_space<vmem>>, vector<1x32x256xf32>
    %86 = vector.shape_cast %85 : vector<1x32x256xf32> to vector<32x256xf32>
    %87 = arith.mulf %84, %86 : vector<32x256xf32>
    %88 = arith.addf %83, %87 : vector<32x256xf32>
    %c32_i32 = arith.constant 32 : i32
    %89 = tpu.dynamic_rotate %70 by %c32_i32 dim 1 : vector<32x256xf32>, i32 -> vector<32x256xf32>
    %c3_47 = arith.constant 3 : index
    %c0_48 = arith.constant 0 : index
    %c0_49 = arith.constant 0 : index
    %90 = vector.load %arg7[%c3_47, %c0_48, %c0_49] : memref<11x32x256xf32, #tpu.memory_space<vmem>>, vector<1x32x256xf32>
    %91 = vector.shape_cast %90 : vector<1x32x256xf32> to vector<32x256xf32>
    %92 = arith.mulf %89, %91 : vector<32x256xf32>
    %93 = arith.addf %88, %92 : vector<32x256xf32>
    %c16_i32 = arith.constant 16 : i32
    %94 = tpu.dynamic_rotate %70 by %c16_i32 dim 1 : vector<32x256xf32>, i32 -> vector<32x256xf32>
    %c4_50 = arith.constant 4 : index
    %c0_51 = arith.constant 0 : index
    %c0_52 = arith.constant 0 : index
    %95 = vector.load %arg7[%c4_50, %c0_51, %c0_52] : memref<11x32x256xf32, #tpu.memory_space<vmem>>, vector<1x32x256xf32>
    %96 = vector.shape_cast %95 : vector<1x32x256xf32> to vector<32x256xf32>
    %97 = arith.mulf %94, %96 : vector<32x256xf32>
    %98 = arith.addf %93, %97 : vector<32x256xf32>
    %c240_i32 = arith.constant 240 : i32
    %99 = tpu.dynamic_rotate %70 by %c240_i32 dim 1 : vector<32x256xf32>, i32 -> vector<32x256xf32>
    %c6_53 = arith.constant 6 : index
    %c0_54 = arith.constant 0 : index
    %c0_55 = arith.constant 0 : index
    %100 = vector.load %arg7[%c6_53, %c0_54, %c0_55] : memref<11x32x256xf32, #tpu.memory_space<vmem>>, vector<1x32x256xf32>
    %101 = vector.shape_cast %100 : vector<1x32x256xf32> to vector<32x256xf32>
    %102 = arith.mulf %99, %101 : vector<32x256xf32>
    %103 = arith.addf %98, %102 : vector<32x256xf32>
    %c224_i32 = arith.constant 224 : i32
    %104 = tpu.dynamic_rotate %70 by %c224_i32 dim 1 : vector<32x256xf32>, i32 -> vector<32x256xf32>
    %c7_56 = arith.constant 7 : index
    %c0_57 = arith.constant 0 : index
    %c0_58 = arith.constant 0 : index
    %105 = vector.load %arg7[%c7_56, %c0_57, %c0_58] : memref<11x32x256xf32, #tpu.memory_space<vmem>>, vector<1x32x256xf32>
    %106 = vector.shape_cast %105 : vector<1x32x256xf32> to vector<32x256xf32>
    %107 = arith.mulf %104, %106 : vector<32x256xf32>
    %108 = arith.addf %103, %107 : vector<32x256xf32>
    %c208_i32 = arith.constant 208 : i32
    %109 = tpu.dynamic_rotate %70 by %c208_i32 dim 1 : vector<32x256xf32>, i32 -> vector<32x256xf32>
    %c8_59 = arith.constant 8 : index
    %c0_60 = arith.constant 0 : index
    %c0_61 = arith.constant 0 : index
    %110 = vector.load %arg7[%c8_59, %c0_60, %c0_61] : memref<11x32x256xf32, #tpu.memory_space<vmem>>, vector<1x32x256xf32>
    %111 = vector.shape_cast %110 : vector<1x32x256xf32> to vector<32x256xf32>
    %112 = arith.mulf %109, %111 : vector<32x256xf32>
    %113 = arith.addf %108, %112 : vector<32x256xf32>
    %c192_i32 = arith.constant 192 : i32
    %114 = tpu.dynamic_rotate %70 by %c192_i32 dim 1 : vector<32x256xf32>, i32 -> vector<32x256xf32>
    %c9_62 = arith.constant 9 : index
    %c0_63 = arith.constant 0 : index
    %c0_64 = arith.constant 0 : index
    %115 = vector.load %arg7[%c9_62, %c0_63, %c0_64] : memref<11x32x256xf32, #tpu.memory_space<vmem>>, vector<1x32x256xf32>
    %116 = vector.shape_cast %115 : vector<1x32x256xf32> to vector<32x256xf32>
    %117 = arith.mulf %114, %116 : vector<32x256xf32>
    %118 = arith.addf %113, %117 : vector<32x256xf32>
    %c176_i32 = arith.constant 176 : i32
    %119 = tpu.dynamic_rotate %70 by %c176_i32 dim 1 : vector<32x256xf32>, i32 -> vector<32x256xf32>
    %c10_65 = arith.constant 10 : index
    %c0_66 = arith.constant 0 : index
    %c0_67 = arith.constant 0 : index
    %120 = vector.load %arg7[%c10_65, %c0_66, %c0_67] : memref<11x32x256xf32, #tpu.memory_space<vmem>>, vector<1x32x256xf32>
    %121 = vector.shape_cast %120 : vector<1x32x256xf32> to vector<32x256xf32>
    %122 = arith.mulf %119, %121 : vector<32x256xf32>
    %123 = arith.addf %118, %122 : vector<32x256xf32>
    %c0_68 = arith.constant 0 : index
    %c0_69 = arith.constant 0 : index
    %124 = vector.load %arg8[%c0_68, %c0_69] : memref<32x1xf32, #tpu.memory_space<vmem>>, vector<32x1xf32>
    %125 = vector.broadcast %124 : vector<32x1xf32> to vector<32x256xf32>
    %126 = arith.addf %123, %125 : vector<32x256xf32>
    %c0_70 = arith.constant 0 : index
    %c0_71 = arith.constant 0 : index
    %127 = vector.load %arg9[%c0_70, %c0_71] : memref<32x32xf32, #tpu.memory_space<vmem>>, vector<32x32xf32>
    %cst_72 = arith.constant dense<0.000000e+00> : vector<32x256xf32>
    %128 = tpu.matmul %127, %126, %cst_72 {dimension_numbers = #tpu.dot_dimension_numbers<[1], [0], [0], [1], [0, 0, 1, 1], [], []>} : vector<32x32xf32>, vector<32x256xf32>, vector<32x256xf32> -> vector<32x256xf32>
    %c0_73 = arith.constant 0 : index
    %c0_74 = arith.constant 0 : index
    %129 = vector.load %arg10[%c0_73, %c0_74] : memref<32x1xf32, #tpu.memory_space<vmem>>, vector<32x1xf32>
    %130 = vector.broadcast %129 : vector<32x1xf32> to vector<32x256xf32>
    %131 = arith.addf %128, %130 : vector<32x256xf32>
    %132 = arith.negf %131 : vector<32x256xf32>
    %133 = math.exp %132 : vector<32x256xf32>
    %cst_75 = arith.constant 1.000000e+00 : f32
    %134 = vector.broadcast %cst_75 : f32 to vector<32x256xf32>
    %135 = arith.addf %134, %133 : vector<32x256xf32>
    %136 = arith.divf %134, %135 : vector<32x256xf32>
    %137 = arith.mulf %131, %136 : vector<32x256xf32>
    %c0_76 = arith.constant 0 : index
    %c0_77 = arith.constant 0 : index
    %c0_78 = arith.constant 0 : index
    %138 = vector.load %arg1[%c0_76, %c0_77, %c0_78] : memref<1x32x256xf32, #tpu.memory_space<vmem>>, vector<1x32x256xf32>
    %139 = vector.shape_cast %138 : vector<1x32x256xf32> to vector<32x256xf32>
    %140 = arith.negf %137 : vector<32x256xf32>
    %141 = math.exp %140 : vector<32x256xf32>
    %cst_79 = arith.constant 1.000000e+00 : f32
    %142 = vector.broadcast %cst_79 : f32 to vector<32x256xf32>
    %143 = arith.addf %142, %141 : vector<32x256xf32>
    %144 = arith.divf %142, %143 : vector<32x256xf32>
    %145 = arith.mulf %139, %144 : vector<32x256xf32>
    %c0_80 = arith.constant 0 : index
    %c0_81 = arith.constant 0 : index
    %c0_82 = arith.constant 0 : index
    %146 = vector.load %arg11[%c0_80, %c0_81, %c0_82] : memref<1x32x256xf32, #tpu.memory_space<vmem>>, vector<1x32x256xf32>
    %147 = vector.shape_cast %146 : vector<1x32x256xf32> to vector<32x256xf32>
    %148 = vector.shape_cast %145 : vector<32x256xf32> to vector<1x32x256xf32>
    tpu.vector_store %arg11[%c0_80, %c0_81, %c0_82], %148 {strides = array<i32>} : memref<1x32x256xf32, #tpu.memory_space<vmem>>, vector<1x32x256xf32>,
    return
  }
  func.func @transform_0(%arg0: i32) -> (i32, i32, i32) {
    %c0_i32 = arith.constant 0 : i32
    %c0_i32_0 = arith.constant 0 : i32
    %c0_i32_1 = arith.constant 0 : i32
    return %arg0, %c0_i32, %c0_i32_0 : i32, i32, i32
  }
  func.func @transform_1(%arg0: i32) -> (i32, i32) {
    %c0_i32 = arith.constant 0 : i32
    %c0_i32_0 = arith.constant 0 : i32
    %c0_i32_1 = arith.constant 0 : i32
    return %c0_i32, %c0_i32_0 : i32, i32
  }
  func.func @transform_2(%arg0: i32) -> (i32, i32) {
    %c0_i32 = arith.constant 0 : i32
    %c0_i32_0 = arith.constant 0 : i32
    %c0_i32_1 = arith.constant 0 : i32
    return %c0_i32, %c0_i32_0 : i32, i32
  }
  func.func @transform_3(%arg0: i32) -> (i32, i32) {
    %c0_i32 = arith.constant 0 : i32
    %c0_i32_0 = arith.constant 0 : i32
    %c0_i32_1 = arith.constant 0 : i32
    return %c0_i32, %c0_i32_0 : i32, i32
  }
  func.func @transform_4(%arg0: i32) -> (i32, i32, i32) {
    %c0_i32 = arith.constant 0 : i32
    %c0_i32_0 = arith.constant 0 : i32
    %c0_i32_1 = arith.constant 0 : i32
    %c0_i32_2 = arith.constant 0 : i32
    return %c0_i32, %c0_i32_0, %c0_i32_1 : i32, i32, i32
  }
  func.func @transform_5(%arg0: i32) -> (i32, i32) {
    %c0_i32 = arith.constant 0 : i32
    %c0_i32_0 = arith.constant 0 : i32
    %c0_i32_1 = arith.constant 0 : i32
    return %c0_i32, %c0_i32_0 : i32, i32
  }
  func.func @transform_6(%arg0: i32) -> (i32, i32, i32) {
    %c0_i32 = arith.constant 0 : i32
    %c0_i32_0 = arith.constant 0 : i32
    %c0_i32_1 = arith.constant 0 : i32
    %c0_i32_2 = arith.constant 0 : i32
    return %c0_i32, %c0_i32_0, %c0_i32_1 : i32, i32, i32
  }
  func.func @transform_7(%arg0: i32) -> (i32, i32) {
    %c0_i32 = arith.constant 0 : i32
    %c0_i32_0 = arith.constant 0 : i32
    %c0_i32_1 = arith.constant 0 : i32
    return %c0_i32, %c0_i32_0 : i32, i32
  }
  func.func @transform_8(%arg0: i32) -> (i32, i32) {
    %c0_i32 = arith.constant 0 : i32
    %c0_i32_0 = arith.constant 0 : i32
    %c0_i32_1 = arith.constant 0 : i32
    return %c0_i32, %c0_i32_0 : i32, i32
  }
  func.func @transform_9(%arg0: i32) -> (i32, i32) {
    %c0_i32 = arith.constant 0 : i32
    %c0_i32_0 = arith.constant 0 : i32
    %c0_i32_1 = arith.constant 0 : i32
    return %c0_i32, %c0_i32_0 : i32, i32
  }
  func.func @transform_10(%arg0: i32) -> (i32, i32, i32) {
    %c0_i32 = arith.constant 0 : i32
    %c0_i32_0 = arith.constant 0 : i32
    %c0_i32_1 = arith.constant 0 : i32
    return %arg0, %c0_i32, %c0_i32_0 : i32, i32, i32
  }
}

</mosaic_0001>

<bundles_post_ra>
// kernel: tpu_custom_call.1
= control target key start
LH: loop header
LB: loop body
LE: loop exit
PB: predicated region body
PF: predicated region fallthrough
CT: control target
= control target key end

     0   :  { %s4468_s0 = inlined_call_operand.hbm [shape: f32[2,32,256], index: 0, kind: input, shape index: {}]   ;;  %s4469_s1 = inlined_call_operand.hbm [shape: f32[256,256], index: 1, kind: input, shape index: {}]   ;;  %s4470_s2 = inlined_call_operand.vmem [shape: f32[32,32], index: 2, kind: input, shape index: {}]   ;;  %s4471_s3 = inlined_call_operand.vmem [shape: f32[32,1], index: 3, kind: input, shape index: {}]   ;;  %s4472_s4 = inlined_call_operand.hbm [shape: f32[11,32,256], index: 4, kind: input, shape index: {}]   ;;  %s4473_s5 = inlined_call_operand.vmem [shape: f32[32,1], index: 5, kind: input, shape index: {}]   ;;  %s4474_s6 = inlined_call_operand.hbm [shape: f32[11,32,256], index: 6, kind: input, shape index: {}]   ;;  %s4475_s7 = inlined_call_operand.vmem [shape: f32[32,1], index: 7, kind: input, shape index: {}]   ;;  %s4476_s8 = inlined_call_operand.vmem [shape: f32[32,32], index: 8, kind: input, shape index: {}]   ;;  %s4477_s9 = inlined_call_operand.vmem [shape: f32[32,1], index: 9, kind: input, shape index: {}]   ;;  %s4478_s10 = inlined_call_operand.hbm [shape: f32[2,32,256], index: 10, kind: output, shape index: {}]  }
   0x1   :  { %4481 = sst [smem:[#allocation16_spill]] %s4469_s1 }
   0x2   :  { %4482 = sst [smem:[#allocation17_spill]] %s4472_s4 }
   0x3   :  { %4483 = sst [smem:[#allocation18_spill]] %s4474_s6 }
   0x4   :  { %15 = vsyncpa [#allocation3], 0 }
   0x5   :  { %17 = vsyncpa [#allocation3 + $0x1], 0 }
   0x6   :  { %18 = vsyncpa [#allocation6], 0 }
   0x7   :  { %19 = vsyncpa [#allocation9], 0 }
   0x8   :  { %20 = vsyncpa [#allocation4], 0 }
   0x9   :  { %22 = vsyncpa [#allocation4 + $0x1], 0  ;;  %s2986_s13 = smov 0   ;;  %s2988_s14 = smov 0  }
   0xa   :  { %s2990_s15 = smov 0   ;;  %s2992_s16 = smov 0  }
   0xb LB: > { %s3007_s17 = sadd.s32 4294967295, %s2905_s16   ;;  %s2444_s18 = sadd.s32 4294967294, %s2905_s16   ;;  %s2905_s16 = sphi %s2992_s16, %s4519_s16   ;;  %s2901_s15 = sphi %s2990_s15, %s4518_s15   ;;  %s2897_s14 = sphi %s2988_s14, %s4517_s14   ;;  %s2893_s13 = sphi %s2986_s13, %s4516_s13  }
   0xc   : > { %p48_p0 = scmp.ne.s32.totalorder %s2897_s14, %s2893_s13  ;;  %p49_p1 = scmp.eq.s32.totalorder %s3007_s17, 0 }
   0xd   : > { %p261_p2 = scmp.eq.s32.totalorder %s3007_s17, 1  ;;  %p267_p3 = scmp.eq.s32.totalorder %s2444_s18, 1 }
   0xe   : > { %p3016_p4 = por %p49_p1, %p48_p0  ;;  %p2445_p5 = scmp.ge.s32.totalorder %s2905_s16, 1 }
   0xf   : > { %p3021_p6 = por %p267_p3, %p48_p0  ;;  %p274_p7 = scmp.lt.s32.totalorder %s2905_s16, 3 }
  0x10   : > { %s4486_s1 = sld [smem:[#allocation16_spill]]  ;;  %s2907_s25 = smov [#allocation5]  }
  0x11   : > { %p3029_p8 = pnand %p2445_p5, %p274_p7  ;;  %s287_s26 = sshll.u32 %s2907_s25, 4  ;;  %s288_s26 = int_to_ptr.vmem [resolvable:$true] %s287_s26 }
  0x12   : > { %s4489_s4 = sld [smem:[#allocation17_spill]]  ;;  %s4479_s11 = smov 256  }
  0x13   : > { %p2522_p9 = pneg %p3029_p8  ;;  %s4480_s12 = smov 16  }
  0x14   : > { %s2910_s18 = smov [#allocation7]   ;;  %s4490_s6 = sld [smem:[#allocation18_spill]] }
  0x15   : > { %p3037_p10 = pnand %p2522_p9, %p49_p1  ;;  %s307_s21 = sshll.u32 %s2910_s18, 4  ;;  %s308_s21 = int_to_ptr.vmem [resolvable:$true] %s307_s21 }
  0x16   : > { %s285_s23 = sshll.u32 %s4486_s1, 4  ;;  %s3059_s29 = sadd.s32 1, %s2905_s16   ;;  %s286_s23 = int_to_ptr.hbm [resolvable:$true] %s285_s23 }
  0x17   : > { %2525 = dma.hbm_to_vmem [thread:$0]  (!%p3037_p10), %s286_s23, 8192, %s288_s26, [#allocation6], %s4479_s11, %s4479_s11, %s4480_s12  }
  0x18   : > { %s305_s30 = sshll.u32 %s4489_s4, 4  ;;  %s2911_s23 = smov [#allocation8]   ;;  %s306_s30 = int_to_ptr.hbm [resolvable:$true] %s305_s30 }
  0x19   : > { %2528 = dma.hbm_to_vmem [thread:$0]  (!%p3037_p10), %s306_s30, 11264, %s308_s21, [#allocation6], %s4479_s11, %s4479_s11, %s4480_s12  }
  0x1a   : > { %s322_s28 = sshll.u32 %s4490_s6, 4  ;;  %s324_s26 = sshll.u32 %s2911_s23, 4  ;;  %s323_s28 = int_to_ptr.hbm [resolvable:$true] %s322_s28  ;;  %s325_s26 = int_to_ptr.vmem [resolvable:$true] %s324_s26 }
  0x1b   : > { %2531 = dma.hbm_to_vmem [thread:$0]  (!%p3037_p10), %s323_s28, 11264, %s325_s26, [#allocation9], %s4479_s11, %s4479_s11, %s4480_s12  }
  0x1c   : > { %s32_s18 = ssub.s32 %s2905_s16, %s3059_s29  ;;  %s35_s22 = sadd.s32 1, %s2901_s15 }
  0x1d   : > { %p33_p12 = scmp.eq.s32.totalorder %s32_s18, 0  ;;  %p42_p13 = scmp.ne.s32.totalorder %s2901_s15, %s2897_s14 }
  0x1e   : > { %p43_p0 = scmp.eq.s32.totalorder %s2905_s16, 0  ;;  %p2543_p5 = scmp.lt.s32.totalorder %s2905_s16, 2 }
  0x1f   : > { %s3073_s25 = scalar_select %p33_p12, %s2901_s15, %s35_s22  }
  0x20   : > { %p3077_p3 = por %p261_p2, %p42_p13  ;;  %s347_s21 = sand.u32 1, %s2901_s15  }
  0x21   : > { %4491 = sst [smem:[#allocation15_spill]] %s3073_s25  ;;  %s2504_s27 = sshll.u32 %s2905_s16, 6 }
  0x22   : > { %p44_p7 = por %p43_p0, %p42_p13  ;;  %s2450_s23 = sshll.u32 %s347_s21, 6 }
  0x23   : > { %s356_s28 = scalar_lea.hbm %s4468_s0, %s2504_s27  ;;  %s351_s18 = scalar_lea.vmem [#allocation2], %s2450_s23 }
  0x24   : > { %s357_s26 = sshll.u32 %s356_s28, 4  ;;  %s359_s11 = sshll.u32 %s351_s18, 4  ;;  %s358_s26 = int_to_ptr.hbm [resolvable:$true] %s357_s26  ;;  %s360_s11 = int_to_ptr.vmem [resolvable:$true] %s359_s11 }
  0x25   : > { %p3087_p9 = pnand %p2543_p5, %p44_p7  ;;  %s348_s12 = scalar_lea.sflag [#allocation3], %s347_s21 }
  0x26   : > { %s2801_s6 = sshra.s32 %s358_s26, 4  ;;  %s2808_s27 = scalar_lea.hbm %s4468_s0, 128  ;;  %s2802_s6 = int_to_ptr.hbm [resolvable:$true] %s2801_s6 }
  0x27   : > { %s2803_s25 = scalar_lea.hbm %s2802_s6, 64  ;;  %p2805_p10 = pneg %p3087_p9 }
  0x28   : > { %p2804_p2 = scmp.ne.s32.totalorder %s2802_s6, %s2803_s25  ;;  %p2809_p0 = scmp.lt.s32.totalorder %s2802_s6, %s4468_s0 }
  0x29   : > { %p2810_p5 = scmp.lt.s32.totalorder %s2808_s27, %s2803_s25 }
  0x2a   : > { %p2806_p12 = pnand %p2805_p10, %p2804_p2 }
  0x2b   : > { %p2811_p7 = por %p2810_p5, %p2809_p0 }
  0x2c   : > { %p2807_p13 = pneg %p2806_p12 }
  0x2e   : > { %p2812_p11 = pnand %p2811_p7, %p2807_p13 }
  0x30   : > { %2815 = shalt.err (!%p2812_p11)
}
  0x31   : > { %s4494_s21 = smov 16   ;;  %s4495_s18 = smov 256  }
  0x32   : > { %2535 = dma.hbm_to_vmem [thread:$0]  (!%p3087_p9), %s358_s26, 1024, %s360_s11, %s348_s12, %s4495_s18, %s4495_s18, %s4494_s21  }
  0x33   : > { %371 = sbr.rel (%p3029_p8) target bundleno = 1149 (0x47d), region = 60  ;;  %s3107_s1 = sand.u32 (!%p3029_p8), 1, %s2897_s14  }
  0x34   : > { %s2454_s6 = sshll.u32 (!%p3029_p8), %s3107_s1, 6  ;;  %s374_s25 = scalar_lea.sflag (!%p3029_p8), [#allocation3], %s3107_s1 }
  0x35   : > { %s3113_s4 = scalar_lea.vmem (!%p3029_p8), [#allocation2], %s2454_s6 }
  0x38   : > { %2876 = dma.done.wait (%p3016_p4), %s374_s25, 1024  }
  0x39   : > { %2878 = vsyncadd (%p3016_p4), %s374_s25, 4294966272 }
  0x3a   : > { %2880 = dma.done.wait (%p49_p1), [#allocation6], 19456  }
  0x3b   : > { %2882 = vsyncadd (%p49_p1), [#allocation6], 4294947840 }
  0x3c   : > { %2884 = dma.done.wait (%p49_p1), [#allocation9], 11264  }
  0x3d   : > { %2886 = vsyncadd (%p49_p1), [#allocation9], 4294956032  ;;  %v468_v0 = vld [vmem:[#allocation5 + $0xf0] sm:$0xff]  ;;  %v469_v2 = vld [vmem:[#allocation5 + $0xf8] sm:$0xff]  ;;  %vm646_vm0 = vcmask 261120   ;;  %s2913_s19 = smov 2  }
  0x3e   : > { %v500_v1 = vld [vmem:[#allocation5 + $0x1f0] sm:$0xff]  ;;  %502 = vmatpush.msra.mxu0 %v468_v0  ;;  %v501_v3 = vld [vmem:[#allocation5 + $0x1f8] sm:$0xff]  ;;  %v466_v4 = vld [vmem:[#allocation5 + $0xe0] sm:$0xff]  ;;  %560 = vmatpush.msra.mxu2 %v469_v2  ;;  %s2914_s24 = smov 4   ;;  %s2915_s11 = smov 5  }
  0x3f   : > { %531 = vmatpush.msra.mxu1 %v500_v1  ;;  %v498_v5 = vld [vmem:[#allocation5 + $0x1e0] sm:$0xff]  ;;  %589 = vmatpush.msra.mxu3 %v501_v3  ;;  %v467_v6 = vld [vmem:[#allocation5 + $0xe8] sm:$0xff]  ;;  %v464_v8 = vld [vmem:[#allocation5 + $0xd0] sm:$0xff]  ;;  %s2916_s12 = smov 126   ;;  %s2917_s26 = smov 1  }
  0x40   : > { %v499_v7 = vld [vmem:[#allocation5 + $0x1e8] sm:$0xff]  ;;  %503 = vmatpush.msra.mxu0 %v466_v4  ;;  %v496_v9 = vld [vmem:[#allocation5 + $0x1d0] sm:$0xff]  ;;  %v465_v10 = vld [vmem:[#allocation5 + $0xd8] sm:$0xff]  ;;  %561 = vmatpush.msra.mxu2 %v467_v6  ;;  %s2918_s22 = smov 3   ;;  %s2919_s27 = smov 125  }
  0x41   : > { %532 = vmatpush.msra.mxu1 %v498_v5  ;;  %v497_v11 = vld [vmem:[#allocation5 + $0x1d8] sm:$0xff]  ;;  %590 = vmatpush.msra.mxu3 %v499_v7  ;;  %v462_v12 = vld [vmem:[#allocation5 + $0xc0] sm:$0xff]  ;;  %v463_v14 = vld [vmem:[#allocation5 + $0xc8] sm:$0xff]  ;;  %s2920_s23 = smov 127   ;;  %s2921_s28 = smov 124  }
  0x42   : > { %v494_v13 = vld [vmem:[#allocation5 + $0x1c0] sm:$0xff]  ;;  %504 = vmatpush.msra.mxu0 %v464_v8  ;;  %v495_v15 = vld [vmem:[#allocation5 + $0x1c8] sm:$0xff]  ;;  %562 = vmatpush.msra.mxu2 %v465_v10  ;;  %v460_v16 = vld [vmem:[#allocation5 + $0xb0] sm:$0xff]  ;;  %v2912_v8 = vmov 0   ;;  %s2922_s21 = smov 123   ;;  %s2923_s18 = smov 80  }
  0x43   : > { %533 = vmatpush.msra.mxu1 %v496_v9  ;;  %591 = vmatpush.msra.mxu3 %v497_v11  ;;  %v492_v17 = vld [vmem:[#allocation5 + $0x1b0] sm:$0xff]  ;;  %v461_v18 = vld [vmem:[#allocation5 + $0xb8] sm:$0xff]  ;;  %v458_v20 = vld [vmem:[#allocation5 + $0xa0] sm:$0xff]  ;;  %s2924_s25 = smov 64  }
  0x44   : > { %505 = vmatpush.msra.mxu0 %v462_v12  ;;  %v493_v19 = vld [vmem:[#allocation5 + $0x1b8] sm:$0xff]  ;;  %563 = vmatpush.msra.mxu2 %v463_v14  ;;  %v490_v21 = vld [vmem:[#allocation5 + $0x1a0] sm:$0xff]  ;;  %v459_v22 = vld [vmem:[#allocation5 + $0xa8] sm:$0xff] }
  0x45   : > { %534 = vmatpush.msra.mxu1 %v494_v13  ;;  %592 = vmatpush.msra.mxu3 %v495_v15  ;;  %v491_v23 = vld [vmem:[#allocation5 + $0x1a8] sm:$0xff]  ;;  %v456_v24 = vld [vmem:[#allocation5 + $0x90] sm:$0xff]  ;;  %v457_v26 = vld [vmem:[#allocation5 + $0x98] sm:$0xff] }
  0x46   : > { %506 = vmatpush.msra.mxu0 %v460_v16  ;;  %564 = vmatpush.msra.mxu2 %v461_v18  ;;  %v488_v25 = vld [vmem:[#allocation5 + $0x190] sm:$0xff]  ;;  %v489_v27 = vld [vmem:[#allocation5 + $0x198] sm:$0xff]  ;;  %v454_v28 = vld [vmem:[#allocation5 + $0x80] sm:$0xff] }
  0x47   : > { %535 = vmatpush.msra.mxu1 %v492_v17  ;;  %593 = vmatpush.msra.mxu3 %v493_v19  ;;  %v486_v29 = vld [vmem:[#allocation5 + $0x180] sm:$0xff]  ;;  %v455_v30 = vld [vmem:[#allocation5 + $0x88] sm:$0xff]  ;;  %v452_v32 = vld [vmem:[#allocation5 + $0x70] sm:$0xff] }
  0x48   : > { %507 = vmatpush.msra.mxu0 %v458_v20  ;;  %565 = vmatpush.msra.mxu2 %v459_v22  ;;  %v487_v31 = vld [vmem:[#allocation5 + $0x188] sm:$0xff]  ;;  %v484_v33 = vld [vmem:[#allocation5 + $0x170] sm:$0xff]  ;;  %v453_v34 = vld [vmem:[#allocation5 + $0x78] sm:$0xff] }
  0x49   : > { %536 = vmatpush.msra.mxu1 %v490_v21  ;;  %594 = vmatpush.msra.mxu3 %v491_v23  ;;  %v485_v35 = vld [vmem:[#allocation5 + $0x178] sm:$0xff]  ;;  %v450_v36 = vld [vmem:[#allocation5 + $0x60] sm:$0xff]  ;;  %v451_v38 = vld [vmem:[#allocation5 + $0x68] sm:$0xff] }
  0x4a   : > { %508 = vmatpush.msra.mxu0 %v456_v24  ;;  %566 = vmatpush.msra.mxu2 %v457_v26  ;;  %v482_v37 = vld [vmem:[#allocation5 + $0x160] sm:$0xff]  ;;  %v483_v39 = vld [vmem:[#allocation5 + $0x168] sm:$0xff]  ;;  %v448_v40 = vld [vmem:[#allocation5 + $0x50] sm:$0xff] }
  0x4b   : > { %537 = vmatpush.msra.mxu1 %v488_v25  ;;  %595 = vmatpush.msra.mxu3 %v489_v27  ;;  %v480_v41 = vld [vmem:[#allocation5 + $0x150] sm:$0xff]  ;;  %v449_v42 = vld [vmem:[#allocation5 + $0x58] sm:$0xff]  ;;  %v446_v44 = vld [vmem:[#allocation5 + $0x40] sm:$0xff] }
  0x4c   : > { %509 = vmatpush.msra.mxu0 %v454_v28  ;;  %567 = vmatpush.msra.mxu2 %v455_v30  ;;  %v481_v43 = vld [vmem:[#allocation5 + $0x158] sm:$0xff]  ;;  %v478_v45 = vld [vmem:[#allocation5 + $0x140] sm:$0xff]  ;;  %v447_v46 = vld [vmem:[#allocation5 + $0x48] sm:$0xff] }
  0x4d   : > { %538 = vmatpush.msra.mxu1 %v486_v29  ;;  %596 = vmatpush.msra.mxu3 %v487_v31  ;;  %v479_v47 = vld [vmem:[#allocation5 + $0x148] sm:$0xff]  ;;  %v444_v48 = vld [vmem:[#allocation5 + $0x30] sm:$0xff]  ;;  %v445_v50 = vld [vmem:[#allocation5 + $0x38] sm:$0xff] }
  0x4e   : > { %510 = vmatpush.msra.mxu0 %v452_v32  ;;  %568 = vmatpush.msra.mxu2 %v453_v34  ;;  %v476_v49 = vld [vmem:[#allocation5 + $0x130] sm:$0xff]  ;;  %v477_v51 = vld [vmem:[#allocation5 + $0x138] sm:$0xff]  ;;  %v442_v52 = vld [vmem:[#allocation5 + $0x20] sm:$0xff] }
  0x4f   : > { %539 = vmatpush.msra.mxu1 %v484_v33  ;;  %597 = vmatpush.msra.mxu3 %v485_v35  ;;  %v474_v53 = vld [vmem:[#allocation5 + $0x120] sm:$0xff]  ;;  %v443_v54 = vld [vmem:[#allocation5 + $0x28] sm:$0xff]  ;;  %v440_v56 = vld [vmem:[#allocation5 + $0x10] sm:$0xff] }
  0x50   : > { %511 = vmatpush.msra.mxu0 %v450_v36  ;;  %569 = vmatpush.msra.mxu2 %v451_v38  ;;  %v475_v55 = vld [vmem:[#allocation5 + $0x128] sm:$0xff]  ;;  %v472_v57 = vld [vmem:[#allocation5 + $0x110] sm:$0xff]  ;;  %v441_v58 = vld [vmem:[#allocation5 + $0x18] sm:$0xff] }
  0x51   : > { %540 = vmatpush.msra.mxu1 %v482_v37  ;;  %598 = vmatpush.msra.mxu3 %v483_v39  ;;  %v473_v59 = vld [vmem:[#allocation5 + $0x118] sm:$0xff]  ;;  %v438_v60 = vld [vmem:[#allocation5] sm:$0xff]  ;;  %v439_v62 = vld [vmem:[#allocation5 + $0x8] sm:$0xff] }
  0x52   : > { %512 = vmatpush.msra.mxu0 %v448_v40  ;;  %570 = vmatpush.msra.mxu2 %v449_v42  ;;  %v470_v61 = vld [vmem:[#allocation5 + $0x100] sm:$0xff]  ;;  %v471_v63 = vld [vmem:[#allocation5 + $0x108] sm:$0xff]  ;;  %v432_v2 = vld [vmem:[%s3113_s4 + $0x10] sm:$0xff] }
  0x53   : > { %541 = vmatpush.msra.mxu1 %v480_v41  ;;  %599 = vmatpush.msra.mxu3 %v481_v43  ;;  %v430_v0 = vld [vmem:[%s3113_s4] sm:$0xff]  ;;  %v431_v1 = vld [vmem:[%s3113_s4 + $0x8] sm:$0xff]  ;;  %v433_v3 = vld [vmem:[%s3113_s4 + $0x18] sm:$0xff] }
  0x54   : > { %513 = vmatpush.msra.mxu0 %v446_v44  ;;  %571 = vmatpush.msra.mxu2 %v447_v46  ;;  %v434_v4 = vld [vmem:[%s3113_s4 + $0x20] sm:$0xff]  ;;  %v435_v5 = vld [vmem:[%s3113_s4 + $0x28] sm:$0xff]  ;;  %v436_v6 = vld [vmem:[%s3113_s4 + $0x30] sm:$0xff] }
  0x55   : > { %542 = vmatpush.msra.mxu1 %v478_v45  ;;  %600 = vmatpush.msra.mxu3 %v479_v47  ;;  %v437_v7 = vld [vmem:[%s3113_s4 + $0x38] sm:$0xff]  ;;  %v622_v9 = vld [vmem:[%s4471_s3] sm:$0xff]  ;;  %v623_v12 = vld [vmem:[%s4471_s3 + $0x8] sm:$0xff] }
  0x56   : > { %514 = vmatpush.msra.mxu0 %v444_v48  ;;  %572 = vmatpush.msra.mxu2 %v445_v50  ;;  %v1395_v17 = vld [vmem:[%s4473_s5] sm:$0xff]  ;;  %v624_v35 = vld [vmem:[%s4471_s3 + $0x10] sm:$0xff]  ;;  %v619_v38 = vld [vmem:[%s4470_s2 + $0x8] sm:$0xff] }
  0x57   : > { %543 = vmatpush.msra.mxu1 %v476_v49  ;;  %601 = vmatpush.msra.mxu3 %v477_v51  ;;  %v618_v32 = vld [vmem:[%s4470_s2] sm:$0xff]  ;;  %v625_v39 = vld [vmem:[%s4471_s3 + $0x18] sm:$0xff]  ;;  %v620_v40 = vld [vmem:[%s4470_s2 + $0x10] sm:$0xff] }
  0x58   : > { %515 = vmatpush.msra.mxu0 %v442_v52  ;;  %573 = vmatpush.msra.mxu2 %v443_v54  ;;  %v1398_v41 = vld [vmem:[%s4473_s5 + $0x18] sm:$0xff]  ;;  %v1397_v43 = vld [vmem:[%s4473_s5 + $0x10] sm:$0xff]  ;;  %v1396_v44 = vld [vmem:[%s4473_s5 + $0x8] sm:$0xff] }
  0x59   : > { %544 = vmatpush.msra.mxu1 %v474_v53  ;;  %602 = vmatpush.msra.mxu3 %v475_v55  ;;  %v621_v42 = vld [vmem:[%s4470_s2 + $0x18] sm:$0xff] }
  0x5a   : > { %516 = vmatpush.msra.mxu0 %v440_v56  ;;  %574 = vmatpush.msra.mxu2 %v441_v58 }
  0x5b   : > { %545 = vmatpush.msra.mxu1 %v472_v57  ;;  %603 = vmatpush.msra.mxu3 %v473_v59 }
  0x5c   : > { %517 = vmatpush.msra.mxu0 %v438_v60  ;;  %575 = vmatpush.msra.mxu2 %v439_v62 }
  0x5d   : > { %546 = vmatpush.msra.mxu1 %v470_v61  ;;  %604 = vmatpush.msra.mxu3 %v471_v63 }
  0x5e   : > { %518 = vmatmul.f32.vlgmr.msra.gmra.mxu0 %v430_v0  ;;  %547 = vmatmul.f32.vlgmr.msra.gmra.mxu1 %v431_v1 }
  0x5f   : > { %576 = vmatmul.f32.vlgmr.msra.gmra.mxu2 %v430_v0  ;;  %605 = vmatmul.f32.vlgmr.msra.gmra.mxu3 %v431_v1 }
  0x60   : > { %2604 = vset.pattern.permute.xlu0 %v2912_v8  ;;  %2605 = vset.pattern.permute.xlu1 %v2912_v8 }
  0x61   : > { %628 = vperm.xlu0 %2604, %v622_v9   ;;  %2606 = vset.pattern.permute.xlu2 %v2912_v8 }
  0x62   : > { %638 = vperm.xlu1 %2605, %v624_v35   ;;  %1406 = vperm.xlu2 %2606, %v1396_v44  }
  0x66   : > { %521 = vmatmul.f32.gmra.mxu0 %v432_v2  ;;  %550 = vmatmul.f32.gmra.mxu1 %v433_v3 }
  0x67   : > { %579 = vmatmul.f32.gmra.mxu2 %v432_v2  ;;  %608 = vmatmul.f32.gmra.mxu3 %v433_v3 }
  0x69   : > { %633 = vperm.xlu0 %2604, %v623_v12  }
  0x6a   : > { %643 = vperm.xlu1 %2605, %v625_v39  }
  0x6e   : > { %524 = vmatmul.f32.gmra.mxu0 %v434_v4  ;;  %553 = vmatmul.f32.gmra.mxu1 %v435_v5 }
  0x6f   : > { %582 = vmatmul.f32.gmra.mxu2 %v434_v4  ;;  %611 = vmatmul.f32.gmra.mxu3 %v435_v5 }
  0x71   : > { %1401 = vperm.xlu0 %2604, %v1395_v17  }
  0x72   : > { %1416 = vperm.xlu1 %2605, %v1398_v41  }
  0x76   : > { %527 = vmatmul.f32.gmra.mxu0 %v436_v6  ;;  %556 = vmatmul.f32.gmra.mxu1 %v437_v7 }
  0x77   : > { %585 = vmatmul.f32.gmra.mxu2 %v436_v6  ;;  %614 = vmatmul.f32.gmra.mxu3 %v437_v7 }
  0x7a   : > { %1411 = vperm.xlu1 %2605, %v1397_v43  }
  0xd3   : > { %v629_v45 = vpop.permute.xlu0 %628 }
  0xdb   : > { %v519_v10 = vpop.f32.mrf.mxu0  ;;  %v548_v11 = vpop.f32.mrf.mxu1 }
  0xdc   : > { %v549_v29 = vadd.f32 %v548_v11, %v519_v10  ;;  %v634_v63 = vpop.permute.xlu0 %633 }
  0xe2   : > { %v577_v13 = vpop.f32.mrf.mxu2  ;;  %v606_v14 = vpop.f32.mrf.mxu3 }
  0xe3   : > { %v522_v15 = vpop.f32.mrf.mxu0  ;;  %v551_v16 = vpop.f32.mrf.mxu1  ;;  %v607_v37 = vadd.f32 %v606_v14, %v577_v13 }
  0xe4   : > { %v552_v28 = vadd.f32 %v551_v16, %v522_v15 }
  0xea   : > { %v580_v18 = vpop.f32.mrf.mxu2  ;;  %v609_v19 = vpop.f32.mrf.mxu3 }
  0xeb   : > { %v525_v20 = vpop.f32.mrf.mxu0  ;;  %v554_v21 = vpop.f32.mrf.mxu1  ;;  %v610_v36 = vadd.f32 %v609_v19, %v580_v18 }
  0xec   : > { %v555_v27 = vadd.f32 %v554_v21, %v525_v20 }
  0xf2   : > { %v583_v22 = vpop.f32.mrf.mxu2  ;;  %v612_v23 = vpop.f32.mrf.mxu3 }
  0xf3   : > { %v528_v24 = vpop.f32.mrf.mxu0  ;;  %v557_v25 = vpop.f32.mrf.mxu1  ;;  %v613_v33 = vadd.f32 %v612_v23, %v583_v22 }
  0xf4   : > { %v558_v26 = vadd.f32 %v557_v25, %v528_v24 }
  0xf6   : > { %671 = vmatpush.msrb.mxu0 %v558_v26 }
  0xf8   : > { %672 = vmatpush.msrb.mxu0 %v555_v27 }
  0xfa   : > { %v586_v30 = vpop.f32.mrf.mxu2  ;;  %v615_v31 = vpop.f32.mrf.mxu3  ;;  %673 = vmatpush.msrb.mxu0 %v552_v28 }
  0xfb   : > { %v616_v34 = vadd.f32 %v615_v31, %v586_v30 }
  0xfc   : > { %674 = vmatpush.msrb.mxu0 %v549_v29 }
  0xfd   : > { %700 = vmatpush.msrb.mxu1 %v616_v34  ;;  %2459 = vmatmul.msk.f32.vlgmr.msrb.gmra.mxu0 %vm646_vm0, %v618_v32  ;;  %v639_v34 = vpop.permute.xlu1 %638 }
  0xff   : > { %701 = vmatpush.msrb.mxu1 %v613_v33 }
 0x101   : > { %702 = vmatpush.msrb.mxu1 %v610_v36 }
 0x103   : > { %703 = vmatpush.msrb.mxu1 %v607_v37 }
 0x104   : > { %2463 = vmatmul.msk.f32.vlgmr.msrb.gmra.mxu1 %vm646_vm0, %v618_v32 }
 0x105   : > { %2460 = vmatmul.msk.f32.gmra.mxu0 %vm646_vm0, %v619_v38 }
 0x10c   : > { %2464 = vmatmul.msk.f32.gmra.mxu1 %vm646_vm0, %v619_v38 }
 0x10d   : > { %2461 = vmatmul.msk.f32.gmra.mxu0 %vm646_vm0, %v620_v40 }
 0x114   : > { %2465 = vmatmul.msk.f32.gmra.mxu1 %vm646_vm0, %v620_v40 }
 0x115   : > { %2462 = vmatmul.msk.f32.gmra.mxu0 %vm646_vm0, %v621_v42 }
 0x11c   : > { %2466 = vmatmul.msk.f32.gmra.mxu1 %vm646_vm0, %v621_v42 }
 0x17a   : > { %v676_v46 = vpop.f32.mrf.mxu0 }
 0x17b   : > { %v677_v47 = vadd.f32 %v676_v46, %v629_v45 }
 0x17d   : > { %v2467_v48 = vmul.f32 -1.442695, %v677_v47 }
 0x17f   : > { %2607 = vpow2.f32 %v2467_v48 }
 0x181   : > { %v705_v49 = vpop.f32.mrf.mxu1 }
 0x182   : > { %v706_v50 = vadd.f32 %v705_v49, %v629_v45  ;;  %v679_v60 = vpop.f32.mrf.mxu0 }
 0x183   : > { %v3179_v2 = vadd.f32 %v679_v60, %v634_v63 }
 0x184   : > { %v2468_v51 = vmul.f32 -1.442695, %v706_v50 }
 0x185   : > { %v2608_v52 = vpop.eup %2607  ;;  %v2469_v9 = vmul.f32 -1.442695, %v3179_v2 }
 0x186   : > { %v741_v53 = vadd.f32 1.0, %v2608_v52  ;;  %2609 = vpow2.f32 %v2468_v51 }
 0x188   : > { %2611 = vrcp.f32 %v741_v53  ;;  %v760_v59 = vand.u32 2147483648, %v741_v53  ;;  %v758_v62 = vand.u32 2147483647, %v741_v53  ;;  %vm754_vm2 = vweird.f32 %v741_v53 }
 0x189   : > { %v708_v20 = vpop.f32.mrf.mxu1 }
 0x18a   : > { %v761_v3 = vor.u32 1.1754944e-38, %v760_v59  ;;  %vm759_vm4 = vcmp.eq.f32.partialorder %v758_v62, 8.507059e+37  ;;  %v3204_v21 = vadd.f32 %v708_v20, %v634_v63  ;;  %v682_v35 = vpop.f32.mrf.mxu0 }
 0x18b   : > { %v3225_v36 = vadd.f32 %v682_v35, %v639_v34 }
 0x18c   : > { %v2610_v54 = vpop.eup %2609  ;;  %v2470_v23 = vmul.f32 -1.442695, %v3204_v21 }
 0x18d   : > { %v742_v55 = vadd.f32 1.0, %v2610_v54  ;;  %v2471_v40 = vmul.f32 -1.442695, %v3225_v36 }
 0x18e   : > { %v2612_v56 = vpop.eup %2611 }
 0x18f   : > { %v750_v57 = vmul.f32 %v2612_v56, %v741_v53  ;;  %2613 = vrcp.f32 %v742_v55  ;;  %vm755_vm1 = vweird.f32 %v2612_v56  ;;  %v775_v12 = vand.u32 2147483648, %v742_v55 }
 0x190   : > { %vm756_vm3 = vmor %vm754_vm2, %vm755_vm1  ;;  %2615 = vpow2.f32 %v2469_v9  ;;  %vm769_vm6 = vweird.f32 %v742_v55  ;;  %v773_v13 = vand.u32 2147483647, %v742_v55 }
 0x191   : > { %v751_v58 = vsub.f32 1.0, %v750_v57  ;;  %v776_v16 = vor.u32 1.1754944e-38, %v775_v12  ;;  %v711_v51 = vpop.f32.mrf.mxu1 }
 0x192   : > { %vm774_vm8 = vcmp.eq.f32.partialorder %v773_v13, 8.507059e+37  ;;  %v3249_v52 = vadd.f32 %v711_v51, %v639_v34 }
 0x193   : > { %v752_v61 = vmul.f32 %v2612_v56, %v751_v58 }
 0x195   : > { %v2614_v0 = vpop.eup %2613  ;;  %v753_v1 = vadd.f32 %v2612_v56, %v752_v61  ;;  %v3267_v61 = vpop.permute.xlu2 %1406 }
 0x196   : > { %v765_v4 = vmul.f32 %v2614_v0, %v742_v55  ;;  %vm770_vm5 = vweird.f32 %v2614_v0  ;;  %v2616_v14 = vpop.eup %2615 }
 0x197   : > { %v757_v5 = vsel %vm756_vm3, %v2612_v56, %v753_v1  ;;  %vm771_vm7 = vmor %vm769_vm6, %vm770_vm5  ;;  %v743_v18 = vadd.f32 1.0, %v2616_v14  ;;  %v2472_v56 = vmul.f32 -1.442695, %v3249_v52 }
 0x198   : > { %v762_v6 = vsel %vm759_vm4, %v761_v3, %v757_v5  ;;  %v766_v7 = vsub.f32 1.0, %v765_v4  ;;  %v3269_v4 = vpop.permute.xlu1 %643 }
 0x199   : > { %v3181_v8 = vmul.f32 %v762_v6, %v677_v47  ;;  %2617 = vrcp.f32 %v743_v18  ;;  %v790_v30 = vand.u32 2147483648, %v743_v18  ;;  %vm784_vm10 = vweird.f32 %v743_v18 }
 0x19a   : > { %v767_v10 = vmul.f32 %v2614_v0, %v766_v7  ;;  %2619 = vpow2.f32 %v2470_v23  ;;  %v788_v31 = vand.u32 2147483647, %v743_v18 }
 0x19b   : > { %1045 = vrot.lane.b32.xlu1 %v3181_v8, %s2913_s19  ;;  %945 = vrot.lane.b32.xlu0 %v3181_v8, %s2914_s24  ;;  %v791_v33 = vor.u32 1.1754944e-38, %v790_v30 }
 0x19c   : > { %894 = vrot.lane.b32.xlu2 %v3181_v8, %s2915_s11  ;;  %v768_v11 = vadd.f32 %v2614_v0, %v767_v10  ;;  %vm789_vm12 = vcmp.eq.f32.partialorder %v788_v31, 8.507059e+37  ;;  %v685_v10 = vpop.f32.mrf.mxu0 }
 0x19d   : > { %v3287_v13 = vadd.f32 %v685_v10, %v3269_v4 }
 0x19e   : > { %v772_v15 = vsel %vm771_vm7, %v2614_v0, %v768_v11 }
 0x19f   : > { %v777_v17 = vsel %vm774_vm8, %v776_v16, %v772_v15  ;;  %v2618_v22 = vpop.eup %2617  ;;  %v2473_v16 = vmul.f32 -1.442695, %v3287_v13 }
 0x1a0   : > { %v3196_v19 = vmul.f32 %v777_v17, %v706_v50  ;;  %v780_v24 = vmul.f32 %v2618_v22, %v743_v18  ;;  %v2620_v26 = vpop.eup %2619  ;;  %vm785_vm9 = vweird.f32 %v2618_v22  ;;  %v3280_v12 = vpop.permute.xlu1 %1416 }
 0x1a1   : > { %v744_v28 = vadd.f32 1.0, %v2620_v26  ;;  %vm786_vm11 = vmor %vm784_vm10, %vm785_vm9  ;;  %v3300_v18 = vpop.permute.xlu0 %1401 }
 0x1a2   : > { %v781_v25 = vsub.f32 1.0, %v780_v24 }
 0x1a3   : > { %1195 = vrot.lane.b32.xlu1 %v3181_v8, %s2916_s12  ;;  %1095 = vrot.lane.b32.xlu0 %v3181_v8, %s2917_s26  ;;  %2621 = vrcp.f32 %v744_v28  ;;  %v805_v47 = vand.u32 2147483648, %v744_v28  ;;  %vm799_vm14 = vweird.f32 %v744_v28  ;;  %v803_v48 = vand.u32 2147483647, %v744_v28 }
 0x1a4   : > { %995 = vrot.lane.b32.xlu2 %v3181_v8, %s2918_s22  ;;  %v782_v27 = vmul.f32 %v2618_v22, %v781_v25  ;;  %2623 = vpow2.f32 %v2471_v40  ;;  %v879_v40 = vld [vmem:[#allocation7 + $0x148] sm:$0xff] }
 0x1a5   : > { %v806_v50 = vor.u32 1.1754944e-38, %v805_v47  ;;  %vm804_vm1 = vcmp.eq.f32.partialorder %v803_v48, 8.507059e+37  ;;  %v714_v47 = vpop.f32.mrf.mxu1  ;;  %v887_v48 = vmul.f32 %v879_v40, %v3196_v19 }
 0x1a6   : > { %v783_v29 = vadd.f32 %v2618_v22, %v782_v27 }
 0x1a8   : > { %v787_v32 = vsel %vm786_vm11, %v2618_v22, %v783_v29  ;;  %v3302_v20 = vpop.permute.xlu1 %1411 }
 0x1a9   : > { %v792_v37 = vsel %vm789_vm12, %v791_v33, %v787_v32  ;;  %v2622_v38 = vpop.eup %2621 }
 0x1aa   : > { %v3228_v39 = vmul.f32 %v792_v37, %v3179_v2  ;;  %v795_v41 = vmul.f32 %v2622_v38, %v744_v28  ;;  %v2624_v43 = vpop.eup %2623  ;;  %vm800_vm13 = vweird.f32 %v2622_v38  ;;  %v910_v28 = vlaneseq }
 0x1ab   : > { %953 = vrot.lane.b32.xlu1 %v3196_v19, %s2914_s24  ;;  %1245 = vrot.lane.b32.xlu0 %v3181_v8, %s2919_s27  ;;  %v745_v45 = vadd.f32 1.0, %v2624_v43  ;;  %vm801_vm15 = vmor %vm799_vm14, %vm800_vm13 }
 0x1ac   : > { %1145 = vrot.lane.b32.xlu2 %v3181_v8, %s2920_s23  ;;  %v796_v42 = vsub.f32 1.0, %v795_v41  ;;  %v3318_v34 = vand.u32 127, %v910_v28  ;;  %v921_v41 = vld [vmem:[#allocation7] sm:$0xff] }
 0x1ad   : > { %2625 = vrcp.f32 %v745_v45  ;;  %vm814_vm2 = vweird.f32 %v745_v45  ;;  %v820_v62 = vand.u32 2147483648, %v745_v45  ;;  %v818_v1 = vand.u32 2147483647, %v745_v45 }
 0x1ae   : > { %v797_v44 = vmul.f32 %v2622_v38, %v796_v42  ;;  %2627 = vpow2.f32 %v2472_v56  ;;  %vm912_vm10 = vcmp.lt.s32.totalorder %v3318_v34, 5  ;;  %v922_v42 = vld [vmem:[#allocation7 + $0x8] sm:$0xff]  ;;  %v3343_v56 = vadd.f32 %v714_v47, %v3269_v4 }
 0x1af   : > { %v821_v2 = vor.u32 1.1754944e-38, %v820_v62  ;;  %vm819_vm5 = vcmp.eq.f32.partialorder %v818_v1, 8.507059e+37  ;;  %vm961_vm11 = vcmp.lt.s32.totalorder %v3318_v34, 4 }
 0x1b0   : > { %v798_v46 = vadd.f32 %v2622_v38, %v797_v44  ;;  %v2474_v62 = vmul.f32 -1.442695, %v3343_v56 }
 0x1b2   : > { %v802_v49 = vsel %vm801_vm15, %v2622_v38, %v798_v46 }
 0x1b3   : > { %1103 = vrot.lane.b32.xlu1 %v3196_v19, %s2917_s26  ;;  %1295 = vrot.lane.b32.xlu0 %v3181_v8, %s2921_s28  ;;  %v807_v53 = vsel %vm804_vm1, %v806_v50, %v802_v49  ;;  %v2626_v54 = vpop.eup %2625  ;;  %vm1061_vm1 = vcmp.lt.s32.totalorder %v3318_v34, 2 }
 0x1b4   : > { %1345 = vrot.lane.b32.xlu2 %v3181_v8, %s2922_s21  ;;  %v3252_v55 = vmul.f32 %v807_v53, %v3204_v21  ;;  %v810_v57 = vmul.f32 %v2626_v54, %v745_v45  ;;  %v2628_v59 = vpop.eup %2627  ;;  %vm815_vm3 = vweird.f32 %v2626_v54 }
 0x1b5   : > { %v746_v63 = vadd.f32 1.0, %v2628_v59  ;;  %vm816_vm4 = vmor %vm814_vm2, %vm815_vm3  ;;  %vm1011_vm2 = vcmp.lt.s32.totalorder %v3318_v34, 3  ;;  %vm1111_vm3 = vcmp.lt.s32.totalorder %v3318_v34, 1 }
 0x1b6   : > { %v811_v58 = vsub.f32 1.0, %v810_v57 }
 0x1b7   : > { %2629 = vrcp.f32 %v746_v63  ;;  %vm829_vm6 = vweird.f32 %v746_v63  ;;  %v835_v21 = vand.u32 2147483648, %v746_v63  ;;  %v833_v24 = vand.u32 2147483647, %v746_v63 }
 0x1b8   : > { %v812_v60 = vmul.f32 %v2626_v54, %v811_v58  ;;  %2631 = vpow2.f32 %v2473_v16 }
 0x1b9   : > { %v836_v26 = vor.u32 1.1754944e-38, %v835_v21  ;;  %vm834_vm9 = vcmp.eq.f32.partialorder %v833_v24, 8.507059e+37 }
 0x1ba   : > { %v813_v0 = vadd.f32 %v2626_v54, %v812_v60 }
 0x1bb   : > { %1253 = vrot.lane.b32.xlu1 %v3196_v19, %s2919_s27  ;;  %1003 = vrot.lane.b32.xlu0 %v3196_v19, %s2918_s22 }
 0x1bc   : > { %902 = vrot.lane.b32.xlu2 %v3196_v19, %s2915_s11  ;;  %v817_v3 = vsel %vm816_vm4, %v2626_v54, %v813_v0  ;;  %vm1211_vm4 = vcmp.lt.s32.totalorder %v3318_v34, 126 }
 0x1bd   : > { %v822_v5 = vsel %vm819_vm5, %v821_v2, %v817_v3  ;;  %v2630_v7 = vpop.eup %2629  ;;  %vm1161_vm5 = vcmp.lt.s32.totalorder %v3318_v34, 127 }
 0x1be   : > { %v3278_v9 = vmul.f32 %v822_v5, %v3225_v36  ;;  %v825_v11 = vmul.f32 %v2630_v7, %v746_v63  ;;  %vm830_vm7 = vweird.f32 %v2630_v7  ;;  %v2632_v25 = vpop.eup %2631  ;;  %v878_v36 = vld [vmem:[#allocation7 + $0x140] sm:$0xff] }
 0x1bf   : > { %vm831_vm8 = vmor %vm829_vm6, %vm830_vm7  ;;  %v3312_v29 = vadd.f32 1.0, %v2632_v25  ;;  %v886_v49 = vmul.f32 %v878_v36, %v3181_v8  ;;  %v972_v8 = vld [vmem:[#allocation7 + $0x48] sm:$0xff]  ;;  %v1021_v25 = vld [vmem:[#allocation7 + $0x80] sm:$0xff]  ;;  %vm1261_vm6 = vcmp.lt.s32.totalorder %v3318_v34, 125  ;;  %vm1311_vm7 = vcmp.lt.s32.totalorder %v3318_v34, 124 }
 0x1c0   : > { %v826_v15 = vsub.f32 1.0, %v825_v11  ;;  %v971_v11 = vld [vmem:[#allocation7 + $0x40] sm:$0xff] }
 0x1c1   : > { %2633 = vrcp.f32 %v3312_v29  ;;  %vm844_vm12 = vweird.f32 %v3312_v29  ;;  %v850_v2 = vand.u32 2147483648, %v3312_v29 }
 0x1c2   : > { %v827_v17 = vmul.f32 %v2630_v7, %v826_v15  ;;  %2635 = vpow2.f32 %v2474_v62 }
 0x1c3   : > { %1303 = vrot.lane.b32.xlu1 %v3196_v19, %s2921_s28  ;;  %1153 = vrot.lane.b32.xlu0 %v3196_v19, %s2920_s23 }
 0x1c4   : > { %1053 = vrot.lane.b32.xlu2 %v3196_v19, %s2913_s19  ;;  %v828_v23 = vadd.f32 %v2630_v7, %v827_v17  ;;  %v851_v17 = vor.u32 1.1754944e-38, %v850_v2 }
 0x1c6   : > { %v832_v27 = vsel %vm831_vm8, %v2630_v7, %v828_v23  ;;  %vm1361_vm8 = vcmp.lt.s32.totalorder %v3318_v34, 123 }
 0x1c7   : > { %v837_v32 = vsel %vm834_vm9, %v836_v26, %v832_v27  ;;  %v2634_v44 = vpop.eup %2633  ;;  %v1022_v26 = vld [vmem:[#allocation7 + $0x88] sm:$0xff] }
 0x1c8   : > { %v3321_v35 = vmul.f32 %v837_v32, %v3249_v52  ;;  %v840_v52 = vmul.f32 %v2634_v44, %v3312_v29  ;;  %vm845_vm13 = vweird.f32 %v2634_v44  ;;  %v2636_v16 = vpop.eup %2635  ;;  %v1072_v32 = vld [vmem:[#allocation7 + $0xc8] sm:$0xff] }
 0x1c9   : > { %vm3368_vm14 = vmor %vm844_vm12, %vm845_vm13  ;;  %v3382_v24 = vadd.f32 1.0, %v2636_v16 }
 0x1ca   : > { %v841_v58 = vsub.f32 1.0, %v840_v52 }
 0x1cb   : > { %947 = vrot.lane.b32.xlu1 %v3228_v39, %s2914_s24  ;;  %1353 = vrot.lane.b32.xlu0 %v3196_v19, %s2922_s21  ;;  %2637 = vrcp.f32 %v3382_v24  ;;  %vm859_vm9 = vweird.f32 %v3382_v24 }
 0x1cc   : > { %1203 = vrot.lane.b32.xlu2 %v3196_v19, %s2916_s12  ;;  %v842_v1 = vmul.f32 %v2634_v44, %v841_v58 }
 0x1ce   : > { %v843_v5 = vadd.f32 %v2634_v44, %v842_v1  ;;  %v1222_v1 = vld [vmem:[#allocation7 + $0x1c8] sm:$0xff] }
 0x1d0   : > { %v847_v21 = vsel %vm3368_vm14, %v2634_v44, %v843_v5 }
 0x1d3   : > { %1097 = vrot.lane.b32.xlu1 %v3228_v39, %s2917_s26  ;;  %997 = vrot.lane.b32.xlu0 %v3228_v39, %s2918_s22 }
 0x1d4   : > { %896 = vrot.lane.b32.xlu2 %v3228_v39, %s2915_s11 }
 0x1db   : > { %1197 = vrot.lane.b32.xlu1 %v3228_v39, %s2916_s12  ;;  %1147 = vrot.lane.b32.xlu0 %v3228_v39, %s2920_s23 }
 0x1dc   : > { %1047 = vrot.lane.b32.xlu2 %v3228_v39, %s2913_s19 }
 0x1e3   : > { %1005 = vrot.lane.b32.xlu1 %v3252_v55, %s2918_s22  ;;  %1247 = vrot.lane.b32.xlu0 %v3228_v39, %s2919_s27 }
 0x1e4   : > { %1297 = vrot.lane.b32.xlu2 %v3228_v39, %s2921_s28 }
 0x1eb   : > { %1155 = vrot.lane.b32.xlu1 %v3252_v55, %s2920_s23  ;;  %904 = vrot.lane.b32.xlu0 %v3252_v55, %s2915_s11 }
 0x1ec   : > { %1347 = vrot.lane.b32.xlu2 %v3228_v39, %s2922_s21 }
 0x1f3   : > { %1255 = vrot.lane.b32.xlu1 %v3252_v55, %s2919_s27  ;;  %1055 = vrot.lane.b32.xlu0 %v3252_v55, %s2913_s19 }
 0x1f4   : > { %955 = vrot.lane.b32.xlu2 %v3252_v55, %s2914_s24 }
 0x1f6   : > { %v895_v6 = vpop.permute.xlu2 %894 }
 0x1fb   : > { %999 = vrot.lane.b32.xlu1 %v3278_v9, %s2918_s22  ;;  %1305 = vrot.lane.b32.xlu0 %v3252_v55, %s2921_s28 }
 0x1fc   : > { %1105 = vrot.lane.b32.xlu2 %v3252_v55, %s2917_s26 }
 0x1fe   : > { %v3291_v14 = vpop.permute.xlu2 %995 }
 0x203   : > { %1149 = vrot.lane.b32.xlu1 %v3278_v9, %s2920_s23  ;;  %1355 = vrot.lane.b32.xlu0 %v3252_v55, %s2922_s21 }
 0x204   : > { %1205 = vrot.lane.b32.xlu2 %v3252_v55, %s2916_s12 }
 0x206   : > { %v3304_v22 = vpop.permute.xlu2 %1145 }
 0x20b   : > { %1349 = vrot.lane.b32.xlu1 %v3278_v9, %s2922_s21  ;;  %898 = vrot.lane.b32.xlu0 %v3278_v9, %s2915_s11 }
 0x20c   : > { %949 = vrot.lane.b32.xlu2 %v3278_v9, %s2914_s24 }
 0x20d   : > { %v3314_v30 = vpop.permute.xlu1 %1045  ;;  %v946_v31 = vpop.permute.xlu0 %945 }
 0x20e   : > { %v3316_v33 = vpop.permute.xlu2 %1345 }
 0x213   : > { %906 = vrot.lane.b32.xlu1 %v3321_v35, %s2915_s11  ;;  %1049 = vrot.lane.b32.xlu0 %v3278_v9, %s2913_s19 }
 0x214   : > { %1099 = vrot.lane.b32.xlu2 %v3278_v9, %s2917_s26 }
 0x215   : > { %v3331_v37 = vpop.permute.xlu1 %1195  ;;  %v3333_v38 = vpop.permute.xlu0 %1095 }
 0x216   : > { %v903_v43 = vpop.permute.xlu2 %902 }
 0x217   : > { %v913_v45 = vsel %vm912_vm10, %v895_v6, %v903_v43  ;;  %v917_v46 = vsel %vm912_vm10, %v903_v43, %v895_v6  ;;  %v848_v6 = vand.u32 2147483647, %v3312_v29 }
 0x218   : > { %v929_v50 = vmul.f32 %v921_v41, %v917_v46  ;;  %v930_v51 = vmul.f32 %v922_v42, %v913_v45 }
 0x219   : > { %vm849_vm15 = vcmp.eq.f32.partialorder %v848_v6, 8.507059e+37 }
 0x21a   : > { %v937_v53 = vadd.f32 %v929_v50, %v886_v49  ;;  %v938_v54 = vadd.f32 %v930_v51, %v887_v48  ;;  %v852_v27 = vsel %vm849_vm15, %v851_v17, %v847_v21  ;;  %v1122_v48 = vld [vmem:[#allocation7 + $0x108] sm:$0xff]  ;;  %vm1609_vm15 = vcmp.lt.s32.totalorder %v3318_v34, 32 }
 0x21b   : > { %1057 = vrot.lane.b32.xlu1 %v3321_v35, %s2913_s19  ;;  %1199 = vrot.lane.b32.xlu0 %v3278_v9, %s2916_s12  ;;  %v3402_v47 = vmul.f32 %v852_v27, %v3287_v13 }
 0x21c   : > { %1299 = vrot.lane.b32.xlu2 %v3278_v9, %s2921_s28 }
 0x21d   : > { %v954_v19 = vpop.permute.xlu1 %953  ;;  %v3352_v57 = vpop.permute.xlu0 %1245 }
 0x21e   : > { %v962_v59 = vsel %vm961_vm11, %v946_v31, %v954_v19  ;;  %v1054_v60 = vpop.permute.xlu2 %1053  ;;  %v966_v15 = vsel %vm961_vm11, %v954_v19, %v946_v31  ;;  %v1071_v31 = vld [vmem:[#allocation7 + $0xc0] sm:$0xff] }
 0x21f   : > { %v980_v63 = vmul.f32 %v972_v8, %v962_v59  ;;  %v979_v23 = vmul.f32 %v971_v11, %v966_v15  ;;  %v1062_v36 = vsel %vm1061_vm1, %v3314_v30, %v1054_v60  ;;  %v1066_v40 = vsel %vm1061_vm1, %v1054_v60, %v3314_v30  ;;  %v1171_v19 = vld [vmem:[#allocation7 + $0x180] sm:$0xff] }
 0x220   : > { %v1079_v49 = vmul.f32 %v1071_v31, %v1066_v40  ;;  %v1080_v50 = vmul.f32 %v1072_v32, %v1062_v36  ;;  %v1271_v11 = vld [vmem:[#allocation7 + $0x200] sm:$0xff]  ;;  %v1322_v32 = vld [vmem:[#allocation7 + $0x248] sm:$0xff] }
 0x221   : > { %v988_v0 = vadd.f32 %v980_v63, %v938_v54  ;;  %v987_v44 = vadd.f32 %v979_v23, %v937_v53  ;;  %v3421_v63 = vpop.eup %2637  ;;  %v1272_v23 = vld [vmem:[#allocation7 + $0x208] sm:$0xff]  ;;  %v1321_v31 = vld [vmem:[#allocation7 + $0x240] sm:$0xff] }
 0x222   : > { %vm860_vm12 = vweird.f32 %v3421_v63 }
 0x223   : > { %1207 = vrot.lane.b32.xlu1 %v3321_v35, %s2916_s12  ;;  %1249 = vrot.lane.b32.xlu0 %v3278_v9, %s2919_s27  ;;  %vm861_vm13 = vmor %vm859_vm9, %vm860_vm12 }
 0x224   : > { %1007 = vrot.lane.b32.xlu2 %v3321_v35, %s2918_s22 }
 0x225   : > { %v1104_v3 = vpop.permute.xlu1 %1103  ;;  %v3365_v4 = vpop.permute.xlu0 %1295 }
 0x226   : > { %v1204_v7 = vpop.permute.xlu2 %1203  ;;  %v1112_v30 = vsel %vm1111_vm3, %v3333_v38, %v1104_v3  ;;  %v1116_v53 = vsel %vm1111_vm3, %v1104_v3, %v3333_v38  ;;  %v1172_v38 = vld [vmem:[#allocation7 + $0x188] sm:$0xff] }
 0x227   : > { %v1130_v13 = vmul.f32 %v1122_v48, %v1112_v30  ;;  %v1212_v2 = vsel %vm1211_vm4, %v3331_v37, %v1204_v7  ;;  %v1216_v3 = vsel %vm1211_vm4, %v1204_v7, %v3331_v37 }
 0x22b   : > { %1257 = vrot.lane.b32.xlu1 %v3321_v35, %s2919_s27  ;;  %957 = vrot.lane.b32.xlu0 %v3321_v35, %s2914_s24 }
 0x22c   : > { %1357 = vrot.lane.b32.xlu2 %v3321_v35, %s2922_s21 }
 0x22d   : > { %v1254_v28 = vpop.permute.xlu1 %1253  ;;  %v1004_v29 = vpop.permute.xlu0 %1003 }
 0x22e   : > { %v1012_v41 = vsel %vm1011_vm2, %v3291_v14, %v1004_v29  ;;  %v1016_v42 = vsel %vm1011_vm2, %v1004_v29, %v3291_v14  ;;  %v3399_v43 = vpop.permute.xlu2 %896  ;;  %v1121_v14 = vld [vmem:[#allocation7 + $0x100] sm:$0xff]  ;;  %v1262_v15 = vsel %vm1261_vm6, %v3352_v57, %v1254_v28  ;;  %v1266_v37 = vsel %vm1261_vm6, %v1254_v28, %v3352_v57 }
 0x22f   : > { %v1029_v45 = vmul.f32 %v1021_v25, %v1016_v42  ;;  %v1030_v46 = vmul.f32 %v1022_v26, %v1012_v41  ;;  %v1129_v58 = vmul.f32 %v1121_v14, %v1116_v53  ;;  %v1230_v25 = vmul.f32 %v1222_v1, %v1216_v3  ;;  %v1371_v42 = vld [vmem:[#allocation7 + $0x280] sm:$0xff] }
 0x230   : > { %v1279_v29 = vmul.f32 %v1271_v11, %v1262_v15  ;;  %v1280_v41 = vmul.f32 %v1272_v23, %v1266_v37  ;;  %v923_v37 = vld [vmem:[#allocation7 + $0x10] sm:$0xff] }
 0x231   : > { %v1037_v51 = vadd.f32 %v1029_v45, %v987_v44  ;;  %v1038_v52 = vadd.f32 %v1030_v46, %v988_v0  ;;  %v1221_v0 = vld [vmem:[#allocation7 + $0x1c0] sm:$0xff]  ;;  %v1372_v44 = vld [vmem:[#allocation7 + $0x288] sm:$0xff] }
 0x232   : > { %v1229_v7 = vmul.f32 %v1221_v0, %v1212_v2  ;;  %v863_v2 = vand.u32 2147483647, %v3382_v24 }
 0x233   : > { %v1087_v54 = vadd.f32 %v1079_v49, %v1037_v51  ;;  %v1088_v8 = vadd.f32 %v1080_v50, %v1038_v52  ;;  %900 = vrot.lane.b32.xlu1 %v3402_v47, %s2915_s11  ;;  %1107 = vrot.lane.b32.xlu0 %v3321_v35, %s2917_s26 }
 0x234   : > { %1001 = vrot.lane.b32.xlu2 %v3402_v47, %s2918_s22  ;;  %vm864_vm14 = vcmp.eq.f32.partialorder %v863_v2, 8.507059e+37 }
 0x235   : > { %v1304_v59 = vpop.permute.xlu1 %1303  ;;  %v1154_v60 = vpop.permute.xlu0 %1153  ;;  %v1138_v62 = vadd.f32 %v1130_v13, %v1088_v8  ;;  %v1137_v16 = vadd.f32 %v1129_v58, %v1087_v54 }
 0x236   : > { %v1162_v5 = vsel %vm1161_vm5, %v3304_v22, %v1154_v60  ;;  %v1166_v6 = vsel %vm1161_vm5, %v1154_v60, %v3304_v22  ;;  %v3435_v10 = vpop.permute.xlu2 %1047  ;;  %v855_v22 = vmul.f32 %v3421_v63, %v3382_v24  ;;  %v1312_v36 = vsel %vm1311_vm7, %v3365_v4, %v1304_v59 }
 0x237   : > { %v1179_v17 = vmul.f32 %v1171_v19, %v1162_v5  ;;  %v1180_v21 = vmul.f32 %v1172_v38, %v1166_v6  ;;  %v1316_v40 = vsel %vm1311_vm7, %v1304_v59, %v3365_v4  ;;  %v1329_v45 = vmul.f32 %v1321_v31, %v1312_v36 }
 0x238   : > { %v1330_v46 = vmul.f32 %v1322_v32, %v1316_v40  ;;  %v856_v50 = vsub.f32 1.0, %v855_v22 }
 0x239   : > { %v1187_v26 = vadd.f32 %v1179_v17, %v1137_v16  ;;  %v1188_v27 = vadd.f32 %v1180_v21, %v1138_v62 }
 0x23a   : > { %v857_v58 = vmul.f32 %v3421_v63, %v856_v50 }
 0x23b   : > { %v1237_v57 = vadd.f32 %v1229_v7, %v1187_v26  ;;  %v1238_v28 = vadd.f32 %v1230_v25, %v1188_v27  ;;  %1051 = vrot.lane.b32.xlu1 %v3402_v47, %s2913_s19  ;;  %1157 = vrot.lane.b32.xlu0 %v3321_v35, %s2920_s23  ;;  %v880_v26 = vld [vmem:[#allocation7 + $0x150] sm:$0xff] }
 0x23c   : > { %1151 = vrot.lane.b32.xlu2 %v3402_v47, %s2920_s23  ;;  %v858_v1 = vadd.f32 %v3421_v63, %v857_v58  ;;  %v888_v22 = vmul.f32 %v880_v26, %v3228_v39  ;;  %v924_v39 = vld [vmem:[#allocation7 + $0x18] sm:$0xff] }
 0x23d   : > { %v3458_v48 = vpop.permute.xlu1 %947  ;;  %v1354_v4 = vpop.permute.xlu0 %1353  ;;  %v1287_v30 = vadd.f32 %v1279_v29, %v1237_v57  ;;  %v1288_v49 = vadd.f32 %v1280_v41, %v1238_v28  ;;  %v973_v29 = vld [vmem:[#allocation7 + $0x50] sm:$0xff] }
 0x23e   : > { %v1362_v51 = vsel %vm1361_vm8, %v3316_v33, %v1354_v4  ;;  %v1366_v52 = vsel %vm1361_vm8, %v1354_v4, %v3316_v33  ;;  %v3466_v14 = vpop.permute.xlu2 %1297  ;;  %v862_v5 = vsel %vm861_vm13, %v3421_v63, %v858_v1 }
 0x23f   : > { %v1337_v53 = vadd.f32 %v1329_v45, %v1287_v30  ;;  %v1338_v13 = vadd.f32 %v1330_v46, %v1288_v49  ;;  %v1379_v54 = vmul.f32 %v1371_v42, %v1362_v51  ;;  %v1380_v8 = vmul.f32 %v1372_v44, %v1366_v52  ;;  %v1023_v42 = vld [vmem:[#allocation7 + $0x90] sm:$0xff]  ;;  %v881_v45 = vld [vmem:[#allocation7 + $0x158] sm:$0xff] }
 0x240   : > { %v1073_v46 = vld [vmem:[#allocation7 + $0xd0] sm:$0xff]  ;;  %v889_v51 = vmul.f32 %v881_v45, %v3252_v55  ;;  %v974_v52 = vld [vmem:[#allocation7 + $0x58] sm:$0xff] }
 0x241   : > { %v1387_v19 = vadd.f32 %v1379_v54, %v1337_v53  ;;  %v1388_v38 = vadd.f32 %v1380_v8, %v1338_v13  ;;  %v1174_v45 = vld [vmem:[#allocation7 + $0x198] sm:$0xff] }
 0x243   : > { %v3470_v59 = vadd.f32 %v3300_v18, %v1387_v19  ;;  %v3473_v60 = vadd.f32 %v3300_v18, %v1388_v38  ;;  %1201 = vrot.lane.b32.xlu1 %v3402_v47, %s2916_s12  ;;  %1307 = vrot.lane.b32.xlu0 %v3321_v35, %s2921_s28  ;;  %v865_v18 = vand.u32 2147483648, %v3382_v24  ;;  %v1123_v19 = vld [vmem:[#allocation7 + $0x110] sm:$0xff] }
 0x244   : > { %1251 = vrot.lane.b32.xlu2 %v3402_v47, %s2919_s27 }
 0x245   : > { %v3483_v33 = vpop.permute.xlu1 %1097  ;;  %v3485_v62 = vpop.permute.xlu0 %997  ;;  %v866_v3 = vor.u32 1.1754944e-38, %v865_v18 }
 0x246   : > { %v3488_v0 = vpop.permute.xlu2 %1347 }
 0x247   : > { %v867_v15 = vsel %vm864_vm14, %v866_v3, %v862_v5  ;;  %v1074_v3 = vld [vmem:[#allocation7 + $0xd8] sm:$0xff] }
 0x248   : > { %v3504_v16 = vmul.f32 %v867_v15, %v3343_v56 }
 0x24b   : > { %1351 = vrot.lane.b32.xlu1 %v3402_v47, %s2922_s21  ;;  %951 = vrot.lane.b32.xlu0 %v3402_v47, %s2914_s24 }
 0x24c   : > { %1301 = vrot.lane.b32.xlu2 %v3402_v47, %s2921_s28 }
 0x24d   : > { %v3499_v6 = vpop.permute.xlu1 %1197  ;;  %v3501_v11 = vpop.permute.xlu0 %1147 }
 0x24e   : > { %v956_v24 = vpop.permute.xlu2 %955 }
 0x24f   : > { %v967_v31 = vsel %vm961_vm11, %v956_v24, %v3458_v48  ;;  %v963_v53 = vsel %vm961_vm11, %v3458_v48, %v956_v24  ;;  %v1024_v48 = vld [vmem:[#allocation7 + $0x98] sm:$0xff] }
 0x250   : > { %v981_v28 = vmul.f32 %v973_v29, %v967_v31  ;;  %v982_v18 = vmul.f32 %v974_v52, %v963_v53  ;;  %v1124_v29 = vld [vmem:[#allocation7 + $0x118] sm:$0xff]  ;;  %v1323_v52 = vld [vmem:[#allocation7 + $0x250] sm:$0xff] }
 0x253   : > { %959 = vrot.lane.b32.xlu1 %v3504_v16, %s2914_s24  ;;  %1101 = vrot.lane.b32.xlu0 %v3402_v47, %s2917_s26  ;;  %s2926_s24 = smov 48  }
 0x254   : > { %908 = vrot.lane.b32.xlu2 %v3504_v16, %s2915_s11  ;;  %s2927_s11 = smov 16  }
 0x255   : > { %v1006_v63 = vpop.permute.xlu1 %1005  ;;  %v3512_v17 = vpop.permute.xlu0 %1247 }
 0x256   : > { %v3514_v21 = vpop.permute.xlu2 %1105  ;;  %v1017_v44 = vsel %vm1011_vm2, %v1006_v63, %v3485_v62  ;;  %v1013_v2 = vsel %vm1011_vm2, %v3485_v62, %v1006_v63 }
 0x257   : > { %v1031_v50 = vmul.f32 %v1023_v42, %v1017_v44  ;;  %v1117_v38 = vsel %vm1111_vm3, %v3514_v21, %v3483_v33  ;;  %v1113_v31 = vsel %vm1111_vm3, %v3483_v33, %v3514_v21 }
 0x258   : > { %v1131_v15 = vmul.f32 %v1123_v19, %v1117_v38  ;;  %v1132_v42 = vmul.f32 %v1124_v29, %v1113_v31 }
 0x25b   : > { %1109 = vrot.lane.b32.xlu1 %v3504_v16, %s2917_s26  ;;  %1009 = vrot.lane.b32.xlu0 %v3504_v16, %s2918_s22  ;;  %s2929_s26 = smov 96  }
 0x25c   : > { %1059 = vrot.lane.b32.xlu2 %v3504_v16, %s2913_s19  ;;  %s2925_s19 = smov 32  }
 0x25d   : > { %v3522_v56 = vpop.permute.xlu1 %1155  ;;  %v905_v23 = vpop.permute.xlu0 %904 }
 0x25e   : > { %v918_v7 = vsel %vm912_vm10, %v905_v23, %v3399_v43  ;;  %v3527_v25 = vpop.permute.xlu2 %1205  ;;  %v914_v41 = vsel %vm912_vm10, %v3399_v43, %v905_v23  ;;  %v1173_v23 = vld [vmem:[#allocation7 + $0x190] sm:$0xff] }
 0x25f   : > { %v931_v27 = vmul.f32 %v923_v37, %v918_v7  ;;  %v932_v30 = vmul.f32 %v924_v39, %v914_v41  ;;  %v1163_v37 = vsel %vm1161_vm5, %v3501_v11, %v3522_v56  ;;  %v1032_v7 = vmul.f32 %v1024_v48, %v1013_v2 }
 0x261   : > { %v939_v32 = vadd.f32 %v931_v27, %v888_v22  ;;  %v940_v13 = vadd.f32 %v932_v30, %v889_v51  ;;  %v1224_v51 = vld [vmem:[#allocation7 + $0x1d8] sm:$0xff] }
 0x263   : > { %1259 = vrot.lane.b32.xlu0 %v3504_v16, %s2919_s27  ;;  %1444 = vrot.lane.b32.xlu1 %v3470_v59, %s2923_s18  ;;  %v989_v49 = vadd.f32 %v981_v28, %v939_v32  ;;  %v990_v24 = vadd.f32 %v982_v18, %v940_v13  ;;  %v1223_v32 = vld [vmem:[#allocation7 + $0x1d0] sm:$0xff] }
 0x264   : > { %1159 = vrot.lane.b32.xlu2 %v3504_v16, %s2920_s23  ;;  %v1373_v13 = vld [vmem:[#allocation7 + $0x290] sm:$0xff]  ;;  %s2851_s23 = scalar_lea.hbm %s4478_s10, 128 }
 0x265   : > { %v3539_v36 = vpop.permute.xlu1 %1255  ;;  %v1056_v40 = vpop.permute.xlu0 %1055  ;;  %v1039_v54 = vadd.f32 %v1031_v50, %v989_v49  ;;  %v1040_v62 = vadd.f32 %v1032_v7, %v990_v24  ;;  %v1324_v7 = vld [vmem:[#allocation7 + $0x258] sm:$0xff] }
 0x266   : > { %v3544_v57 = vpop.permute.xlu2 %949  ;;  %v1067_v4 = vsel %vm1061_vm1, %v1056_v40, %v3435_v10  ;;  %v1063_v5 = vsel %vm1061_vm1, %v3435_v10, %v1056_v40  ;;  %v1181_v10 = vmul.f32 %v1173_v23, %v1163_v37  ;;  %v1213_v40 = vsel %vm1211_vm4, %v3499_v6, %v3527_v25 }
 0x267   : > { %v1081_v43 = vmul.f32 %v1073_v46, %v1067_v4  ;;  %v1082_v26 = vmul.f32 %v1074_v3, %v1063_v5  ;;  %v1231_v44 = vmul.f32 %v1223_v32, %v1213_v40  ;;  %v1167_v46 = vsel %vm1161_vm5, %v3522_v56, %v3501_v11  ;;  %v1273_v4 = vld [vmem:[#allocation7 + $0x210] sm:$0xff]  ;;  %v1274_v3 = vld [vmem:[#allocation7 + $0x218] sm:$0xff] }
 0x268   : > { %v1263_v33 = vsel %vm1261_vm6, %v3512_v17, %v3539_v36  ;;  %v1182_v11 = vmul.f32 %v1174_v45, %v1167_v46 }
 0x269   : > { %v1089_v1 = vadd.f32 %v1081_v43, %v1039_v54  ;;  %v1090_v41 = vadd.f32 %v1082_v26, %v1040_v62  ;;  %v1281_v56 = vmul.f32 %v1273_v4, %v1263_v33  ;;  %v1217_v43 = vsel %vm1211_vm4, %v3527_v25, %v3499_v6  ;;  %v882_v4 = vld [vmem:[#allocation7 + $0x160] sm:$0xff] }
 0x26a   : > { %v1267_v6 = vsel %vm1261_vm6, %v3539_v36, %v3512_v17  ;;  %v1374_v36 = vld [vmem:[#allocation7 + $0x298] sm:$0xff] }
 0x26b   : > { %1309 = vrot.lane.b32.xlu0 %v3504_v16, %s2921_s28  ;;  %1501 = vrot.lane.b32.xlu1 %v3473_v60, %s2924_s25  ;;  %v1139_v27 = vadd.f32 %v1131_v15, %v1089_v1  ;;  %v1140_v21 = vadd.f32 %v1132_v42, %v1090_v41  ;;  %v1232_v1 = vmul.f32 %v1224_v51, %v1217_v43  ;;  %s4367_s28 = scalar_lea.vmem [#allocation10], %s2454_s6  ;;  %s2505_s6 = sshll.u32 %s3007_s17, 6 }
 0x26c   : > { %1209 = vrot.lane.b32.xlu2 %v3504_v16, %s2916_s12  ;;  %s2928_s12 = smov 112   ;;  %v1282_v15 = vmul.f32 %v1274_v3, %v1267_v6  ;;  %s2339_s17 = sshll.u32 %s4367_s28, 4  ;;  %s2340_s17 = int_to_ptr.vmem [resolvable:$true] %s2339_s17 }
 0x26d   : > { %v3562_v8 = vpop.permute.xlu1 %999  ;;  %v3564_v55 = vpop.permute.xlu0 %1305  ;;  %v1189_v28 = vadd.f32 %v1181_v10, %v1139_v27  ;;  %v1190_v38 = vadd.f32 %v1182_v11, %v1140_v21  ;;  %v975_v11 = vld [vmem:[#allocation7 + $0x60] sm:$0xff] }
 0x26e   : > { %v3570_v58 = vpop.permute.xlu2 %1099  ;;  %v1313_v53 = vsel %vm1311_vm7, %v3466_v14, %v3564_v55  ;;  %v1317_v17 = vsel %vm1311_vm7, %v3564_v55, %v3466_v14 }
 0x26f   : > { %v1239_v30 = vadd.f32 %v1231_v44, %v1189_v28  ;;  %v1331_v48 = vmul.f32 %v1323_v52, %v1313_v53  ;;  %v1240_v25 = vadd.f32 %v1232_v1, %v1190_v38  ;;  %v1332_v62 = vmul.f32 %v1324_v7, %v1317_v17  ;;  %v926_v44 = vld [vmem:[#allocation7 + $0x28] sm:$0xff]  ;;  %v1075_v7 = vld [vmem:[#allocation7 + $0xe0] sm:$0xff] }
 0x270   : > { %v1076_v17 = vld [vmem:[#allocation7 + $0xe8] sm:$0xff] }
 0x271   : > { %v1289_v18 = vadd.f32 %v1281_v56, %v1239_v30  ;;  %v1290_v10 = vadd.f32 %v1282_v15, %v1240_v25  ;;  %v883_v30 = vld [vmem:[#allocation7 + $0x168] sm:$0xff] }
 0x272   : > { %v976_v56 = vld [vmem:[#allocation7 + $0x68] sm:$0xff] }
 0x273   : > { %1493 = vrot.lane.b32.xlu0 %v3470_v59, %s2924_s25  ;;  %1593 = vrot.lane.b32.xlu1 %v3470_v59, %s2925_s19  ;;  %v1339_v5 = vadd.f32 %v1331_v48, %v1289_v18  ;;  %v1340_v32 = vadd.f32 %v1332_v62, %v1290_v10 }
 0x274   : > { %1359 = vrot.lane.b32.xlu2 %v3504_v16, %s2922_s21 }
 0x275   : > { %v3588_v63 = vpop.permute.xlu1 %1149  ;;  %v1356_v22 = vpop.permute.xlu0 %1355 }
 0x276   : > { %v3598_v39 = vpop.permute.xlu2 %1299  ;;  %v1363_v54 = vsel %vm1361_vm8, %v3488_v0, %v1356_v22  ;;  %v1367_v26 = vsel %vm1361_vm8, %v1356_v22, %v3488_v0 }
 0x277   : > { %v1381_v2 = vmul.f32 %v1373_v13, %v1363_v54  ;;  %v1382_v29 = vmul.f32 %v1374_v36, %v1367_v26  ;;  %v890_v13 = vmul.f32 %v882_v4, %v3278_v9  ;;  %v891_v54 = vmul.f32 %v883_v30, %v3321_v35  ;;  %v1126_v26 = vld [vmem:[#allocation7 + $0x128] sm:$0xff] }
 0x279   : > { %v1389_v24 = vadd.f32 %v1381_v2, %v1339_v5  ;;  %v1390_v14 = vadd.f32 %v1382_v29, %v1340_v32  ;;  %v1025_v2 = vld [vmem:[#allocation7 + $0xa0] sm:$0xff] }
 0x27b   : > { %1551 = vrot.lane.b32.xlu0 %v3473_v60, %s2926_s24  ;;  %1651 = vrot.lane.b32.xlu1 %v3473_v60, %s2927_s11  ;;  %v3651_v31 = vadd.f32 %v3267_v61, %v1389_v24  ;;  %v3664_v40 = vadd.f32 %v3267_v61, %v1390_v14  ;;  %v925_v61 = vld [vmem:[#allocation7 + $0x20] sm:$0xff] }
 0x27c   : > { %1452 = vrot.lane.b32.xlu2 %v3473_v60, %s2923_s18 }
 0x27d   : > { %v3614_v49 = vpop.permute.xlu1 %1349  ;;  %v899_v50 = vpop.permute.xlu0 %898 }
 0x27e   : > { %v3627_v19 = vpop.permute.xlu2 %1007 }
 0x27f   : > { %v1014_v3 = vsel %vm1011_vm2, %v3562_v8, %v3627_v19  ;;  %v1018_v9 = vsel %vm1011_vm2, %v3627_v19, %v3562_v8  ;;  %v1125_v19 = vld [vmem:[#allocation7 + $0x120] sm:$0xff] }
 0x280   : > { %v1033_v24 = vmul.f32 %v1025_v2, %v1018_v9  ;;  %v1276_v9 = vld [vmem:[#allocation7 + $0x228] sm:$0xff] }
 0x283   : > { %1643 = vrot.lane.b32.xlu0 %v3470_v59, %s2927_s11  ;;  %1701 = vrot.lane.b32.xlu1 %v3473_v60, %s2928_s12 }
 0x284   : > { %1543 = vrot.lane.b32.xlu2 %v3470_v59, %s2926_s24 }
 0x285   : > { %v907_v23 = vpop.permute.xlu1 %906  ;;  %v3639_v37 = vpop.permute.xlu0 %1049 }
 0x286   : > { %v3648_v27 = vpop.permute.xlu2 %1357  ;;  %v915_v45 = vsel %vm912_vm10, %v899_v50, %v907_v23  ;;  %v919_v46 = vsel %vm912_vm10, %v907_v23, %v899_v50 }
 0x287   : > { %v933_v50 = vmul.f32 %v925_v61, %v919_v46  ;;  %v934_v53 = vmul.f32 %v926_v44, %v915_v45 }
 0x289   : > { %v941_v1 = vadd.f32 %v933_v50, %v890_v13  ;;  %v942_v48 = vadd.f32 %v934_v53, %v891_v54 }
 0x28b   : > { %1693 = vrot.lane.b32.xlu0 %v3470_v59, %s2928_s12  ;;  %1446 = vrot.lane.b32.xlu1 %v3651_v31, %s2923_s18 }
 0x28c   : > { %1601 = vrot.lane.b32.xlu2 %v3473_v60, %s2925_s19 }
 0x28d   : > { %v1058_v0 = vpop.permute.xlu1 %1057  ;;  %v3659_v55 = vpop.permute.xlu0 %1199 }
 0x28e   : > { %v3661_v22 = vpop.permute.xlu2 %1001  ;;  %v1064_v36 = vsel %vm1061_vm1, %v3639_v37, %v1058_v0  ;;  %v1068_v8 = vsel %vm1061_vm1, %v1058_v0, %v3639_v37  ;;  %v1175_v37 = vld [vmem:[#allocation7 + $0x1a0] sm:$0xff]  ;;  %v1176_v0 = vld [vmem:[#allocation7 + $0x1a8] sm:$0xff] }
 0x28f   : > { %v1083_v14 = vmul.f32 %v1075_v7, %v1068_v8  ;;  %v1084_v61 = vmul.f32 %v1076_v17, %v1064_v36  ;;  %v1375_v36 = vld [vmem:[#allocation7 + $0x2a0] sm:$0xff]  ;;  %v1376_v8 = vld [vmem:[#allocation7 + $0x2a8] sm:$0xff] }
 0x293   : > { %1495 = vrot.lane.b32.xlu0 %v3651_v31, %s2924_s25  ;;  %1503 = vrot.lane.b32.xlu1 %v3664_v40, %s2924_s25 }
 0x294   : > { %1454 = vrot.lane.b32.xlu2 %v3664_v40, %s2923_s18 }
 0x295   : > { %v3672_v41 = vpop.permute.xlu1 %1207  ;;  %v3674_v28 = vpop.permute.xlu0 %1249 }
 0x296   : > { %v3676_v42 = vpop.permute.xlu2 %1151 }
 0x29b   : > { %1553 = vrot.lane.b32.xlu0 %v3664_v40, %s2926_s24  ;;  %1595 = vrot.lane.b32.xlu1 %v3651_v31, %s2925_s19 }
 0x29c   : > { %1545 = vrot.lane.b32.xlu2 %v3651_v31, %s2926_s24 }
 0x29d   : > { %v3688_v33 = vpop.permute.xlu1 %1257  ;;  %v958_v21 = vpop.permute.xlu0 %957 }
 0x29e   : > { %v964_v51 = vsel %vm961_vm11, %v3544_v57, %v958_v21  ;;  %v968_v43 = vsel %vm961_vm11, %v958_v21, %v3544_v57  ;;  %v3696_v52 = vpop.permute.xlu2 %1251  ;;  %v1026_v57 = vld [vmem:[#allocation7 + $0xa8] sm:$0xff] }
 0x29f   : > { %v983_v38 = vmul.f32 %v975_v11, %v968_v43  ;;  %v984_v18 = vmul.f32 %v976_v56, %v964_v51  ;;  %v1034_v23 = vmul.f32 %v1026_v57, %v1014_v3  ;;  %v1226_v11 = vld [vmem:[#allocation7 + $0x1e8] sm:$0xff]  ;;  %v1214_v56 = vsel %vm1211_vm4, %v3659_v55, %v3672_v41  ;;  %v1275_v3 = vld [vmem:[#allocation7 + $0x220] sm:$0xff] }
 0x2a0   : > { %v1218_v51 = vsel %vm1211_vm4, %v3672_v41, %v3659_v55  ;;  %v1264_v55 = vsel %vm1261_vm6, %v3674_v28, %v3688_v33 }
 0x2a1   : > { %v991_v35 = vadd.f32 %v983_v38, %v941_v1  ;;  %v992_v6 = vadd.f32 %v984_v18, %v942_v48  ;;  %v1234_v48 = vmul.f32 %v1226_v11, %v1218_v51  ;;  %v928_v51 = vld [vmem:[#allocation7 + $0x38] sm:$0xff] }
 0x2a3   : > { %1645 = vrot.lane.b32.xlu0 %v3651_v31, %s2927_s11  ;;  %1653 = vrot.lane.b32.xlu1 %v3664_v40, %s2927_s11  ;;  %v1041_v29 = vadd.f32 %v1033_v24, %v991_v35  ;;  %v1042_v32 = vadd.f32 %v1034_v23, %v992_v6  ;;  %v1325_v6 = vld [vmem:[#allocation7 + $0x260] sm:$0xff]  ;;  %v1283_v24 = vmul.f32 %v1275_v3, %v1264_v55  ;;  %v1027_v55 = vld [vmem:[#allocation7 + $0xb0] sm:$0xff] }
 0x2a4   : > { %1603 = vrot.lane.b32.xlu2 %v3664_v40, %s2925_s19 }
 0x2a5   : > { %v3714_v25 = vpop.permute.xlu1 %900  ;;  %v1108_v5 = vpop.permute.xlu0 %1107  ;;  %v1091_v46 = vadd.f32 %v1083_v14, %v1041_v29  ;;  %v1092_v4 = vadd.f32 %v1084_v61, %v1042_v32 }
 0x2a6   : > { %v3716_v15 = vpop.permute.xlu2 %1301  ;;  %v1114_v10 = vsel %vm1111_vm3, %v3570_v58, %v1108_v5  ;;  %v1118_v62 = vsel %vm1111_vm3, %v1108_v5, %v3570_v58  ;;  %v1225_v58 = vld [vmem:[#allocation7 + $0x1e0] sm:$0xff]  ;;  %v1326_v5 = vld [vmem:[#allocation7 + $0x268] sm:$0xff] }
 0x2a7   : > { %v1133_v44 = vmul.f32 %v1125_v19, %v1118_v62  ;;  %v1134_v45 = vmul.f32 %v1126_v26, %v1114_v10  ;;  %v1233_v1 = vmul.f32 %v1225_v58, %v1214_v56  ;;  %v927_v56 = vld [vmem:[#allocation7 + $0x30] sm:$0xff] }
 0x2a9   : > { %v1141_v13 = vadd.f32 %v1133_v44, %v1091_v46  ;;  %v1142_v54 = vadd.f32 %v1134_v45, %v1092_v4 }
 0x2ab   : > { %1703 = vrot.lane.b32.xlu0 %v3664_v40, %s2928_s12 }
 0x2ac   : > { %1695 = vrot.lane.b32.xlu2 %v3651_v31, %s2928_s12 }
 0x2ad   : > { %v3734_v21 = vpop.permute.xlu1 %1051  ;;  %v1158_v30 = vpop.permute.xlu0 %1157 }
 0x2ae   : > { %v1164_v43 = vsel %vm1161_vm5, %v3588_v63, %v1158_v30  ;;  %v1168_v50 = vsel %vm1161_vm5, %v1158_v30, %v3588_v63  ;;  %v909_v53 = vpop.permute.xlu2 %908  ;;  %v1268_v63 = vsel %vm1261_vm6, %v3688_v33, %v3674_v28  ;;  %v1364_v28 = vsel %vm1361_vm8, %v3614_v49, %v3648_v27 }
 0x2af   : > { %v1183_v38 = vmul.f32 %v1175_v37, %v1164_v43  ;;  %v1184_v18 = vmul.f32 %v1176_v0, %v1168_v50  ;;  %v1284_v23 = vmul.f32 %v1276_v9, %v1268_v63  ;;  %v1368_v33 = vsel %vm1361_vm8, %v3648_v27, %v3614_v49  ;;  %v1028_v63 = vld [vmem:[#allocation7 + $0xb8] sm:$0xff] }
 0x2b0   : > { %v1383_v61 = vmul.f32 %v1375_v36, %v1364_v28  ;;  %v1384_v44 = vmul.f32 %v1376_v8, %v1368_v33  ;;  %v920_v43 = vsel %vm912_vm10, %v909_v53, %v3714_v25 }
 0x2b1   : > { %v1191_v2 = vadd.f32 %v1183_v38, %v1141_v13  ;;  %v1192_v57 = vadd.f32 %v1184_v18, %v1142_v54  ;;  %v884_v13 = vld [vmem:[#allocation7 + $0x170] sm:$0xff]  ;;  %v885_v54 = vld [vmem:[#allocation7 + $0x178] sm:$0xff] }
 0x2b2   : > { %v977_v38 = vld [vmem:[#allocation7 + $0x70] sm:$0xff]  ;;  %v978_v18 = vld [vmem:[#allocation7 + $0x78] sm:$0xff] }
 0x2b3   : > { %v1241_v41 = vadd.f32 %v1233_v1, %v1191_v2  ;;  %v1242_v35 = vadd.f32 %v1234_v48, %v1192_v57  ;;  %v892_v2 = vmul.f32 %v884_v13, %v3402_v47  ;;  %v893_v57 = vmul.f32 %v885_v54, %v3504_v16 }
 0x2b4   : > { %1745 = vrot.lane.b32.xlu2 %v3651_v31, %s2929_s26 }
 0x2b5   : > { %v3760_v7 = vpop.permute.xlu1 %1201  ;;  %v1308_v17 = vpop.permute.xlu0 %1307  ;;  %v1291_v62 = vadd.f32 %v1283_v24, %v1241_v41  ;;  %v1292_v29 = vadd.f32 %v1284_v23, %v1242_v35  ;;  %v1077_v24 = vld [vmem:[#allocation7 + $0xf0] sm:$0xff]  ;;  %v1078_v23 = vld [vmem:[#allocation7 + $0xf8] sm:$0xff] }
 0x2b6   : > { %v1314_v19 = vsel %vm1311_vm7, %v3598_v39, %v1308_v17  ;;  %v1318_v26 = vsel %vm1311_vm7, %v1308_v17, %v3598_v39  ;;  %v1060_v10 = vpop.permute.xlu2 %1059 }
 0x2b7   : > { %v1333_v32 = vmul.f32 %v1325_v6, %v1314_v19  ;;  %v1334_v14 = vmul.f32 %v1326_v5, %v1318_v26  ;;  %v1065_v17 = vsel %vm1061_vm1, %v3734_v21, %v1060_v10  ;;  %v1069_v47 = vsel %vm1061_vm1, %v1060_v10, %v3734_v21 }
 0x2b8   : > { %vm1559_vm1 = vcmp.lt.s32.totalorder %v3318_v34, 48 }
 0x2b9   : > { %v1341_v45 = vadd.f32 %v1333_v32, %v1291_v62  ;;  %v1342_v37 = vadd.f32 %v1334_v14, %v1292_v29  ;;  %v1127_v62 = vld [vmem:[#allocation7 + $0x130] sm:$0xff]  ;;  %v1128_v29 = vld [vmem:[#allocation7 + $0x138] sm:$0xff]  ;;  %v1086_v32 = vmul.f32 %v1078_v23, %v1065_v17 }
 0x2bb   : > { %v1391_v0 = vadd.f32 %v1383_v61, %v1341_v45  ;;  %v1392_v46 = vadd.f32 %v1384_v44, %v1342_v37  ;;  %v1177_v44 = vld [vmem:[#allocation7 + $0x1b0] sm:$0xff]  ;;  %v1178_v45 = vld [vmem:[#allocation7 + $0x1b8] sm:$0xff] }
 0x2bd   : > { %v3777_v49 = vadd.f32 %v3302_v20, %v1391_v0  ;;  %v3780_v27 = vadd.f32 %v3302_v20, %v1392_v46  ;;  %v3782_v4 = vpop.permute.xlu1 %1351  ;;  %v952_v39 = vpop.permute.xlu0 %951  ;;  %v916_v20 = vsel %vm912_vm10, %v3714_v25, %v909_v53  ;;  %v935_v25 = vmul.f32 %v927_v56, %v920_v43 }
 0x2be   : > { %v1160_v30 = vpop.permute.xlu2 %1159  ;;  %v936_v53 = vmul.f32 %v928_v51, %v916_v20  ;;  %vm1460_vm10 = vcmp.lt.s32.totalorder %v3318_v34, 80 }
 0x2bf   : > { %1547 = vrot.lane.b32.xlu2 %v3777_v49, %s2926_s24  ;;  %1448 = vrot.lane.b32.xlu0 %v3777_v49, %s2923_s18  ;;  %v943_v41 = vadd.f32 %v935_v25, %v892_v2  ;;  %v1165_v37 = vsel %vm1161_vm5, %v3676_v42, %v1160_v30  ;;  %v1169_v0 = vsel %vm1161_vm5, %v1160_v30, %v3676_v42 }
 0x2c0   : > { %1456 = vrot.lane.b32.xlu1 %v3780_v27, %s2923_s18  ;;  %v944_v35 = vadd.f32 %v936_v53, %v893_v57  ;;  %v1185_v56 = vmul.f32 %v1177_v44, %v1165_v37  ;;  %v1186_v51 = vmul.f32 %v1178_v45, %v1169_v0  ;;  %v1277_v57 = vld [vmem:[#allocation7 + $0x230] sm:$0xff]  ;;  %v1428_v44 = vld [vmem:[#allocation8 + $0x140] sm:$0xff] }
 0x2c5   : > { %v960_v58 = vpop.permute.xlu1 %959  ;;  %v1102_v11 = vpop.permute.xlu0 %1101 }
 0x2c6   : > { %v3796_v50 = vpop.permute.xlu2 %1209  ;;  %v965_v1 = vsel %vm961_vm11, %v952_v39, %v960_v58  ;;  %v969_v48 = vsel %vm961_vm11, %v960_v58, %v952_v39  ;;  %vm1509_vm11 = vcmp.lt.s32.totalorder %v3318_v34, 64 }
 0x2c7   : > { %1605 = vrot.lane.b32.xlu2 %v3780_v27, %s2925_s19  ;;  %1497 = vrot.lane.b32.xlu0 %v3777_v49, %s2924_s25  ;;  %v985_v3 = vmul.f32 %v977_v38, %v969_v48  ;;  %v986_v9 = vmul.f32 %v978_v18, %v965_v1  ;;  %v1227_v38 = vld [vmem:[#allocation7 + $0x1f0] sm:$0xff]  ;;  %v1228_v18 = vld [vmem:[#allocation7 + $0x1f8] sm:$0xff]  ;;  %v1215_v1 = vsel %vm1211_vm4, %v3760_v7, %v3796_v50 }
 0x2c8   : > { %1505 = vrot.lane.b32.xlu1 %v3780_v27, %s2924_s25  ;;  %v1219_v42 = vsel %vm1211_vm4, %v3796_v50, %v3760_v7  ;;  %v1235_v7 = vmul.f32 %v1227_v38, %v1215_v1  ;;  %vm1759_vm4 = vcmp.lt.s32.totalorder %v3318_v34, 96 }
 0x2c9   : > { %v993_v28 = vadd.f32 %v985_v3, %v943_v41  ;;  %v994_v33 = vadd.f32 %v986_v9, %v944_v35  ;;  %v1236_v50 = vmul.f32 %v1228_v18, %v1219_v42  ;;  %v1278_v3 = vld [vmem:[#allocation7 + $0x238] sm:$0xff]  ;;  %v1327_v35 = vld [vmem:[#allocation7 + $0x270] sm:$0xff] }
 0x2cd   : > { %v1110_v6 = vpop.permute.xlu1 %1109  ;;  %v1010_v5 = vpop.permute.xlu0 %1009 }
 0x2ce   : > { %v1015_v16 = vsel %vm1011_vm2, %v3661_v22, %v1010_v5  ;;  %v1019_v36 = vsel %vm1011_vm2, %v1010_v5, %v3661_v22  ;;  %v1360_v8 = vpop.permute.xlu2 %1359  ;;  %v1115_v21 = vsel %vm1111_vm3, %v1102_v11, %v1110_v6  ;;  %v1119_v10 = vsel %vm1111_vm3, %v1110_v6, %v1102_v11  ;;  %v1328_v6 = vld [vmem:[#allocation7 + $0x278] sm:$0xff] }
 0x2cf   : > { %v1035_v19 = vmul.f32 %v1027_v55, %v1019_v36  ;;  %v1036_v26 = vmul.f32 %v1028_v63, %v1015_v16  ;;  %1697 = vrot.lane.b32.xlu2 %v3777_v49, %s2928_s12  ;;  %1555 = vrot.lane.b32.xlu0 %v3780_v27, %s2926_s24  ;;  %v1085_v22 = vmul.f32 %v1077_v24, %v1069_v47  ;;  %v1377_v47 = vld [vmem:[#allocation7 + $0x2b0] sm:$0xff]  ;;  %v1378_v16 = vld [vmem:[#allocation7 + $0x2b8] sm:$0xff]  ;;  %vm1659_vm2 = vcmp.lt.s32.totalorder %v3318_v34, 16 }
 0x2d0   : > { %1597 = vrot.lane.b32.xlu1 %v3777_v49, %s2925_s19  ;;  %v1135_v46 = vmul.f32 %v1127_v62, %v1119_v10  ;;  %v1136_v39 = vmul.f32 %v1128_v29, %v1115_v21  ;;  %v1365_v36 = vsel %vm1361_vm8, %v3782_v4, %v1360_v8  ;;  %v1469_v10 = vld [vmem:[#allocation8] sm:$0xff]  ;;  %vm1709_vm3 = vcmp.lt.s32.totalorder %v3318_v34, 112 }
 0x2d1   : > { %v1043_v14 = vadd.f32 %v1035_v19, %v993_v28  ;;  %v1044_v61 = vadd.f32 %v1036_v26, %v994_v33  ;;  %v1369_v28 = vsel %vm1361_vm8, %v1360_v8, %v3782_v4  ;;  %v1385_v4 = vmul.f32 %v1377_v47, %v1365_v36 }
 0x2d2   : > { %v1386_v8 = vmul.f32 %v1378_v16, %v1369_v28 }
 0x2d3   : > { %v1093_v58 = vadd.f32 %v1085_v22, %v1043_v14  ;;  %v1094_v11 = vadd.f32 %v1086_v32, %v1044_v61  ;;  %v1470_v22 = vld [vmem:[#allocation8 + $0x8] sm:$0xff] }
 0x2d4   : > { %v1429_v32 = vld [vmem:[#allocation8 + $0x148] sm:$0xff] }
 0x2d5   : > { %v1143_v20 = vadd.f32 %v1135_v46, %v1093_v58  ;;  %v1144_v43 = vadd.f32 %v1136_v39, %v1094_v11  ;;  %v1260_v13 = vpop.permute.xlu0 %1259  ;;  %v1445_v54 = vpop.permute.xlu1 %1444  ;;  %v1437_v46 = vmul.f32 %v1429_v32, %v3473_v60  ;;  %v1519_v39 = vld [vmem:[#allocation8 + $0x40] sm:$0xff]  ;;  %v1520_v58 = vld [vmem:[#allocation8 + $0x48] sm:$0xff]  ;;  %v1436_v11 = vmul.f32 %v1428_v44, %v3470_v59  ;;  %v1430_v32 = vld [vmem:[#allocation8 + $0x150] sm:$0xff] }
 0x2d6   : > { %v1453_v30 = vpop.permute.xlu2 %1452  ;;  %v1265_v9 = vsel %vm1261_vm6, %v3696_v52, %v1260_v13  ;;  %v1269_v55 = vsel %vm1261_vm6, %v1260_v13, %v3696_v52  ;;  %v1471_v44 = vld [vmem:[#allocation8 + $0x10] sm:$0xff] }
 0x2d7   : > { %v1193_v48 = vadd.f32 %v1185_v56, %v1143_v20  ;;  %v1194_v25 = vadd.f32 %v1186_v51, %v1144_v43  ;;  %1755 = vrot.lane.b32.xlu2 %v3780_v27, %s2929_s26  ;;  %v3851_v53 = vsel %vm1460_vm10, %v1445_v54, %v1453_v30  ;;  %v3855_v2 = vsel %vm1460_vm10, %v1453_v30, %v1445_v54 }
 0x2d8   : > { %1647 = vrot.lane.b32.xlu0 %v3777_v49, %s2927_s11  ;;  %1655 = vrot.lane.b32.xlu1 %v3780_v27, %s2927_s11  ;;  %v1285_v5 = vmul.f32 %v1277_v57, %v1265_v9  ;;  %v1286_v24 = vmul.f32 %v1278_v3, %v1269_v55  ;;  %v1478_v45 = vmul.f32 %v1470_v22, %v3851_v53  ;;  %v1570_v57 = vld [vmem:[#allocation8 + $0x88] sm:$0xff]  ;;  %v1619_v55 = vld [vmem:[#allocation8 + $0xc0] sm:$0xff] }
 0x2d9   : > { %v1243_v63 = vadd.f32 %v1235_v7, %v1193_v48  ;;  %v1244_v41 = vadd.f32 %v1236_v50, %v1194_v25  ;;  %v1569_v50 = vld [vmem:[#allocation8 + $0x80] sm:$0xff] }
 0x2da   : > { %v1486_v1 = vadd.f32 %v1478_v45, %v1437_v46 }
 0x2db   : > { %v1293_v26 = vadd.f32 %v1285_v5, %v1243_v63  ;;  %v1294_v62 = vadd.f32 %v1286_v24, %v1244_v41  ;;  %v1620_v63 = vld [vmem:[#allocation8 + $0xc8] sm:$0xff] }
 0x2dd   : > { %v1310_v23 = vpop.permute.xlu0 %1309  ;;  %v1502_v17 = vpop.permute.xlu1 %1501 }
 0x2de   : > { %v1315_v52 = vsel %vm1311_vm7, %v3716_v15, %v1310_v23  ;;  %v1319_v33 = vsel %vm1311_vm7, %v1310_v23, %v3716_v15  ;;  %v1544_v19 = vpop.permute.xlu2 %1543  ;;  %v1477_v15 = vmul.f32 %v1469_v10, %v3855_v2 }
 0x2df   : > { %v1335_v29 = vmul.f32 %v1327_v35, %v1315_v52  ;;  %v1336_v21 = vmul.f32 %v1328_v6, %v1319_v33  ;;  %v1669_v52 = vld [vmem:[#allocation8 + $0x100] sm:$0xff]  ;;  %v1670_v33 = vld [vmem:[#allocation8 + $0x108] sm:$0xff] }
 0x2e0   : > { %1705 = vrot.lane.b32.xlu0 %v3780_v27, %s2928_s12  ;;  %1747 = vrot.lane.b32.xlu1 %v3777_v49, %s2929_s26  ;;  %v1485_v18 = vadd.f32 %v1477_v15, %v1436_v11 }
 0x2e1   : > { %v1343_v14 = vadd.f32 %v1335_v29, %v1293_v26  ;;  %v1344_v61 = vadd.f32 %v1336_v21, %v1294_v62 }
 0x2e3   : > { %v1393_v37 = vadd.f32 %v1385_v4, %v1343_v14  ;;  %v1394_v0 = vadd.f32 %v1386_v8, %v1344_v61  ;;  %v1719_v14 = vld [vmem:[#allocation8 + $0x180] sm:$0xff]  ;;  %v1720_v61 = vld [vmem:[#allocation8 + $0x188] sm:$0xff] }
 0x2e5   : > { %v3889_v56 = vadd.f32 %v3280_v12, %v1393_v37  ;;  %v3892_v51 = vadd.f32 %v3280_v12, %v1394_v0  ;;  %v1494_v20 = vpop.permute.xlu0 %1493  ;;  %v1594_v43 = vpop.permute.xlu1 %1593 }
 0x2e6   : > { %v1602_v13 = vpop.permute.xlu2 %1601  ;;  %v3897_v54 = vsel %vm1509_vm11, %v1494_v20, %v1502_v17  ;;  %v3901_v38 = vsel %vm1509_vm11, %v1502_v17, %v1494_v20 }
 0x2e7   : > { %v1527_v42 = vmul.f32 %v1519_v39, %v3901_v38  ;;  %v1528_v12 = vmul.f32 %v1520_v58, %v3897_v54  ;;  %1458 = vrot.lane.b32.xlu2 %v3892_v51, %s2923_s18  ;;  %v1610_v30 = vsel %vm1609_vm15, %v1594_v43, %v1602_v13  ;;  %v1614_v48 = vsel %vm1609_vm15, %v1602_v13, %v1594_v43 }
 0x2e8   : > { %1507 = vrot.lane.b32.xlu0 %v3892_v51, %s2924_s25  ;;  %1450 = vrot.lane.b32.xlu1 %v3889_v56, %s2923_s18  ;;  %v1627_v23 = vmul.f32 %v1619_v55, %v1614_v48  ;;  %v1628_v17 = vmul.f32 %v1620_v63, %v1610_v30  ;;  %v1438_v43 = vmul.f32 %v1430_v32, %v3651_v31  ;;  %v1431_v30 = vld [vmem:[#allocation8 + $0x158] sm:$0xff]  ;;  %v1521_v48 = vld [vmem:[#allocation8 + $0x50] sm:$0xff]  ;;  %s2338_s18 = scalar_lea.hbm %s4478_s10, %s2505_s6 }
 0x2e9   : > { %v1535_v25 = vadd.f32 %v1527_v42, %v1485_v18  ;;  %v1536_v7 = vadd.f32 %v1528_v12, %v1486_v1  ;;  %v1472_v18 = vld [vmem:[#allocation8 + $0x18] sm:$0xff] }
 0x2ed   : > { %v1552_v3 = vpop.permute.xlu0 %1551  ;;  %v1652_v9 = vpop.permute.xlu1 %1651 }
 0x2ee   : > { %v1455_v41 = vpop.permute.xlu2 %1454  ;;  %v3918_v35 = vsel %vm1559_vm1, %v1544_v19, %v1552_v3  ;;  %v3922_v6 = vsel %vm1559_vm1, %v1552_v3, %v1544_v19 }
 0x2ef   : > { %v1577_v5 = vmul.f32 %v1569_v50, %v3922_v6  ;;  %v1578_v24 = vmul.f32 %v1570_v57, %v3918_v35  ;;  %1499 = vrot.lane.b32.xlu2 %v3889_v56, %s2924_s25  ;;  %s2341_s25 = sshll.u32 %s2338_s18, 4  ;;  %s2342_s25 = int_to_ptr.hbm [resolvable:$true] %s2341_s25 }
 0x2f0   : > { %1557 = vrot.lane.b32.xlu0 %v3892_v51, %s2926_s24  ;;  %1599 = vrot.lane.b32.xlu1 %v3889_v56, %s2925_s19 }
 0x2f1   : > { %v1585_v47 = vadd.f32 %v1577_v5, %v1535_v25  ;;  %v1586_v16 = vadd.f32 %v1578_v24, %v1536_v7  ;;  %v1522_v25 = vld [vmem:[#allocation8 + $0x58] sm:$0xff]  ;;  %v1439_v7 = vmul.f32 %v1431_v30, %v3664_v40 }
 0x2f3   : > { %v1635_v36 = vadd.f32 %v1627_v23, %v1585_v47  ;;  %v1636_v28 = vadd.f32 %v1628_v17, %v1586_v16  ;;  %v1571_v17 = vld [vmem:[#allocation8 + $0x90] sm:$0xff]  ;;  %v1572_v47 = vld [vmem:[#allocation8 + $0x98] sm:$0xff] }
 0x2f5   : > { %v1644_v19 = vpop.permute.xlu0 %1643  ;;  %v1702_v26 = vpop.permute.xlu1 %1701 }
 0x2f6   : > { %v1546_v62 = vpop.permute.xlu2 %1545  ;;  %v1660_v29 = vsel %vm1659_vm2, %v1644_v19, %v1652_v9  ;;  %v1664_v21 = vsel %vm1659_vm2, %v1652_v9, %v1644_v19  ;;  %v1622_v19 = vld [vmem:[#allocation8 + $0xd8] sm:$0xff] }
 0x2f7   : > { %v1677_v10 = vmul.f32 %v1669_v52, %v1664_v21  ;;  %v1678_v22 = vmul.f32 %v1670_v33, %v1660_v29  ;;  %1549 = vrot.lane.b32.xlu2 %v3889_v56, %s2926_s24  ;;  %v1870_v52 = vld [vmem:[%s4475_s7 + $0x10] sm:$0xff]  ;;  %s2845_s24 = sshra.s32 %s2342_s25, 4  ;;  %s2846_s24 = int_to_ptr.hbm [resolvable:$true] %s2845_s24 }
 0x2f8   : > { %1649 = vrot.lane.b32.xlu0 %v3889_v56, %s2927_s11  ;;  %1657 = vrot.lane.b32.xlu1 %v3892_v51, %s2927_s11  ;;  %v1621_v33 = vld [vmem:[#allocation8 + $0xd0] sm:$0xff]  ;;  %p2852_p11 = scmp.lt.s32.totalorder %s2846_s24, %s4478_s10 }
 0x2f9   : > { %v1685_v4 = vadd.f32 %v1677_v10, %v1635_v36  ;;  %v1686_v8 = vadd.f32 %v1678_v22, %v1636_v28  ;;  %v1871_v28 = vld [vmem:[%s4475_s7 + $0x18] sm:$0xff] }
 0x2fd   : > { %v1694_v15 = vpop.permute.xlu0 %1693  ;;  %v1447_v45 = vpop.permute.xlu1 %1446 }
 0x2fe   : > { %v1710_v37 = vsel %vm1709_vm3, %v1694_v15, %v1702_v26  ;;  %v1714_v0 = vsel %vm1709_vm3, %v1702_v26, %v1694_v15  ;;  %v3950_v46 = vsel %vm1460_vm10, %v1447_v45, %v1455_v41  ;;  %v3954_v39 = vsel %vm1460_vm10, %v1455_v41, %v1447_v45  ;;  %v1604_v58 = vpop.permute.xlu2 %1603  ;;  %v1672_v15 = vld [vmem:[#allocation8 + $0x118] sm:$0xff] }
 0x2ff   : > { %v1727_v11 = vmul.f32 %v1719_v14, %v1710_v37  ;;  %v1728_v20 = vmul.f32 %v1720_v61, %v1714_v0  ;;  %v1479_v13 = vmul.f32 %v1471_v44, %v3954_v39  ;;  %1607 = vrot.lane.b32.xlu2 %v3892_v51, %s2925_s19  ;;  %v1480_v31 = vmul.f32 %v1472_v18, %v3950_v46  ;;  %v1671_v44 = vld [vmem:[#allocation8 + $0x110] sm:$0xff]  ;;  %v1868_v0 = vld [vmem:[%s4475_s7] sm:$0xff]  ;;  %s2327_s19 = scalar_lea.sflag [#allocation4], %s3107_s1 }
 0x300   : > { %1707 = vrot.lane.b32.xlu0 %v3892_v51, %s2928_s12  ;;  %1749 = vrot.lane.b32.xlu1 %v3889_v56, %s2929_s26 }
 0x301   : > { %v3964_v1 = vadd.f32 %v1727_v11, %v1685_v4  ;;  %v3966_v42 = vadd.f32 %v1728_v20, %v1686_v8  ;;  %v1487_v12 = vadd.f32 %v1479_v13, %v1438_v43  ;;  %v1488_v55 = vadd.f32 %v1480_v31, %v1439_v7  ;;  %v1721_v31 = vld [vmem:[#allocation8 + $0x190] sm:$0xff] }
 0x305   : > { %v1496_v50 = vpop.permute.xlu0 %1495  ;;  %v1504_v57 = vpop.permute.xlu1 %1503 }
 0x306   : > { %v3972_v3 = vsel %vm1509_vm11, %v1496_v50, %v1504_v57  ;;  %v3976_v9 = vsel %vm1509_vm11, %v1504_v57, %v1496_v50  ;;  %v1696_v5 = vpop.permute.xlu2 %1695  ;;  %v1906_v50 = vld [vmem:[%s4477_s9 + $0x10] sm:$0xff] }
 0x307   : > { %v1529_v63 = vmul.f32 %v1521_v48, %v3976_v9  ;;  %v1530_v41 = vmul.f32 %v1522_v25, %v3972_v3  ;;  %1699 = vrot.lane.b32.xlu2 %v3889_v56, %s2928_s12  ;;  %v1722_v48 = vld [vmem:[#allocation8 + $0x198] sm:$0xff]  ;;  %v1869_v25 = vld [vmem:[%s4475_s7 + $0x8] sm:$0xff]  ;;  %s2847_s12 = scalar_lea.hbm %s2846_s24, 64 }
 0x308   : > { %1753 = vrot.lane.b32.xlu0 %v3664_v40, %s2929_s26  ;;  %1743 = vrot.lane.b32.xlu1 %v3470_v59, %s2929_s26  ;;  %p2848_p1 = scmp.ne.s32.totalorder %s2846_s24, %s2847_s12  ;;  %p2853_p9 = scmp.lt.s32.totalorder %s2851_s23, %s2847_s12 }
 0x309   : > { %v1537_v24 = vadd.f32 %v1529_v63, %v1487_v12  ;;  %v1538_v23 = vadd.f32 %v1530_v41, %v1488_v55 }
 0x30a   : > { %p2849_p4 = pnand %p2848_p1, %p3077_p3  ;;  %p2854_p2 = por %p2853_p9, %p2852_p11 }
 0x30c   : > { %p2850_p8 = pneg %p2849_p4 }
 0x30d   : > { %v1554_v16 = vpop.permute.xlu0 %1553  ;;  %v1596_v36 = vpop.permute.xlu1 %1595 }
 0x30e   : > { %v3994_v40 = vsel %vm1559_vm1, %v1546_v62, %v1554_v16  ;;  %v3998_v59 = vsel %vm1559_vm1, %v1554_v16, %v1546_v62  ;;  %v1611_v26 = vsel %vm1609_vm15, %v1596_v36, %v1604_v58  ;;  %v1615_v29 = vsel %vm1609_vm15, %v1604_v58, %v1596_v36  ;;  %v4008_v32 = vpop.permute.xlu2 %1745  ;;  %v1904_v58 = vld [vmem:[%s4477_s9] sm:$0xff]  ;;  %p2855_p10 = pnand %p2854_p2, %p2850_p8 }
 0x30f   : > { %v1579_v21 = vmul.f32 %v1571_v17, %v3998_v59  ;;  %v1580_v10 = vmul.f32 %v1572_v47, %v3994_v40  ;;  %1757 = vrot.lane.b32.xlu2 %v3892_v51, %s2929_s26  ;;  %v1629_v4 = vmul.f32 %v1621_v33, %v1615_v29  ;;  %v1630_v8 = vmul.f32 %v1622_v19, %v1611_v26  ;;  %v1905_v17 = vld [vmem:[%s4477_s9 + $0x8] sm:$0xff]  ;;  %v1473_v19 = vld [vmem:[#allocation8 + $0x20] sm:$0xff] }
 0x310   : > { %1889 = vperm.xlu0 %2604, %v1871_v28   ;;  %1884 = vperm.xlu1 %2605, %v1870_v52   ;;  %v1474_v26 = vld [vmem:[#allocation8 + $0x28] sm:$0xff] }
 0x311   : > { %v1587_v22 = vadd.f32 %v1579_v21, %v1537_v24  ;;  %v1588_v62 = vadd.f32 %v1580_v10, %v1538_v23  ;;  %v1432_v10 = vld [vmem:[#allocation8 + $0x160] sm:$0xff] }
 0x313   : > { %v1637_v14 = vadd.f32 %v1629_v4, %v1587_v22  ;;  %v1638_v61 = vadd.f32 %v1630_v8, %v1588_v62  ;;  %v1433_v22 = vld [vmem:[#allocation8 + $0x168] sm:$0xff]  ;;  %v1523_v62 = vld [vmem:[#allocation8 + $0x60] sm:$0xff] }
 0x314   : > { %v1524_v4 = vld [vmem:[#allocation8 + $0x68] sm:$0xff] }
 0x315   : > { %v1646_v45 = vpop.permute.xlu0 %1645  ;;  %v1654_v37 = vpop.permute.xlu1 %1653 }
 0x316   : > { %v1661_v11 = vsel %vm1659_vm2, %v1646_v45, %v1654_v37  ;;  %v1665_v20 = vsel %vm1659_vm2, %v1654_v37, %v1646_v45  ;;  %v1441_v45 = vmul.f32 %v1433_v22, %v3780_v27 }
 0x317   : > { %v1679_v43 = vmul.f32 %v1671_v44, %v1665_v20  ;;  %v1680_v13 = vmul.f32 %v1672_v15, %v1661_v11  ;;  %1751 = vrot.lane.b32.xlu2 %v3473_v60, %s2929_s26  ;;  %v1907_v60 = vld [vmem:[%s4477_s9 + $0x18] sm:$0xff]  ;;  %v1440_v15 = vmul.f32 %v1432_v10, %v3777_v49  ;;  %v1573_v11 = vld [vmem:[#allocation8 + $0xa0] sm:$0xff]  ;;  %v1574_v20 = vld [vmem:[#allocation8 + $0xa8] sm:$0xff] }
 0x318   : > { %1874 = vperm.xlu0 %2604, %v1868_v0   ;;  %1910 = vperm.xlu1 %2605, %v1904_v58  }
 0x319   : > { %v1687_v18 = vadd.f32 %v1679_v43, %v1637_v14  ;;  %v1688_v12 = vadd.f32 %v1680_v13, %v1638_v61  ;;  %v1548_v30 = vpop.permute.xlu2 %1547 }
 0x31d   : > { %v1704_v7 = vpop.permute.xlu0 %1703 }
 0x31e   : > { %v1711_v57 = vsel %vm1709_vm3, %v1696_v5, %v1704_v7  ;;  %v1715_v55 = vsel %vm1709_vm3, %v1704_v7, %v1696_v5 }
 0x31f   : > { %v1729_v63 = vmul.f32 %v1721_v31, %v1711_v57  ;;  %v1730_v41 = vmul.f32 %v1722_v48, %v1715_v55  ;;  %1879 = vperm.xlu2 %2606, %v1869_v25  }
 0x320   : > { %1920 = vperm.xlu0 %2604, %v1906_v50   ;;  %1925 = vperm.xlu1 %2605, %v1907_v60  }
 0x321   : > { %v4035_v24 = vadd.f32 %v1729_v63, %v1687_v18  ;;  %v4037_v23 = vadd.f32 %v1730_v41, %v1688_v12  ;;  %v1606_v47 = vpop.permute.xlu2 %1605  ;;  %v1623_v41 = vld [vmem:[#allocation8 + $0xe0] sm:$0xff] }
 0x327   : > { %1915 = vperm.xlu2 %2606, %v1905_v17   ;;  %v1624_v17 = vld [vmem:[#allocation8 + $0xe8] sm:$0xff] }
 0x329   : > { %v1698_v16 = vpop.permute.xlu2 %1697 }
 0x331   : > { %v1449_v36 = vpop.permute.xlu0 %1448  ;;  %v4042_v52 = vpop.permute.xlu2 %1755 }
 0x332   : > { %v1457_v28 = vpop.permute.xlu1 %1456 }
 0x333   : > { %v4046_v29 = vsel %vm1460_vm10, %v1449_v36, %v1457_v28  ;;  %v4050_v21 = vsel %vm1460_vm10, %v1457_v28, %v1449_v36 }
 0x334   : > { %v1481_v61 = vmul.f32 %v1473_v19, %v4050_v21  ;;  %v1482_v44 = vmul.f32 %v1474_v26, %v4046_v29 }
 0x336   : > { %v1489_v43 = vadd.f32 %v1481_v61, %v1440_v15  ;;  %v1490_v13 = vadd.f32 %v1482_v44, %v1441_v45  ;;  %v1723_v61 = vld [vmem:[#allocation8 + $0x1a0] sm:$0xff]  ;;  %v1724_v44 = vld [vmem:[#allocation8 + $0x1a8] sm:$0xff] }
 0x339   : > { %v1498_v5 = vpop.permute.xlu0 %1497 }
 0x33a   : > { %v1506_v33 = vpop.permute.xlu1 %1505 }
 0x33b   : > { %v4054_v8 = vsel %vm1509_vm11, %v1498_v5, %v1506_v33  ;;  %v4058_v14 = vsel %vm1509_vm11, %v1506_v33, %v1498_v5  ;;  %v1673_v5 = vld [vmem:[#allocation8 + $0x120] sm:$0xff] }
 0x33c   : > { %v1531_v37 = vmul.f32 %v1523_v62, %v4058_v14  ;;  %v1532_v0 = vmul.f32 %v1524_v4, %v4054_v8 }
 0x33e   : > { %v1539_v48 = vadd.f32 %v1531_v37, %v1489_v43  ;;  %v1540_v27 = vadd.f32 %v1532_v0, %v1490_v13  ;;  %v1774_v43 = vld [vmem:[#allocation8 + $0x1e8] sm:$0xff] }
 0x341   : > { %v4066_v58 = vpop.permute.xlu2 %1458  ;;  %v1556_v18 = vpop.permute.xlu0 %1555 }
 0x342   : > { %v1598_v12 = vpop.permute.xlu1 %1597  ;;  %v1562_v31 = vsel %vm1559_vm1, %v1548_v30, %v1556_v18  ;;  %v1566_v49 = vsel %vm1559_vm1, %v1556_v18, %v1548_v30  ;;  %v1674_v30 = vld [vmem:[#allocation8 + $0x128] sm:$0xff] }
 0x343   : > { %v1581_v25 = vmul.f32 %v1573_v11, %v1566_v49  ;;  %v1582_v7 = vmul.f32 %v1574_v20, %v1562_v31  ;;  %v1612_v36 = vsel %vm1609_vm15, %v1598_v12, %v1606_v47  ;;  %v1616_v28 = vsel %vm1609_vm15, %v1606_v47, %v1598_v12  ;;  %v1773_v20 = vld [vmem:[#allocation8 + $0x1e0] sm:$0xff] }
 0x344   : > { %v1631_v26 = vmul.f32 %v1623_v41, %v1616_v28  ;;  %v1632_v10 = vmul.f32 %v1624_v17, %v1612_v36 }
 0x345   : > { %v1589_v50 = vadd.f32 %v1581_v25, %v1539_v48  ;;  %v1590_v60 = vadd.f32 %v1582_v7, %v1540_v27  ;;  %v1798_v7 = vld [vmem:[#allocation8 + $0x220] sm:$0xff] }
 0x346   : > { %v1806_v41 = vmul.f32 %v1798_v7, %v4046_v29  ;;  %v1526_v7 = vld [vmem:[#allocation8 + $0x78] sm:$0xff] }
 0x347   : > { %v1639_v15 = vadd.f32 %v1631_v26, %v1589_v50  ;;  %v1640_v47 = vadd.f32 %v1632_v10, %v1590_v60  ;;  %v1799_v50 = vld [vmem:[#allocation8 + $0x228] sm:$0xff]  ;;  %v1848_v10 = vld [vmem:[#allocation8 + $0x2a0] sm:$0xff] }
 0x348   : > { %v1807_v17 = vmul.f32 %v1799_v50, %v4050_v21 }
 0x349   : > { %v4072_v57 = vpop.permute.xlu2 %1499 }
 0x34a   : > { %v1648_v55 = vpop.permute.xlu0 %1647  ;;  %v1656_v63 = vpop.permute.xlu1 %1655 }
 0x34b   : > { %v1662_v33 = vsel %vm1659_vm2, %v1648_v55, %v1656_v63  ;;  %v1666_v19 = vsel %vm1659_vm2, %v1656_v63, %v1648_v55 }
 0x34c   : > { %v1681_v22 = vmul.f32 %v1673_v5, %v1666_v19  ;;  %v1682_v62 = vmul.f32 %v1674_v30, %v1662_v33  ;;  %v1823_v5 = vld [vmem:[#allocation8 + $0x260] sm:$0xff]  ;;  %v1824_v30 = vld [vmem:[#allocation8 + $0x268] sm:$0xff] }
 0x34e   : > { %v1689_v12 = vadd.f32 %v1681_v22, %v1639_v15  ;;  %v1690_v48 = vadd.f32 %v1682_v62, %v1640_v47  ;;  %v1849_v22 = vld [vmem:[#allocation8 + $0x2a8] sm:$0xff]  ;;  %v1856_v15 = vmul.f32 %v1848_v10, %v1562_v31  ;;  %v1675_v10 = vld [vmem:[#allocation8 + $0x130] sm:$0xff] }
 0x34f   : > { %v1857_v47 = vmul.f32 %v1849_v22, %v1566_v49  ;;  %v1434_v49 = vld [vmem:[#allocation8 + $0x170] sm:$0xff]  ;;  %v1676_v22 = vld [vmem:[#allocation8 + $0x138] sm:$0xff] }
 0x351   : > { %v4083_v4 = vpop.permute.xlu2 %1549 }
 0x352   : > { %v1706_v45 = vpop.permute.xlu0 %1705  ;;  %v1748_v37 = vpop.permute.xlu1 %1747 }
 0x353   : > { %v1712_v0 = vsel %vm1709_vm3, %v1698_v16, %v1706_v45  ;;  %v1716_v11 = vsel %vm1709_vm3, %v1706_v45, %v1698_v16  ;;  %v1762_v13 = vsel %vm1759_vm4, %v1748_v37, %v4042_v52  ;;  %v1766_v18 = vsel %vm1759_vm4, %v4042_v52, %v1748_v37 }
 0x354   : > { %v1731_v27 = vmul.f32 %v1723_v61, %v1712_v0  ;;  %v1732_v25 = vmul.f32 %v1724_v44, %v1716_v11  ;;  %v1781_v63 = vmul.f32 %v1773_v20, %v1762_v13  ;;  %v1782_v16 = vmul.f32 %v1774_v43, %v1766_v18  ;;  %v1475_v0 = vld [vmem:[#allocation8 + $0x30] sm:$0xff]  ;;  %v1476_v11 = vld [vmem:[#allocation8 + $0x38] sm:$0xff] }
 0x355   : > { %v1831_v61 = vmul.f32 %v1823_v5, %v4054_v8  ;;  %v1832_v44 = vmul.f32 %v1824_v30, %v4058_v14  ;;  %v1435_v43 = vld [vmem:[#allocation8 + $0x178] sm:$0xff] }
 0x356   : > { %v1739_v60 = vadd.f32 %v1731_v27, %v1689_v12  ;;  %v1740_v55 = vadd.f32 %v1732_v25, %v1690_v48  ;;  %v1525_v48 = vld [vmem:[#allocation8 + $0x70] sm:$0xff]  ;;  %v1442_v27 = vmul.f32 %v1434_v49, %v3889_v56  ;;  %v1443_v25 = vmul.f32 %v1435_v43, %v3892_v51  ;;  %v1726_v43 = vld [vmem:[#allocation8 + $0x1b8] sm:$0xff] }
 0x357   : > { %v1725_v49 = vld [vmem:[#allocation8 + $0x1b0] sm:$0xff] }
 0x358   : > { %v1789_v36 = vadd.f32 %v1781_v63, %v1739_v60  ;;  %v1790_v28 = vadd.f32 %v1782_v16, %v1740_v55  ;;  %v1575_v60 = vld [vmem:[#allocation8 + $0xb0] sm:$0xff]  ;;  %v1576_v55 = vld [vmem:[#allocation8 + $0xb8] sm:$0xff] }
 0x359   : > { %v1608_v62 = vpop.permute.xlu2 %1607 }
 0x35a   : > { %v1814_v33 = vadd.f32 %v1806_v41, %v1789_v36  ;;  %v1815_v52 = vadd.f32 %v1807_v17, %v1790_v28  ;;  %v1508_v19 = vpop.permute.xlu0 %1507  ;;  %v1451_v26 = vpop.permute.xlu1 %1450 }
 0x35b   : > { %v4106_v20 = vsel %vm1460_vm10, %v1451_v26, %v4066_v58  ;;  %v4111_v8 = vsel %vm1460_vm10, %v4066_v58, %v1451_v26  ;;  %v4120_v58 = vsel %vm1509_vm11, %v4072_v57, %v1508_v19  ;;  %v4125_v50 = vsel %vm1509_vm11, %v1508_v19, %v4072_v57  ;;  %v1626_v19 = vld [vmem:[#allocation8 + $0xf8] sm:$0xff] }
 0x35c   : > { %v1839_v29 = vadd.f32 %v1831_v61, %v1814_v33  ;;  %v1840_v45 = vadd.f32 %v1832_v44, %v1815_v52  ;;  %v1483_v13 = vmul.f32 %v1475_v0, %v4111_v8  ;;  %v1484_v18 = vmul.f32 %v1476_v11, %v4106_v20  ;;  %v1625_v52 = vld [vmem:[#allocation8 + $0xf0] sm:$0xff] }
 0x35d   : > { %v1533_v41 = vmul.f32 %v1525_v48, %v4125_v50  ;;  %v1534_v17 = vmul.f32 %v1526_v7, %v4120_v58  ;;  %v1776_v7 = vld [vmem:[#allocation8 + $0x1f8] sm:$0xff] }
 0x35e   : > { %v4099_v21 = vadd.f32 %v1856_v15, %v1839_v29  ;;  %v4101_v37 = vadd.f32 %v1857_v47, %v1840_v45  ;;  %v1491_v51 = vadd.f32 %v1483_v13, %v1442_v27  ;;  %v1492_v16 = vadd.f32 %v1484_v18, %v1443_v25  ;;  %v1775_v25 = vld [vmem:[#allocation8 + $0x1f0] sm:$0xff] }
 0x360   : > { %v1541_v30 = vadd.f32 %v1533_v41, %v1491_v51  ;;  %v1542_v33 = vadd.f32 %v1534_v17, %v1492_v16  ;;  %v1794_v51 = vld [vmem:[#allocation8 + $0x200] sm:$0xff]  ;;  %v1795_v16 = vld [vmem:[#allocation8 + $0x208] sm:$0xff] }
 0x361   : > { %v1700_v12 = vpop.permute.xlu2 %1699 }
 0x362   : > { %v1558_v14 = vpop.permute.xlu0 %1557  ;;  %v1600_v31 = vpop.permute.xlu1 %1599 }
 0x363   : > { %v4130_v63 = vsel %vm1559_vm1, %v4083_v4, %v1558_v14  ;;  %v4135_v56 = vsel %vm1559_vm1, %v1558_v14, %v4083_v4  ;;  %v1613_v4 = vsel %vm1609_vm15, %v1600_v31, %v1608_v62  ;;  %v1617_v26 = vsel %vm1609_vm15, %v1608_v62, %v1600_v31 }
 0x364   : > { %v1583_v57 = vmul.f32 %v1575_v60, %v4135_v56  ;;  %v1584_v36 = vmul.f32 %v1576_v55, %v4130_v63  ;;  %v1633_v45 = vmul.f32 %v1625_v52, %v1617_v26  ;;  %v1634_v0 = vmul.f32 %v1626_v19, %v1613_v4  ;;  %v1844_v52 = vld [vmem:[#allocation8 + $0x280] sm:$0xff] }
 0x366   : > { %v1591_v15 = vadd.f32 %v1583_v57, %v1541_v30  ;;  %v1592_v47 = vadd.f32 %v1584_v36, %v1542_v33  ;;  %v1801_v30 = vld [vmem:[#allocation8 + $0x238] sm:$0xff]  ;;  %v1820_v33 = vld [vmem:[#allocation8 + $0x248] sm:$0xff] }
 0x368   : > { %v1641_v13 = vadd.f32 %v1633_v45, %v1591_v15  ;;  %v1642_v18 = vadd.f32 %v1634_v0, %v1592_v47  ;;  %v1826_v15 = vld [vmem:[#allocation8 + $0x278] sm:$0xff] }
 0x369   : > { %v1758_v29 = vpop.permute.xlu2 %1757 }
 0x36a   : > { %v1650_v28 = vpop.permute.xlu0 %1649  ;;  %v1658_v5 = vpop.permute.xlu1 %1657 }
 0x36b   : > { %v1663_v61 = vsel %vm1659_vm2, %v1650_v28, %v1658_v5  ;;  %v1667_v44 = vsel %vm1659_vm2, %v1658_v5, %v1650_v28  ;;  %v1819_v28 = vld [vmem:[#allocation8 + $0x240] sm:$0xff]  ;;  %v1800_v5 = vld [vmem:[#allocation8 + $0x230] sm:$0xff] }
 0x36c   : > { %v1683_v11 = vmul.f32 %v1675_v10, %v1667_v44  ;;  %v1684_v14 = vmul.f32 %v1676_v22, %v1663_v61  ;;  %v1802_v22 = vmul.f32 %v1794_v51, %v3851_v53  ;;  %v1803_v61 = vmul.f32 %v1795_v16, %v3855_v2  ;;  %v1825_v44 = vld [vmem:[#allocation8 + $0x270] sm:$0xff]  ;;  %v1769_v2 = vld [vmem:[#allocation8 + $0x1c0] sm:$0xff]  ;;  %v1851_v51 = vld [vmem:[#allocation8 + $0x2b8] sm:$0xff] }
 0x36d   : > { %v1808_v47 = vmul.f32 %v1800_v5, %v4106_v20  ;;  %v1833_v20 = vmul.f32 %v1825_v44, %v4120_v58 }
 0x36e   : > { %v1691_v41 = vadd.f32 %v1683_v11, %v1641_v13  ;;  %v1692_v17 = vadd.f32 %v1684_v14, %v1642_v18  ;;  %v1771_v11 = vld [vmem:[#allocation8 + $0x1d0] sm:$0xff]  ;;  %v1827_v14 = vmul.f32 %v1819_v28, %v3897_v54  ;;  %v1772_v18 = vld [vmem:[#allocation8 + $0x1d8] sm:$0xff] }
 0x371   : > { %v1752_v53 = vpop.permute.xlu2 %1751 }
 0x372   : > { %v1708_v62 = vpop.permute.xlu0 %1707  ;;  %v1750_v31 = vpop.permute.xlu1 %1749 }
 0x373   : > { %v1713_v48 = vsel %vm1709_vm3, %v1700_v12, %v1708_v62  ;;  %v1717_v27 = vsel %vm1709_vm3, %v1708_v62, %v1700_v12  ;;  %v1763_v60 = vsel %vm1759_vm4, %v1750_v31, %v1758_v29  ;;  %v1767_v55 = vsel %vm1759_vm4, %v1758_v29, %v1750_v31  ;;  %v1845_v12 = vld [vmem:[#allocation8 + $0x288] sm:$0xff]  ;;  %v1796_v31 = vld [vmem:[#allocation8 + $0x210] sm:$0xff] }
 0x374   : > { %v1733_v57 = vmul.f32 %v1725_v49, %v1713_v48  ;;  %v1734_v36 = vmul.f32 %v1726_v43, %v1717_v27  ;;  %v1783_v26 = vmul.f32 %v1775_v25, %v1763_v60  ;;  %v1784_v10 = vmul.f32 %v1776_v7, %v1767_v55  ;;  %v1770_v62 = vld [vmem:[#allocation8 + $0x1c8] sm:$0xff]  ;;  %v1797_v48 = vld [vmem:[#allocation8 + $0x218] sm:$0xff]  ;;  %v1821_v60 = vld [vmem:[#allocation8 + $0x250] sm:$0xff] }
 0x375   : > { %v1809_v29 = vmul.f32 %v1801_v30, %v4111_v8  ;;  %v1828_v49 = vmul.f32 %v1820_v33, %v3901_v38  ;;  %v1852_v43 = vmul.f32 %v1844_v52, %v3918_v35  ;;  %v1853_v13 = vmul.f32 %v1845_v12, %v3922_v6  ;;  %v1850_v55 = vld [vmem:[#allocation8 + $0x2b0] sm:$0xff]  ;;  %v1847_v33 = vld [vmem:[#allocation8 + $0x298] sm:$0xff] }
 0x376   : > { %v1741_v19 = vadd.f32 %v1733_v57, %v1691_v41  ;;  %v1742_v4 = vadd.f32 %v1734_v36, %v1692_v17  ;;  %v1834_v8 = vmul.f32 %v1826_v15, %v4125_v50  ;;  %v1822_v50 = vld [vmem:[#allocation8 + $0x258] sm:$0xff]  ;;  %v1804_v36 = vmul.f32 %v1796_v31, %v3950_v46 }
 0x377   : > { %v1805_v28 = vmul.f32 %v1797_v48, %v3954_v39  ;;  %v1858_v46 = vmul.f32 %v1850_v55, %v4130_v63  ;;  %v1859_v39 = vmul.f32 %v1851_v51, %v4135_v56 }
 0x378   : > { %v1791_v45 = vadd.f32 %v1783_v26, %v1741_v19  ;;  %v1792_v0 = vadd.f32 %v1784_v10, %v1742_v4  ;;  %v1829_v4 = vmul.f32 %v1821_v60, %v3972_v3  ;;  %v1830_v26 = vmul.f32 %v1822_v50, %v3976_v9 }
 0x37a   : > { %v1816_v27 = vadd.f32 %v1808_v47, %v1791_v45  ;;  %v1817_v25 = vadd.f32 %v1809_v29, %v1792_v0  ;;  %v1754_v7 = vpop.permute.xlu0 %1753  ;;  %v1744_v54 = vpop.permute.xlu1 %1743 }
 0x37b   : > { %v1761_v38 = vsel %vm1759_vm4, %v4008_v32, %v1754_v7  ;;  %v1765_v35 = vsel %vm1759_vm4, %v1754_v7, %v4008_v32  ;;  %v1760_v6 = vsel %vm1759_vm4, %v1744_v54, %v1752_v53  ;;  %v1764_v58 = vsel %vm1759_vm4, %v1752_v53, %v1744_v54  ;;  %v1846_v32 = vld [vmem:[#allocation8 + $0x290] sm:$0xff] }
 0x37c   : > { %v1779_v16 = vmul.f32 %v1771_v11, %v1761_v38  ;;  %v1780_v41 = vmul.f32 %v1772_v18, %v1765_v35  ;;  %v1777_v17 = vmul.f32 %v1769_v2, %v1760_v6  ;;  %v1778_v57 = vmul.f32 %v1770_v62, %v1764_v58 }
 0x37d   : > { %v1841_v5 = vadd.f32 %v1833_v20, %v1816_v27  ;;  %v1842_v30 = vadd.f32 %v1834_v8, %v1817_v25 }
 0x37e   : > { %v1787_v52 = vadd.f32 %v1779_v16, %v4035_v24  ;;  %v1788_v34 = vadd.f32 %v1780_v41, %v4037_v23  ;;  %v1785_v12 = vadd.f32 %v1777_v17, %v3964_v1  ;;  %v1786_v19 = vadd.f32 %v1778_v57, %v3966_v42 }
 0x37f   : > { %v1854_v24 = vmul.f32 %v1846_v32, %v3994_v40  ;;  %v1855_v23 = vmul.f32 %v1847_v33, %v3998_v59  ;;  %v1866_v29 = vadd.f32 %v1858_v46, %v1841_v5  ;;  %v1867_v1 = vadd.f32 %v1859_v39, %v1842_v30 }
 0x380   : > { %v1812_v10 = vadd.f32 %v1804_v36, %v1787_v52  ;;  %v1813_v44 = vadd.f32 %v1805_v28, %v1788_v34  ;;  %v1810_v15 = vadd.f32 %v1802_v22, %v1785_v12  ;;  %v1811_v47 = vadd.f32 %v1803_v61, %v1786_v19  ;;  %v1880_v22 = vpop.permute.xlu2 %1879 }
 0x382   : > { %v1890_v45 = vpop.permute.xlu0 %1889  ;;  %v1885_v42 = vpop.permute.xlu1 %1884  ;;  %v1837_v0 = vadd.f32 %v1829_v4, %v1812_v10  ;;  %v1838_v3 = vadd.f32 %v1830_v26, %v1813_v44  ;;  %v1835_v11 = vadd.f32 %v1827_v14, %v1810_v15  ;;  %v1836_v9 = vadd.f32 %v1828_v49, %v1811_v47 }
 0x383   : > { %v1898_v53 = vadd.f32 %v1890_v45, %v1866_v29  ;;  %v1899_v63 = vadd.f32 %v1890_v45, %v1867_v1  ;;  %v1896_v40 = vadd.f32 %v1885_v42, %v4099_v21  ;;  %v1897_v59 = vadd.f32 %v1885_v42, %v4101_v37  ;;  %v1901_v21 = vld [vmem:[%s4476_s8 + $0x8] sm:$0xff]  ;;  %v1902_v37 = vld [vmem:[%s4476_s8 + $0x10] sm:$0xff] }
 0x384   : > { %v1862_v18 = vadd.f32 %v1854_v24, %v1837_v0  ;;  %v1863_v56 = vadd.f32 %v1855_v23, %v1838_v3  ;;  %v1860_v2 = vadd.f32 %v1852_v43, %v1835_v11  ;;  %v1861_v62 = vadd.f32 %v1853_v13, %v1836_v9  ;;  %v1900_v43 = vld [vmem:[%s4476_s8] sm:$0xff]  ;;  %v1903_v13 = vld [vmem:[%s4476_s8 + $0x18] sm:$0xff] }
 0x385   : > { %1952 = vmatpush.msrb.mxu2 %v1898_v53  ;;  %1981 = vmatpush.msrb.mxu3 %v1899_v63 }
 0x386   : > { %v1894_v61 = vadd.f32 %v1880_v22, %v1862_v18  ;;  %v1895_v31 = vadd.f32 %v1880_v22, %v1863_v56 }
 0x387   : > { %1953 = vmatpush.msrb.mxu2 %v1896_v40  ;;  %1982 = vmatpush.msrb.mxu3 %v1897_v59 }
 0x388   : > { %v1916_v38 = vpop.permute.xlu2 %1915 }
 0x389   : > { %1954 = vmatpush.msrb.mxu2 %v1894_v61  ;;  %1983 = vmatpush.msrb.mxu3 %v1895_v31 }
 0x38a   : > { %v1875_v14 = vpop.permute.xlu0 %1874  ;;  %v1911_v20 = vpop.permute.xlu1 %1910 }
 0x38b   : > { %v1892_v49 = vadd.f32 %v1875_v14, %v1860_v2  ;;  %v1893_v48 = vadd.f32 %v1875_v14, %v1861_v62 }
 0x38d   : > { %1955 = vmatpush.msrb.mxu2 %v1892_v49  ;;  %1984 = vmatpush.msrb.mxu3 %v1893_v48 }
 0x38e   : > { %2475 = vmatmul.msk.f32.vlgmr.msrb.gmra.mxu2 %vm646_vm0, %v1900_v43  ;;  %2479 = vmatmul.msk.f32.vlgmr.msrb.gmra.mxu3 %vm646_vm0, %v1900_v43 }
 0x392   : > { %v1921_v36 = vpop.permute.xlu0 %1920  ;;  %v1926_v42 = vpop.permute.xlu1 %1925 }
 0x396   : > { %2476 = vmatmul.msk.f32.gmra.mxu2 %vm646_vm0, %v1901_v21  ;;  %2480 = vmatmul.msk.f32.gmra.mxu3 %vm646_vm0, %v1901_v21 }
 0x39e   : > { %2477 = vmatmul.msk.f32.gmra.mxu2 %vm646_vm0, %v1902_v37  ;;  %2481 = vmatmul.msk.f32.gmra.mxu3 %vm646_vm0, %v1902_v37 }
 0x3a6   : > { %2478 = vmatmul.msk.f32.gmra.mxu2 %vm646_vm0, %v1903_v13  ;;  %2482 = vmatmul.msk.f32.gmra.mxu3 %vm646_vm0, %v1903_v13 }
 0x411   : > { %v1957_v8 = vpop.f32.mrf.mxu2  ;;  %v1986_v27 = vpop.f32.mrf.mxu3 }
 0x412   : > { %v4211_v25 = vadd.f32 %v1957_v8, %v1911_v20  ;;  %v4213_v7 = vadd.f32 %v1986_v27, %v1911_v20 }
 0x414   : > { %v2483_v54 = vmul.f32 -1.442695, %v4211_v25  ;;  %v2484_v60 = vmul.f32 -1.442695, %v4213_v7 }
 0x416   : > { %2639 = vpow2.f32 %v2483_v54 }
 0x417   : > { %2641 = vpow2.f32 %v2484_v60 }
 0x419   : > { %v1960_v35 = vpop.f32.mrf.mxu2  ;;  %v1989_v6 = vpop.f32.mrf.mxu3 }
 0x41a   : > { %v4217_v58 = vadd.f32 %v1960_v35, %v1916_v38  ;;  %v4219_v50 = vadd.f32 %v1989_v6, %v1916_v38 }
 0x41c   : > { %v2640_v55 = vpop.eup %2639  ;;  %v2485_v51 = vmul.f32 -1.442695, %v4217_v58  ;;  %v2486_v17 = vmul.f32 -1.442695, %v4219_v50 }
 0x41d   : > { %v2642_v16 = vpop.eup %2641  ;;  %v2022_v41 = vadd.f32 1.0, %v2640_v55 }
 0x41e   : > { %v2023_v57 = vadd.f32 1.0, %v2642_v16  ;;  %2643 = vpow2.f32 %v2485_v51 }
 0x41f   : > { %2645 = vrcp.f32 %v2022_v41  ;;  %v2039_v44 = vand.u32 2147483647, %v2022_v41  ;;  %v2041_v47 = vand.u32 2147483648, %v2022_v41  ;;  %vm2035_vm6 = vweird.f32 %v2022_v41 }
 0x420   : > { %2647 = vrcp.f32 %v2023_v57  ;;  %v2054_v23 = vand.u32 2147483647, %v2023_v57  ;;  %v2056_v45 = vand.u32 2147483648, %v2023_v57  ;;  %vm2050_vm7 = vweird.f32 %v2023_v57 }
 0x421   : > { %2649 = vpow2.f32 %v2486_v17  ;;  %v1963_v28 = vpop.f32.mrf.mxu2  ;;  %v1992_v5 = vpop.f32.mrf.mxu3  ;;  %vm2040_vm9 = vcmp.eq.f32.partialorder %v2039_v44, 8.507059e+37  ;;  %v2042_v63 = vor.u32 1.1754944e-38, %v2041_v47 }
 0x422   : > { %v4223_v30 = vadd.f32 %v1963_v28, %v1921_v36  ;;  %v4225_v32 = vadd.f32 %v1992_v5, %v1921_v36  ;;  %vm2055_vm13 = vcmp.eq.f32.partialorder %v2054_v23, 8.507059e+37  ;;  %v2057_v62 = vor.u32 1.1754944e-38, %v2056_v45 }
 0x424   : > { %v2644_v33 = vpop.eup %2643  ;;  %v2487_v52 = vmul.f32 -1.442695, %v4223_v30  ;;  %v2488_v19 = vmul.f32 -1.442695, %v4225_v32 }
 0x425   : > { %v2646_v34 = vpop.eup %2645  ;;  %v4228_v12 = vadd.f32 1.0, %v2644_v33 }
 0x426   : > { %v2648_v4 = vpop.eup %2647  ;;  %v2031_v26 = vmul.f32 %v2646_v34, %v2022_v41  ;;  %2651 = vpow2.f32 %v2487_v52  ;;  %vm2036_vm0 = vweird.f32 %v2646_v34 }
 0x427   : > { %v2650_v46 = vpop.eup %2649  ;;  %v2046_v39 = vmul.f32 %v2648_v4, %v2023_v57  ;;  %2653 = vrcp.f32 %v4228_v12  ;;  %vm2051_vm5 = vweird.f32 %v2648_v4  ;;  %vm2037_vm8 = vmor %vm2035_vm6, %vm2036_vm0  ;;  %v2071_v37 = vand.u32 2147483648, %v4228_v12 }
 0x428   : > { %v2032_v10 = vsub.f32 1.0, %v2031_v26  ;;  %v4232_v15 = vadd.f32 1.0, %v2650_v46  ;;  %2655 = vpow2.f32 %v2488_v19  ;;  %vm2052_vm12 = vmor %vm2050_vm7, %vm2051_vm5  ;;  %vm2065_vm14 = vweird.f32 %v4228_v12 }
 0x429   : > { %v2047_v24 = vsub.f32 1.0, %v2046_v39  ;;  %v1966_v29 = vpop.f32.mrf.mxu2  ;;  %v1995_v14 = vpop.f32.mrf.mxu3  ;;  %v2069_v20 = vand.u32 2147483647, %v4228_v12  ;;  %v2072_v55 = vor.u32 1.1754944e-38, %v2071_v37 }
 0x42a   : > { %v2033_v1 = vmul.f32 %v2646_v34, %v2032_v10  ;;  %2657 = vrcp.f32 %v4232_v15  ;;  %v4235_v9 = vadd.f32 %v1966_v29, %v1926_v42  ;;  %v4248_v60 = vadd.f32 %v1995_v14, %v1926_v42 }
 0x42b   : > { %v2048_v0 = vmul.f32 %v2648_v4, %v2047_v24  ;;  %v2084_v41 = vand.u32 2147483647, %v4232_v15  ;;  %vm2070_vm1 = vcmp.eq.f32.partialorder %v2069_v20, 8.507059e+37  ;;  %vm2080_vm2 = vweird.f32 %v4232_v15 }
 0x42c   : > { %v2652_v3 = vpop.eup %2651  ;;  %v2034_v11 = vadd.f32 %v2646_v34, %v2033_v1  ;;  %v2489_v31 = vmul.f32 -1.442695, %v4235_v9  ;;  %v2490_v5 = vmul.f32 -1.442695, %v4248_v60 }
 0x42d   : > { %v2654_v53 = vpop.eup %2653  ;;  %v2049_v18 = vadd.f32 %v2648_v4, %v2048_v0  ;;  %v4237_v56 = vadd.f32 1.0, %v2652_v3  ;;  %vm2085_vm4 = vcmp.eq.f32.partialorder %v2084_v41, 8.507059e+37 }
 0x42e   : > { %v2038_v2 = vsel %vm2037_vm8, %v2646_v34, %v2034_v11  ;;  %v2061_v22 = vmul.f32 %v2654_v53, %v4228_v12  ;;  %v2656_v40 = vpop.eup %2655  ;;  %vm2066_vm10 = vweird.f32 %v2654_v53 }
 0x42f   : > { %v2043_v59 = vsel %vm2040_vm9, %v2042_v63, %v2038_v2  ;;  %v2053_v61 = vsel %vm2052_vm12, %v2648_v4, %v2049_v18  ;;  %2659 = vrcp.f32 %v4237_v56  ;;  %vm2067_vm11 = vmor %vm2065_vm14, %vm2066_vm10  ;;  %v2099_v4 = vand.u32 2147483647, %v4237_v56 }
 0x430   : > { %v2658_v49 = vpop.eup %2657  ;;  %v2150_v48 = vmul.f32 %v2043_v59, %v4211_v25  ;;  %v2058_v43 = vsel %vm2055_vm13, %v2057_v62, %v2053_v61  ;;  %v2062_v21 = vsub.f32 1.0, %v2061_v22  ;;  %v4250_v25 = vadd.f32 1.0, %v2656_v40 }
 0x431   : > { %v2151_v13 = vmul.f32 %v2058_v43, %v4213_v7  ;;  %v2076_v8 = vmul.f32 %v2658_v49, %v4232_v15  ;;  %2661 = vpow2.f32 %v2489_v31  ;;  %v2086_v7 = vand.u32 2147483648, %v4232_v15 }
 0x432   : > { %v2491_v27 = vmul.f32 -1.442695, %v2150_v48  ;;  %v2063_v54 = vmul.f32 %v2654_v53, %v2062_v21  ;;  %vm2081_vm15 = vweird.f32 %v2658_v49  ;;  %v2101_v44 = vand.u32 2147483648, %v4237_v56 }
 0x433   : > { %v2492_v38 = vmul.f32 -1.442695, %v2151_v13  ;;  %v2077_v35 = vsub.f32 1.0, %v2076_v8  ;;  %vm2082_vm3 = vmor %vm2080_vm2, %vm2081_vm15  ;;  %v2087_v52 = vor.u32 1.1754944e-38, %v2086_v7  ;;  %vm2095_vm5 = vweird.f32 %v4237_v56 }
 0x434   : > { %2663 = vpow2.f32 %v2491_v27  ;;  %v2064_v6 = vadd.f32 %v2654_v53, %v2063_v54  ;;  %v2116_v1 = vand.u32 2147483648, %v4250_v25  ;;  %v2102_v45 = vor.u32 1.1754944e-38, %v2101_v44  ;;  %v2705_v54 = vld [vmem:[%s3113_s4 + $0x10] sm:$0xff] }
 0x435   : > { %v2660_v51 = vpop.eup %2659  ;;  %2665 = vpow2.f32 %v2492_v38  ;;  %v2078_v16 = vmul.f32 %v2658_v49, %v2077_v35  ;;  %vm2100_vm7 = vcmp.eq.f32.partialorder %v2099_v4, 8.507059e+37  ;;  %vm2110_vm8 = vweird.f32 %v4250_v25 }
 0x436   : > { %v2068_v17 = vsel %vm2067_vm11, %v2654_v53, %v2064_v6  ;;  %v2091_v57 = vmul.f32 %v2660_v51, %v4237_v56  ;;  %2667 = vrcp.f32 %v4250_v25  ;;  %vm2096_vm0 = vweird.f32 %v2660_v51 }
 0x437   : > { %v2073_v36 = vsel %vm2070_vm1, %v2072_v55, %v2068_v17  ;;  %v2079_v28 = vadd.f32 %v2658_v49, %v2078_v16  ;;  %v2662_v12 = vpop.eup %2661  ;;  %2669 = vpow2.f32 %v2490_v5  ;;  %vm2097_vm6 = vmor %vm2095_vm5, %vm2096_vm0  ;;  %v2117_v62 = vor.u32 1.1754944e-38, %v2116_v1  ;;  %v2703_v1 = vld [vmem:[%s3113_s4] sm:$0xff] }
 0x438   : > { %v2152_v33 = vmul.f32 %v2073_v36, %v4217_v58  ;;  %v2092_v34 = vsub.f32 1.0, %v2091_v57  ;;  %v4275_v42 = vadd.f32 1.0, %v2662_v12 }
 0x439   : > { %v2083_v19 = vsel %vm2082_vm3, %v2658_v49, %v2079_v28 }
 0x43a   : > { %v2664_v26 = vpop.eup %2663  ;;  %v2493_v46 = vmul.f32 -1.442695, %v2152_v33  ;;  %v2088_v39 = vsel %vm2085_vm4, %v2087_v52, %v2083_v19  ;;  %v2093_v10 = vmul.f32 %v2660_v51, %v2092_v34  ;;  %v2131_v38 = vand.u32 2147483648, %v4275_v42 }
 0x43b   : > { %v2666_v15 = vpop.eup %2665  ;;  %v4263_v47 = vadd.f32 1.0, %v2664_v26  ;;  %v2153_v24 = vmul.f32 %v2088_v39, %v4219_v50  ;;  %v2114_v50 = vand.u32 2147483647, %v4250_v25  ;;  %v2129_v7 = vand.u32 2147483647, %v4275_v42 }
 0x43c   : > { %v4266_v58 = vadd.f32 1.0, %v2666_v15  ;;  %2671 = vpow2.f32 %v2493_v46  ;;  %v2094_v23 = vadd.f32 %v2660_v51, %v2093_v10  ;;  %v4268_v29 = vpop.eup %2667  ;;  %vm2125_vm3 = vweird.f32 %v4275_v42 }
 0x43d   : > { %2673 = vrcp.f32 %v4263_v47  ;;  %v2494_v0 = vmul.f32 -1.442695, %v2153_v24  ;;  %v2199_v11 = vand.u32 2147483647, %v4263_v47  ;;  %v2106_v63 = vmul.f32 %v4268_v29, %v4250_v25  ;;  %v2670_v18 = vpop.eup %2669 }
 0x43e   : > { %2675 = vrcp.f32 %v4266_v58  ;;  %v2098_v3 = vsel %vm2097_vm6, %v2660_v51, %v2094_v23  ;;  %v2201_v56 = vand.u32 2147483648, %v4263_v47  ;;  %vm2195_vm9 = vweird.f32 %v4263_v47 }
 0x43f   : > { %v2103_v53 = vsel %vm2100_vm7, %v2102_v45, %v2098_v3  ;;  %2677 = vpow2.f32 %v2494_v0  ;;  %v2214_v40 = vand.u32 2147483647, %v4266_v58  ;;  %v2107_v59 = vsub.f32 1.0, %v2106_v63 }
 0x440   : > { %v2154_v2 = vmul.f32 %v2103_v53, %v4223_v30  ;;  %vm4285_vm12 = vcmp.eq.f32.partialorder %v2114_v50, 8.507059e+37  ;;  %2679 = vrcp.f32 %v4275_v42  ;;  %vm2210_vm13 = vweird.f32 %v4266_v58 }
 0x441   : > { %v2216_v14 = vand.u32 2147483648, %v4266_v58  ;;  %vm4295_vm14 = vcmp.eq.f32.partialorder %v2199_v11, 8.507059e+37  ;;  %v2108_v37 = vmul.f32 %v4268_v29, %v2107_v59  ;;  %v4300_v13 = vadd.f32 1.0, %v2670_v18  ;;  %v2704_v11 = vld [vmem:[%s3113_s4 + $0x8] sm:$0xff] }
 0x442   : > { %v2672_v22 = vpop.eup %2671  ;;  %v2495_v30 = vmul.f32 -1.442695, %v2154_v2  ;;  %v2202_v20 = vor.u32 1.1754944e-38, %v2201_v56  ;;  %vm2111_vm10 = vweird.f32 %v4268_v29  ;;  %vm4305_vm11 = vcmp.eq.f32.partialorder %v2214_v40, 8.507059e+37 }
 0x443   : > { %v2674_v31 = vpop.eup %2673  ;;  %v4292_v49 = vadd.f32 1.0, %v2672_v22  ;;  %v2109_v55 = vadd.f32 %v4268_v29, %v2108_v37  ;;  %vm4319_vm1 = vmor %vm2110_vm8, %vm2111_vm10  ;;  %v2217_v52 = vor.u32 1.1754944e-38, %v2216_v14  ;;  %v2132_v25 = vor.u32 1.1754944e-38, %v2131_v38 }
 0x444   : > { %v2676_v48 = vpop.eup %2675  ;;  %v2191_v43 = vmul.f32 %v2674_v31, %v4263_v47  ;;  %vm2196_vm15 = vweird.f32 %v2674_v31  ;;  %vm4346_vm7 = vcmp.eq.f32.partialorder %v2129_v7, 8.507059e+37  ;;  %v2144_v21 = vand.u32 2147483647, %v4300_v13 }
 0x445   : > { %v2206_v8 = vmul.f32 %v2676_v48, %v4266_v58  ;;  %2681 = vrcp.f32 %v4292_v49  ;;  %v2678_v35 = vpop.eup %2677  ;;  %v2229_v41 = vand.u32 2147483647, %v4292_v49  ;;  %vm2211_vm2 = vweird.f32 %v2676_v48  ;;  %vm2197_vm4 = vmor %vm2195_vm9, %vm2196_vm15 }
 0x446   : > { %v2192_v27 = vsub.f32 1.0, %v2191_v43  ;;  %2683 = vpow2.f32 %v2495_v30  ;;  %v4312_v51 = vpop.eup %2679  ;;  %v4315_v17 = vadd.f32 1.0, %v2678_v35  ;;  %v2113_v28 = vsel %vm4319_vm1, %v4268_v29, %v2109_v55  ;;  %vm2212_vm5 = vmor %vm2210_vm13, %vm2211_vm2 }
 0x447   : > { %v2207_v6 = vsub.f32 1.0, %v2206_v8  ;;  %2685 = vrcp.f32 %v4300_v13  ;;  %v2121_v5 = vmul.f32 %v4312_v51, %v4275_v42  ;;  %vm2225_vm0 = vweird.f32 %v4292_v49 }
 0x448   : > { %v2193_v16 = vmul.f32 %v2674_v31, %v2192_v27  ;;  %2687 = vrcp.f32 %v4315_v17  ;;  %v2231_v19 = vand.u32 2147483648, %v4292_v49  ;;  %v2118_v4 = vsel %vm4285_vm12, %v2117_v62, %v2113_v28 }
 0x449   : > { %v2208_v36 = vmul.f32 %v2676_v48, %v2207_v6  ;;  %vm4342_vm6 = vcmp.eq.f32.partialorder %v2229_v41, 8.507059e+37  ;;  %v2122_v44 = vsub.f32 1.0, %v2121_v5  ;;  %v2244_v58 = vand.u32 2147483647, %v4315_v17 }
 0x44a   : > { %v2194_v33 = vadd.f32 %v2674_v31, %v2193_v16  ;;  %v2155_v3 = vmul.f32 %v2118_v4, %v4225_v32  ;;  %v2232_v63 = vor.u32 1.1754944e-38, %v2231_v19  ;;  %vm2126_vm8 = vweird.f32 %v4312_v51  ;;  %v2706_v19 = vld [vmem:[%s3113_s4 + $0x18] sm:$0xff] }
 0x44b   : > { %v2682_v34 = vpop.eup %2681  ;;  %v2209_v12 = vadd.f32 %v2676_v48, %v2208_v36  ;;  %vm2140_vm9 = vweird.f32 %v4300_v13  ;;  %v2123_v32 = vmul.f32 %v4312_v51, %v2122_v44  ;;  %vm2240_vm13 = vweird.f32 %v4315_v17  ;;  %vm2127_vm10 = vmor %vm2125_vm3, %vm2126_vm8 }
 0x44c   : > { %v2684_v26 = vpop.eup %2683  ;;  %v2198_v46 = vsel %vm2197_vm4, %v2674_v31, %v2194_v33  ;;  %v2221_v39 = vmul.f32 %v2682_v34, %v4292_v49  ;;  %vm2226_vm12 = vweird.f32 %v2682_v34  ;;  %v2496_v2 = vmul.f32 -1.442695, %v2155_v3 }
 0x44d   : > { %v2203_v47 = vsel %vm4295_vm14, %v2202_v20, %v2198_v46  ;;  %v2213_v24 = vsel %vm2212_vm5, %v2676_v48, %v2209_v12  ;;  %v4353_v23 = vadd.f32 1.0, %v2684_v26  ;;  %v4355_v29 = vpop.eup %2685  ;;  %v2246_v22 = vand.u32 2147483648, %v4315_v17 }
 0x44e   : > { %v2310_v45 = vmul.f32 %v2703_v1, %v2203_v47  ;;  %v2218_v50 = vsel %vm4305_vm11, %v2217_v52, %v2213_v24  ;;  %v2222_v0 = vsub.f32 1.0, %v2221_v39  ;;  %v2688_v18 = vpop.eup %2687  ;;  %v2136_v40 = vmul.f32 %v4355_v29, %v4300_v13  ;;  %vm2227_vm11 = vmor %vm2225_vm0, %vm2226_vm12  ;;  %v2707_v47 = vld [vmem:[%s3113_s4 + $0x20] sm:$0xff] }
 0x44f   : > { %v2311_v53 = vmul.f32 %v2704_v11, %v2218_v50  ;;  %2689 = vrcp.f32 %v4353_v23  ;;  %v2236_v62 = vmul.f32 %v2688_v18, %v4315_v17  ;;  %vm4377_vm14 = vcmp.eq.f32.partialorder %v2244_v58, 8.507059e+37 }
 0x450   : > { %2318 = vst [vmem:[%s4367_s28] sm:$0xff] %v2310_v45  ;;  %v2223_v56 = vmul.f32 %v2682_v34, %v2222_v0  ;;  %2691 = vpow2.f32 %v2496_v2  ;;  %v2124_v31 = vadd.f32 %v4312_v51, %v2123_v32  ;;  %vm2241_vm15 = vweird.f32 %v2688_v18  ;;  %v2708_v32 = vld [vmem:[%s3113_s4 + $0x28] sm:$0xff] }
 0x451   : > { %2319 = vst [vmem:[%s4367_s28 + $0x8] sm:$0xff] %v2311_v53  ;;  %v2237_v14 = vsub.f32 1.0, %v2236_v62  ;;  %v2137_v30 = vsub.f32 1.0, %v2136_v40  ;;  %vm2141_vm1 = vweird.f32 %v4355_v29  ;;  %v2146_v37 = vand.u32 2147483648, %v4300_v13  ;;  %vm4403_vm2 = vmor %vm2240_vm13, %vm2241_vm15 }
 0x452   : > { %v2224_v59 = vadd.f32 %v2682_v34, %v2223_v56  ;;  %v2128_v43 = vsel %vm2127_vm10, %v4312_v51, %v2124_v31  ;;  %v2247_v35 = vor.u32 1.1754944e-38, %v2246_v22  ;;  %v2259_v16 = vand.u32 2147483647, %v4353_v23  ;;  %vm2142_vm4 = vmor %vm2140_vm9, %vm2141_vm1 }
 0x453   : > { %v2238_v8 = vmul.f32 %v2688_v18, %v2237_v14  ;;  %v2133_v49 = vsel %vm4346_vm7, %v2132_v25, %v2128_v43  ;;  %v2138_v27 = vmul.f32 %v4355_v29, %v2137_v30  ;;  %v2261_v41 = vand.u32 2147483648, %v4353_v23 }
 0x454   : > { %v2228_v48 = vsel %vm2227_vm11, %v2682_v34, %v2224_v59  ;;  %v2156_v55 = vmul.f32 %v2133_v49, %v4235_v9  ;;  %v2147_v17 = vor.u32 1.1754944e-38, %v2146_v37  ;;  %vm2145_vm0 = vcmp.eq.f32.partialorder %v2144_v21, 8.507059e+37 }
 0x455   : > { %v2690_v20 = vpop.eup %2689  ;;  %v2233_v42 = vsel %vm4342_vm6, %v2232_v63, %v2228_v48  ;;  %v2239_v7 = vadd.f32 %v2688_v18, %v2238_v8  ;;  %v2139_v57 = vadd.f32 %v4355_v29, %v2138_v27  ;;  %vm2255_vm5 = vweird.f32 %v4353_v23 }
 0x456   : > { %v2312_v38 = vmul.f32 %v2705_v54, %v2233_v42  ;;  %v2251_v6 = vmul.f32 %v2690_v20, %v4353_v23  ;;  %v2692_v36 = vpop.eup %2691  ;;  %vm2256_vm3 = vweird.f32 %v2690_v20  ;;  %v2497_v9 = vmul.f32 -1.442695, %v2156_v55  ;;  %v2709_v42 = vld [vmem:[%s3113_s4 + $0x30] sm:$0xff]  ;;  %v2710_v55 = vld [vmem:[%s3113_s4 + $0x38] sm:$0xff] }
 0x457   : > { %v2243_v5 = vsel %vm4403_vm2, %v2688_v18, %v2239_v7  ;;  %v2187_v33 = vadd.f32 1.0, %v2692_v36  ;;  %v2143_v52 = vsel %vm2142_vm4, %v4355_v29, %v2139_v57  ;;  %vm2257_vm6 = vmor %vm2255_vm5, %vm2256_vm3  ;;  %v2262_v46 = vor.u32 1.1754944e-38, %v2261_v41 }
 0x458   : > { %2320 = vst [vmem:[%s4367_s28 + $0x10] sm:$0xff] %v2312_v38  ;;  %v2252_v28 = vsub.f32 1.0, %v2251_v6  ;;  %v2248_v25 = vsel %vm4377_vm14, %v2247_v35, %v2243_v5  ;;  %2693 = vpow2.f32 %v2497_v9  ;;  %v2148_v12 = vsel %vm2145_vm0, %v2147_v17, %v2143_v52 }
 0x459   : > { %v2313_v4 = vmul.f32 %v2706_v19, %v2248_v25  ;;  %2695 = vrcp.f32 %v2187_v33  ;;  %v2157_v26 = vmul.f32 %v2148_v12, %v4248_v60  ;;  %vm2260_vm7 = vcmp.eq.f32.partialorder %v2259_v16, 8.507059e+37 }
 0x45a   : > { %v2253_v34 = vmul.f32 %v2690_v20, %v2252_v28  ;;  %v2276_v45 = vand.u32 2147483648, %v2187_v33  ;;  %v2274_v0 = vand.u32 2147483647, %v2187_v33  ;;  %vm2270_vm9 = vweird.f32 %v2187_v33 }
 0x45b   : > { %2321 = vst [vmem:[%s4367_s28 + $0x18] sm:$0xff] %v2313_v4  ;;  %v2498_v10 = vmul.f32 -1.442695, %v2157_v26 }
 0x45c   : > { %v2254_v13 = vadd.f32 %v2690_v20, %v2253_v34  ;;  %v2277_v63 = vor.u32 1.1754944e-38, %v2276_v45  ;;  %vm2275_vm13 = vcmp.eq.f32.partialorder %v2274_v0, 8.507059e+37 }
 0x45d   : > { %2697 = vpow2.f32 %v2498_v10 }
 0x45e   : > { %v2258_v39 = vsel %vm2257_vm6, %v2690_v20, %v2254_v13  ;;  %v2694_v15 = vpop.eup %2693 }
 0x45f   : > { %v2263_v44 = vsel %vm2260_vm7, %v2262_v46, %v2258_v39  ;;  %v2696_v58 = vpop.eup %2695  ;;  %v2188_v29 = vadd.f32 1.0, %v2694_v15 }
 0x460   : > { %v2314_v24 = vmul.f32 %v2707_v47, %v2263_v44  ;;  %v2266_v1 = vmul.f32 %v2696_v58, %v2187_v33  ;;  %vm2271_vm8 = vweird.f32 %v2696_v58 }
 0x461   : > { %2699 = vrcp.f32 %v2188_v29  ;;  %vm2272_vm12 = vmor %vm2270_vm9, %vm2271_vm8  ;;  %v2291_v40 = vand.u32 2147483648, %v2188_v29  ;;  %v2289_v61 = vand.u32 2147483647, %v2188_v29  ;;  %vm2285_vm10 = vweird.f32 %v2188_v29 }
 0x462   : > { %2322 = vst [vmem:[%s4367_s28 + $0x20] sm:$0xff] %v2314_v24  ;;  %v2267_v23 = vsub.f32 1.0, %v2266_v1 }
 0x463   : > { %v2698_v60 = vpop.eup %2697  ;;  %v2292_v48 = vor.u32 1.1754944e-38, %v2291_v40  ;;  %vm2290_vm15 = vcmp.eq.f32.partialorder %v2289_v61, 8.507059e+37 }
 0x464   : > { %v2268_v50 = vmul.f32 %v2696_v58, %v2267_v23  ;;  %v2189_v3 = vadd.f32 1.0, %v2698_v60 }
 0x466   : > { %v2269_v11 = vadd.f32 %v2696_v58, %v2268_v50  ;;  %2701 = vrcp.f32 %v2189_v3  ;;  %v2306_v20 = vand.u32 2147483648, %v2189_v3  ;;  %v2304_v27 = vand.u32 2147483647, %v2189_v3 }
 0x467   : > { %v2700_v53 = vpop.eup %2699  ;;  %vm2300_vm2 = vweird.f32 %v2189_v3 }
 0x468   : > { %v2273_v18 = vsel %vm2272_vm12, %v2696_v58, %v2269_v11  ;;  %v2281_v56 = vmul.f32 %v2700_v53, %v2188_v29  ;;  %vm2286_vm14 = vweird.f32 %v2700_v53  ;;  %v2307_v38 = vor.u32 1.1754944e-38, %v2306_v20 }
 0x469   : > { %v2278_v2 = vsel %vm2275_vm13, %v2277_v63, %v2273_v18  ;;  %vm2287_vm11 = vmor %vm2285_vm10, %vm2286_vm14  ;;  %vm2305_vm4 = vcmp.eq.f32.partialorder %v2304_v27, 8.507059e+37 }
 0x46a   : > { %v2315_v62 = vmul.f32 %v2708_v32, %v2278_v2  ;;  %v2282_v22 = vsub.f32 1.0, %v2281_v56 }
 0x46c   : > { %2323 = vst [vmem:[%s4367_s28 + $0x28] sm:$0xff] %v2315_v62  ;;  %v2283_v59 = vmul.f32 %v2700_v53, %v2282_v22  ;;  %v2702_v31 = vpop.eup %2701 }
 0x46d   : > { %v2296_v30 = vmul.f32 %v2702_v31, %v2189_v3  ;;  %vm2301_vm1 = vweird.f32 %v2702_v31 }
 0x46e   : > { %v2284_v14 = vadd.f32 %v2700_v53, %v2283_v59  ;;  %vm2302_vm3 = vmor %vm2300_vm2, %vm2301_vm1 }
 0x46f   : > { %v2297_v21 = vsub.f32 1.0, %v2296_v30 }
 0x470   : > { %v2288_v43 = vsel %vm2287_vm11, %v2700_v53, %v2284_v14 }
 0x471   : > { %v2293_v37 = vsel %vm2290_vm15, %v2292_v48, %v2288_v43  ;;  %v2298_v49 = vmul.f32 %v2702_v31, %v2297_v21 }
 0x472   : > { %v2316_v8 = vmul.f32 %v2709_v42, %v2293_v37 }
 0x473   : > { %v2299_v54 = vadd.f32 %v2702_v31, %v2298_v49 }
 0x474   : > { %2324 = vst [vmem:[%s4367_s28 + $0x30] sm:$0xff] %v2316_v8 }
 0x475   : > { %v2303_v35 = vsel %vm2302_vm3, %v2702_v31, %v2299_v54 }
 0x476   : > { %v2308_v6 = vsel %vm2305_vm4, %v2307_v38, %v2303_v35 }
 0x477   : > { %v2317_v7 = vmul.f32 %v2710_v55, %v2308_v6 }
 0x479   : > { %2325 = vst [vmem:[%s4367_s28 + $0x38] sm:$0xff] %v2317_v7 }
 0x47a   : > { %2858 = shalt.err (!%p2855_p10)
}
 0x47b   : > { %s2930_s1 = smov 256  }
 0x47c   : > { %2520 = dma.vmem_to_hbm [thread:$0]  (%p3077_p3), %s2340_s17, 1024, %s2342_s25, %s2327_s19, %s2930_s1, %s2930_s1, %s2927_s11  }
 0x47d PF: > { %s2356_s4 = sand.u32 1, %s2893_s13   ;;  %p4514_p12 = scmp.ge.s32.totalorder %s2905_s16, 2 }
 0x47e   : > { %s2357_s28 = scalar_lea.sflag [#allocation4], %s2356_s4 }
 0x47f   : > { %p2537_p13 = pnand %p4514_p12, %p3021_p6 }
 0x481   : > { %p2538_p0 = pneg %p2537_p13 }
 0x483   : > { %2888 = dma.done.wait (%p2538_p0), %s2357_s28, 1024  }
 0x484   : > { %2890 = vsyncadd (%p2538_p0), %s2357_s28, 4294966272  ;;  %s4515_s21 = sld [smem:[#allocation15_spill]]  ;;  %p25_p5 = scmp.ge.s32.totalorder %s3059_s29, 4  }
 0x485   : > { %s4516_s13 = smov %s2897_s14  ;;  %s4517_s14 = smov %s2901_s15 }
 0x486   : > { %s4519_s16 = smov %s3059_s29  ;;  %27 = sbr.rel (!%p25_p5) target bundleno = 11 (0xb), region = 137 }
 0x48a   : > { %s4518_s15 = smov %s4515_s21 }
 0x48b   :  { %2363 = vsyncpa [#allocation3], 1 }
 0x48c   :  { %2365 = vsyncpa [#allocation3 + $0x1], 1 }
 0x48d   :  { %2366 = vsyncpa [#allocation6], 1 }
 0x48e   :  { %2367 = vsyncpa [#allocation9], 1 }
 0x48f   :  { %2368 = vsyncpa [#allocation4], 1 }
 0x490   :  { %2370 = vsyncpa [#allocation4 + $0x1], 1 }

</bundles_post_ra>
